<compile_context>
chip_gen: v6e
topology: v6e:2x2x1
jax: 0.10.0
libtpu: 0.0.40
codegen_flags: <defaults>
</compile_context>

<pallas_src>
import functools

import jax
import jax.numpy as jnp
from jax.experimental import pallas as pl
from jax.experimental.pallas import tpu as pltpu


# ------------------------------ fused kernel --------------------------------

def _cos_kernel(x_ref, key_ref, bias_ref, *rest, treedef, num_layers, num_heads,
                batch, eps):
    o_ref = rest[-1]
    stacked = jax.tree_util.tree_unflatten(treedef, [r[...] for r in rest[:-1]])

    B, H = batch, num_heads
    x0 = x_ref[...]                                   # (B*T, E) f32 slab
    E = x0.shape[-1]

    # ---- operands identical for every layer: build once (hoisted) ----------
    key_slab = key_ref[...]                           # (B*S, Kin) f32
    S = key_slab.shape[0] // B
    Kin = key_slab.shape[-1]
    key_bh = jnp.broadcast_to(
        key_slab.astype(jnp.bfloat16).reshape(B, 1, S, Kin),
        (B, H, S, Kin)).reshape(B * H, S, Kin)        # (B*H, S, Kin) bf16
    bias_bh = jnp.broadcast_to(
        bias_ref[...].reshape(B, 1, 1, S),
        (B, H, 1, S)).reshape(B * H, 1, S)            # (B*H, 1, S) f32

    def bh_batch(a):
        """(B*N, D) f32 slab -> (B*H, N, D) bf16, replicated over heads."""
        n, d = a.shape[0] // B, a.shape[1]
        return jnp.broadcast_to(
            a.astype(jnp.bfloat16).reshape(B, 1, n, d),
            (B, H, n, d)).reshape(B * H, n, d)

    def bh_weight(w):
        """(H, d0, d1) head-major weight -> (B*H, d0, d1), replicated over B."""
        return jnp.broadcast_to(
            w[None], (B,) + w.shape).reshape((B * H,) + w.shape[1:])

    def layer_norm(y, g, b):                          # f32 math (v5e-safe)
        mean = jnp.mean(y, axis=-1, keepdims=True)
        cent = y - mean
        var = jnp.mean(cent * cent, axis=-1, keepdims=True)
        return cent * jax.lax.rsqrt(var + eps) * g + b

    def attention(q_in, kv_in, bias, p):
        # Every matmul is one leading-batch einsum over B*H (no head slicing).
        qh = jnp.einsum('bte,bed->btd', q_in, bh_weight(p['wq_h']),
                        preferred_element_type=jnp.float32) + bh_weight(p['bq_h'])
        kh = jnp.einsum('bse,bed->bsd', kv_in, bh_weight(p['wk_h']),
                        preferred_element_type=jnp.float32) + bh_weight(p['bk_h'])
        vh = jnp.einsum('bse,bed->bsd', kv_in, bh_weight(p['wv_h']),
                        preferred_element_type=jnp.float32) + bh_weight(p['bv_h'])
        s = jnp.einsum('btd,bsd->bts', qh, kh,
                       preferred_element_type=jnp.float32)   # (B*H, T, S)
        if bias is not None:
            s = s + bias
        m = jnp.max(s, axis=-1, keepdims=True)
        e = jnp.exp(s - m)
        # approx reciprocal -> EUP slot; ~1e-3 rel. error vs an exact divide.
        probs = e * pl.reciprocal(jnp.sum(e, axis=-1, keepdims=True), approx=True)
        ctx = jnp.einsum('bts,bsd->btd', probs, vh,
                         preferred_element_type=jnp.float32)  # (B*H, T, dh)
        out = jnp.einsum('btd,bde->bte', ctx.astype(jnp.bfloat16),
                         bh_weight(p['wo_h']),
                         preferred_element_type=jnp.float32)  # (B*H, T, E)
        out4 = out.reshape(B, H, -1, E)
        acc = out4[:, 0]                                      # sum over heads
        for hh in range(1, H):                                # (leading-dim adds)
            acc = acc + out4[:, hh]
        return acc.reshape(-1, E) + p['bo']                   # (B*T, E) f32

    def ffn_block(attn_out, resid, p):                        # post-norm block
        h1 = layer_norm(attn_out + resid, p['ln1_g'], p['ln1_b'])
        f = jnp.dot(h1.astype(jnp.bfloat16), p['fc1_w'],
                    preferred_element_type=jnp.float32) + p['fc1_b']
        f = jnp.maximum(f, 0.0)
        f = jnp.dot(f.astype(jnp.bfloat16), p['fc2_w'],
                    preferred_element_type=jnp.float32) + p['fc2_b']
        return layer_norm(f + h1, p['ln2_g'], p['ln2_b'])

    h = x0
    for l in range(num_layers):        # fully unrolled; weights stay in VMEM
        p1 = {k: v[l] for k, v in stacked['ffm1'].items()}
        p2 = {k: v[l] for k, v in stacked['ffm2'].items()}
        # FFM_1: cross-attention fusion block
        attn = attention(bh_batch(h), key_bh, bias_bh, p1)
        h = ffn_block(attn, h, p1)
        # FFM_2: self-attention fusion block (no padding mask)
        xh = bh_batch(h)
        attn = attention(xh, xh, None, p2)
        h = ffn_block(attn, h, p2)

    o_ref[...] = h + x0                # final global residual, fused in-kernel


# --------------------------------- wrapper -----------------------------------

def cos_forward(params, x, k, key_padding_mask, num_heads):
    """x: (T, B, E), k: (S, B, Kin), key_padding_mask: (B, S) bool (True=pad)."""
    T, B, E = x.shape
    S = k.shape[0]
    num_layers = params['ffm1']['wq_h'].shape[0]

    # One transpose at the boundary; the kernel works on (B*T, E)/(B*S, Kin)
    # lane-dense 2-D slabs.
    x_slab = jnp.transpose(x, (1, 0, 2)).reshape(B * T, E)
    k_slab = jnp.transpose(k, (1, 0, 2)).reshape(B * S, k.shape[2])
    bias = jnp.where(key_padding_mask, -1e9, 0.0).astype(jnp.float32).reshape(B, 1, S)

    leaves, treedef = jax.tree_util.tree_flatten(params)
    kernel = functools.partial(
        _cos_kernel, treedef=treedef, num_layers=num_layers,
        num_heads=num_heads, batch=B, eps=1e-5)

    vmem = pl.BlockSpec(memory_space=pltpu.MemorySpace.VMEM)
    out = pl.pallas_call(
        kernel,
        out_shape=jax.ShapeDtypeStruct((B * T, E), jnp.float32),
        in_specs=[vmem] * (3 + len(leaves)),
        out_specs=vmem,
    )(x_slab, k_slab, bias, *leaves)
    return jnp.transpose(out.reshape(B, T, E), (1, 0, 2))     # back to (T, B, E)


# ------------------------------- param setup ---------------------------------

def init_ffm_raw(key, embed_dim, kv_in_dim, ffn_dim):
    ks = jax.random.split(key, 6)

    def lin(kk, din, dout):
        return (0.02 * jax.random.normal(kk, (din, dout), jnp.float32),
                jnp.zeros((dout,), jnp.float32))

    p = {}
    p['wq'], p['bq'] = lin(ks[0], embed_dim, embed_dim)
    p['wk'], p['bk'] = lin(ks[1], kv_in_dim, embed_dim)
    p['wv'], p['bv'] = lin(ks[2], kv_in_dim, embed_dim)
    p['wo'], p['bo'] = lin(ks[3], embed_dim, embed_dim)
    p['fc1_w'], p['fc1_b'] = lin(ks[4], embed_dim, ffn_dim)
    p['fc2_w'], p['fc2_b'] = lin(ks[5], ffn_dim, embed_dim)
    p['ln1_g'] = jnp.ones((embed_dim,), jnp.float32)
    p['ln1_b'] = jnp.zeros((embed_dim,), jnp.float32)
    p['ln2_g'] = jnp.ones((embed_dim,), jnp.float32)
    p['ln2_b'] = jnp.zeros((embed_dim,), jnp.float32)
    return p


def prepare_ffm(raw, num_heads):
    """Pre-permute projections to head-major, fold 1/sqrt(dh), cast to bf16."""
    E = raw['wq'].shape[1]
    dh = E // num_heads
    scale = dh ** -0.5

    def head_major(w):  # (Din, H*dh) -> (H, Din, dh)
        din = w.shape[0]
        return jnp.transpose(w.reshape(din, num_heads, dh), (1, 0, 2))

    return {
        'wq_h': head_major(raw['wq'] * scale).astype(jnp.bfloat16),
        'bq_h': (raw['bq'] * scale).reshape(num_heads, 1, dh),
        'wk_h': head_major(raw['wk']).astype(jnp.bfloat16),
        'bk_h': raw['bk'].reshape(num_heads, 1, dh),
        'wv_h': head_major(raw['wv']).astype(jnp.bfloat16),
        'bv_h': raw['bv'].reshape(num_heads, 1, dh),
        'wo_h': raw['wo'].reshape(num_heads, dh, E).astype(jnp.bfloat16),
        'bo': raw['bo'].reshape(1, E),
        'ln1_g': raw['ln1_g'].reshape(1, E),
        'ln1_b': raw['ln1_b'].reshape(1, E),
        'fc1_w': raw['fc1_w'].astype(jnp.bfloat16),
        'fc1_b': raw['fc1_b'].reshape(1, -1),
        'fc2_w': raw['fc2_w'].astype(jnp.bfloat16),
        'fc2_b': raw['fc2_b'].reshape(1, E),
        'ln2_g': raw['ln2_g'].reshape(1, E),
        'ln2_b': raw['ln2_b'].reshape(1, E),
    }


def stack_layers(dicts):
    """List of per-layer dicts -> dict of layer-stacked arrays (leading L axis)."""
    return {k: jnp.stack([d[k] for d in dicts], axis=0) for k in dicts[0]}


# ----------------------------------- main -------------------------------------

if __name__ == "__main__":
    embed_dim, kdim, ffn_embed_dim = 32, 16, 64
    num_layers, num_heads = 2, 4
    T, S, B = 8, 8, 2

    root = jax.random.PRNGKey(0)
    kx, kk, kp = jax.random.split(root, 3)
    x = jax.random.normal(kx, (T, B, embed_dim), jnp.float32)
    k = jax.random.normal(kk, (S, B, kdim), jnp.float32)
    # last two key positions of every batch element are padding
    key_padding_mask = jnp.zeros((B, S), jnp.bool_).at[:, S - 2:].set(True)

    ffm1_layers, ffm2_layers = [], []
    for i in range(num_layers):
        kl = jax.random.fold_in(kp, i)
        k1, k2 = jax.random.split(kl)
        ffm1_layers.append(prepare_ffm(
            init_ffm_raw(k1, embed_dim, kdim, ffn_embed_dim), num_heads))       # cross
        ffm2_layers.append(prepare_ffm(
            init_ffm_raw(k2, embed_dim, embed_dim, ffn_embed_dim), num_heads))  # self
    params = {'ffm1': stack_layers(ffm1_layers), 'ffm2': stack_layers(ffm2_layers)}

    fwd = jax.jit(functools.partial(cos_forward, num_heads=num_heads))
    out = fwd(params, x, k, key_padding_mask)
    jax.block_until_ready(out)
    assert out.shape == (T, B, embed_dim) and out.dtype == jnp.float32
    assert bool(jnp.isfinite(out).all())
    print("KERNEL_OK")
</pallas_src>

<mosaic_0001>
module attributes {stable_mosaic.version = 11 : i64} {
  func.func @_cos_kernel(%arg0: memref<16x32xf32, #tpu.memory_space<vmem>>, %arg1: memref<16x16xf32, #tpu.memory_space<vmem>>, %arg2: memref<2x1x8xf32, #tpu.memory_space<vmem>>, %arg3: memref<2x4x1x8xf32, #tpu.memory_space<vmem>>, %arg4: memref<2x1x32xf32, #tpu.memory_space<vmem>>, %arg5: memref<2x4x1x8xf32, #tpu.memory_space<vmem>>, %arg6: memref<2x4x1x8xf32, #tpu.memory_space<vmem>>, %arg7: memref<2x1x64xf32, #tpu.memory_space<vmem>>, %arg8: memref<2x32x64xbf16, #tpu.memory_space<vmem>>, %arg9: memref<2x1x32xf32, #tpu.memory_space<vmem>>, %arg10: memref<2x64x32xbf16, #tpu.memory_space<vmem>>, %arg11: memref<2x1x32xf32, #tpu.memory_space<vmem>>, %arg12: memref<2x1x32xf32, #tpu.memory_space<vmem>>, %arg13: memref<2x1x32xf32, #tpu.memory_space<vmem>>, %arg14: memref<2x1x32xf32, #tpu.memory_space<vmem>>, %arg15: memref<2x4x16x8xbf16, #tpu.memory_space<vmem>>, %arg16: memref<2x4x8x32xbf16, #tpu.memory_space<vmem>>, %arg17: memref<2x4x32x8xbf16, #tpu.memory_space<vmem>>, %arg18: memref<2x4x16x8xbf16, #tpu.memory_space<vmem>>, %arg19: memref<2x4x1x8xf32, #tpu.memory_space<vmem>>, %arg20: memref<2x1x32xf32, #tpu.memory_space<vmem>>, %arg21: memref<2x4x1x8xf32, #tpu.memory_space<vmem>>, %arg22: memref<2x4x1x8xf32, #tpu.memory_space<vmem>>, %arg23: memref<2x1x64xf32, #tpu.memory_space<vmem>>, %arg24: memref<2x32x64xbf16, #tpu.memory_space<vmem>>, %arg25: memref<2x1x32xf32, #tpu.memory_space<vmem>>, %arg26: memref<2x64x32xbf16, #tpu.memory_space<vmem>>, %arg27: memref<2x1x32xf32, #tpu.memory_space<vmem>>, %arg28: memref<2x1x32xf32, #tpu.memory_space<vmem>>, %arg29: memref<2x1x32xf32, #tpu.memory_space<vmem>>, %arg30: memref<2x1x32xf32, #tpu.memory_space<vmem>>, %arg31: memref<2x4x32x8xbf16, #tpu.memory_space<vmem>>, %arg32: memref<2x4x8x32xbf16, #tpu.memory_space<vmem>>, %arg33: memref<2x4x32x8xbf16, #tpu.memory_space<vmem>>, %arg34: memref<2x4x32x8xbf16, #tpu.memory_space<vmem>>, %arg35: memref<16x32xf32, #tpu.memory_space<vmem>>) attributes {dimension_semantics = [], scalar_prefetch = 0 : i64, scratch_operands = 0 : i64, tpu.core_type = #tpu.core_type<tc>} {
    %c0 = arith.constant 0 : index
    %c0_0 = arith.constant 0 : index
    %c0_1 = arith.constant 0 : index
    %c0_2 = arith.constant 0 : index
    %0 = vector.load %arg3[%c0, %c0_0, %c0_1, %c0_2] : memref<2x4x1x8xf32, #tpu.memory_space<vmem>>, vector<2x4x1x8xf32>
    %c0_3 = arith.constant 0 : index
    %c0_4 = arith.constant 0 : index
    %c0_5 = arith.constant 0 : index
    %1 = vector.load %arg4[%c0_3, %c0_4, %c0_5] : memref<2x1x32xf32, #tpu.memory_space<vmem>>, vector<2x1x32xf32>
    %c0_6 = arith.constant 0 : index
    %c0_7 = arith.constant 0 : index
    %c0_8 = arith.constant 0 : index
    %c0_9 = arith.constant 0 : index
    %2 = vector.load %arg5[%c0_6, %c0_7, %c0_8, %c0_9] : memref<2x4x1x8xf32, #tpu.memory_space<vmem>>, vector<2x4x1x8xf32>
    %c0_10 = arith.constant 0 : index
    %c0_11 = arith.constant 0 : index
    %c0_12 = arith.constant 0 : index
    %c0_13 = arith.constant 0 : index
    %3 = vector.load %arg6[%c0_10, %c0_11, %c0_12, %c0_13] : memref<2x4x1x8xf32, #tpu.memory_space<vmem>>, vector<2x4x1x8xf32>
    %c0_14 = arith.constant 0 : index
    %c0_15 = arith.constant 0 : index
    %c0_16 = arith.constant 0 : index
    %4 = vector.load %arg7[%c0_14, %c0_15, %c0_16] : memref<2x1x64xf32, #tpu.memory_space<vmem>>, vector<2x1x64xf32>
    %c0_17 = arith.constant 0 : index
    %c0_18 = arith.constant 0 : index
    %c0_19 = arith.constant 0 : index
    %5 = vector.load %arg8[%c0_17, %c0_18, %c0_19] : memref<2x32x64xbf16, #tpu.memory_space<vmem>>, vector<2x32x64xbf16>
    %c0_20 = arith.constant 0 : index
    %c0_21 = arith.constant 0 : index
    %c0_22 = arith.constant 0 : index
    %6 = vector.load %arg9[%c0_20, %c0_21, %c0_22] : memref<2x1x32xf32, #tpu.memory_space<vmem>>, vector<2x1x32xf32>
    %c0_23 = arith.constant 0 : index
    %c0_24 = arith.constant 0 : index
    %c0_25 = arith.constant 0 : index
    %7 = vector.load %arg10[%c0_23, %c0_24, %c0_25] : memref<2x64x32xbf16, #tpu.memory_space<vmem>>, vector<2x64x32xbf16>
    %c0_26 = arith.constant 0 : index
    %c0_27 = arith.constant 0 : index
    %c0_28 = arith.constant 0 : index
    %8 = vector.load %arg11[%c0_26, %c0_27, %c0_28] : memref<2x1x32xf32, #tpu.memory_space<vmem>>, vector<2x1x32xf32>
    %c0_29 = arith.constant 0 : index
    %c0_30 = arith.constant 0 : index
    %c0_31 = arith.constant 0 : index
    %9 = vector.load %arg12[%c0_29, %c0_30, %c0_31] : memref<2x1x32xf32, #tpu.memory_space<vmem>>, vector<2x1x32xf32>
    %c0_32 = arith.constant 0 : index
    %c0_33 = arith.constant 0 : index
    %c0_34 = arith.constant 0 : index
    %10 = vector.load %arg13[%c0_32, %c0_33, %c0_34] : memref<2x1x32xf32, #tpu.memory_space<vmem>>, vector<2x1x32xf32>
    %c0_35 = arith.constant 0 : index
    %c0_36 = arith.constant 0 : index
    %c0_37 = arith.constant 0 : index
    %11 = vector.load %arg14[%c0_35, %c0_36, %c0_37] : memref<2x1x32xf32, #tpu.memory_space<vmem>>, vector<2x1x32xf32>
    %c0_38 = arith.constant 0 : index
    %c0_39 = arith.constant 0 : index
    %c0_40 = arith.constant 0 : index
    %c0_41 = arith.constant 0 : index
    %12 = vector.load %arg15[%c0_38, %c0_39, %c0_40, %c0_41] : memref<2x4x16x8xbf16, #tpu.memory_space<vmem>>, vector<2x4x16x8xbf16>
    %c0_42 = arith.constant 0 : index
    %c0_43 = arith.constant 0 : index
    %c0_44 = arith.constant 0 : index
    %c0_45 = arith.constant 0 : index
    %13 = vector.load %arg16[%c0_42, %c0_43, %c0_44, %c0_45] : memref<2x4x8x32xbf16, #tpu.memory_space<vmem>>, vector<2x4x8x32xbf16>
    %c0_46 = arith.constant 0 : index
    %c0_47 = arith.constant 0 : index
    %c0_48 = arith.constant 0 : index
    %c0_49 = arith.constant 0 : index
    %14 = vector.load %arg17[%c0_46, %c0_47, %c0_48, %c0_49] : memref<2x4x32x8xbf16, #tpu.memory_space<vmem>>, vector<2x4x32x8xbf16>
    %c0_50 = arith.constant 0 : index
    %c0_51 = arith.constant 0 : index
    %c0_52 = arith.constant 0 : index
    %c0_53 = arith.constant 0 : index
    %15 = vector.load %arg18[%c0_50, %c0_51, %c0_52, %c0_53] : memref<2x4x16x8xbf16, #tpu.memory_space<vmem>>, vector<2x4x16x8xbf16>
    %c0_54 = arith.constant 0 : index
    %c0_55 = arith.constant 0 : index
    %c0_56 = arith.constant 0 : index
    %c0_57 = arith.constant 0 : index
    %16 = vector.load %arg19[%c0_54, %c0_55, %c0_56, %c0_57] : memref<2x4x1x8xf32, #tpu.memory_space<vmem>>, vector<2x4x1x8xf32>
    %c0_58 = arith.constant 0 : index
    %c0_59 = arith.constant 0 : index
    %c0_60 = arith.constant 0 : index
    %17 = vector.load %arg20[%c0_58, %c0_59, %c0_60] : memref<2x1x32xf32, #tpu.memory_space<vmem>>, vector<2x1x32xf32>
    %c0_61 = arith.constant 0 : index
    %c0_62 = arith.constant 0 : index
    %c0_63 = arith.constant 0 : index
    %c0_64 = arith.constant 0 : index
    %18 = vector.load %arg21[%c0_61, %c0_62, %c0_63, %c0_64] : memref<2x4x1x8xf32, #tpu.memory_space<vmem>>, vector<2x4x1x8xf32>
    %c0_65 = arith.constant 0 : index
    %c0_66 = arith.constant 0 : index
    %c0_67 = arith.constant 0 : index
    %c0_68 = arith.constant 0 : index
    %19 = vector.load %arg22[%c0_65, %c0_66, %c0_67, %c0_68] : memref<2x4x1x8xf32, #tpu.memory_space<vmem>>, vector<2x4x1x8xf32>
    %c0_69 = arith.constant 0 : index
    %c0_70 = arith.constant 0 : index
    %c0_71 = arith.constant 0 : index
    %20 = vector.load %arg23[%c0_69, %c0_70, %c0_71] : memref<2x1x64xf32, #tpu.memory_space<vmem>>, vector<2x1x64xf32>
    %c0_72 = arith.constant 0 : index
    %c0_73 = arith.constant 0 : index
    %c0_74 = arith.constant 0 : index
    %21 = vector.load %arg24[%c0_72, %c0_73, %c0_74] : memref<2x32x64xbf16, #tpu.memory_space<vmem>>, vector<2x32x64xbf16>
    %c0_75 = arith.constant 0 : index
    %c0_76 = arith.constant 0 : index
    %c0_77 = arith.constant 0 : index
    %22 = vector.load %arg25[%c0_75, %c0_76, %c0_77] : memref<2x1x32xf32, #tpu.memory_space<vmem>>, vector<2x1x32xf32>
    %c0_78 = arith.constant 0 : index
    %c0_79 = arith.constant 0 : index
    %c0_80 = arith.constant 0 : index
    %23 = vector.load %arg26[%c0_78, %c0_79, %c0_80] : memref<2x64x32xbf16, #tpu.memory_space<vmem>>, vector<2x64x32xbf16>
    %c0_81 = arith.constant 0 : index
    %c0_82 = arith.constant 0 : index
    %c0_83 = arith.constant 0 : index
    %24 = vector.load %arg27[%c0_81, %c0_82, %c0_83] : memref<2x1x32xf32, #tpu.memory_space<vmem>>, vector<2x1x32xf32>
    %c0_84 = arith.constant 0 : index
    %c0_85 = arith.constant 0 : index
    %c0_86 = arith.constant 0 : index
    %25 = vector.load %arg28[%c0_84, %c0_85, %c0_86] : memref<2x1x32xf32, #tpu.memory_space<vmem>>, vector<2x1x32xf32>
    %c0_87 = arith.constant 0 : index
    %c0_88 = arith.constant 0 : index
    %c0_89 = arith.constant 0 : index
    %26 = vector.load %arg29[%c0_87, %c0_88, %c0_89] : memref<2x1x32xf32, #tpu.memory_space<vmem>>, vector<2x1x32xf32>
    %c0_90 = arith.constant 0 : index
    %c0_91 = arith.constant 0 : index
    %c0_92 = arith.constant 0 : index
    %27 = vector.load %arg30[%c0_90, %c0_91, %c0_92] : memref<2x1x32xf32, #tpu.memory_space<vmem>>, vector<2x1x32xf32>
    %c0_93 = arith.constant 0 : index
    %c0_94 = arith.constant 0 : index
    %c0_95 = arith.constant 0 : index
    %c0_96 = arith.constant 0 : index
    %28 = vector.load %arg31[%c0_93, %c0_94, %c0_95, %c0_96] : memref<2x4x32x8xbf16, #tpu.memory_space<vmem>>, vector<2x4x32x8xbf16>
    %c0_97 = arith.constant 0 : index
    %c0_98 = arith.constant 0 : index
    %c0_99 = arith.constant 0 : index
    %c0_100 = arith.constant 0 : index
    %29 = vector.load %arg32[%c0_97, %c0_98, %c0_99, %c0_100] : memref<2x4x8x32xbf16, #tpu.memory_space<vmem>>, vector<2x4x8x32xbf16>
    %c0_101 = arith.constant 0 : index
    %c0_102 = arith.constant 0 : index
    %c0_103 = arith.constant 0 : index
    %c0_104 = arith.constant 0 : index
    %30 = vector.load %arg33[%c0_101, %c0_102, %c0_103, %c0_104] : memref<2x4x32x8xbf16, #tpu.memory_space<vmem>>, vector<2x4x32x8xbf16>
    %c0_105 = arith.constant 0 : index
    %c0_106 = arith.constant 0 : index
    %c0_107 = arith.constant 0 : index
    %c0_108 = arith.constant 0 : index
    %31 = vector.load %arg34[%c0_105, %c0_106, %c0_107, %c0_108] : memref<2x4x32x8xbf16, #tpu.memory_space<vmem>>, vector<2x4x32x8xbf16>
    %c0_109 = arith.constant 0 : index
    %c0_110 = arith.constant 0 : index
    %32 = vector.load %arg0[%c0_109, %c0_110] : memref<16x32xf32, #tpu.memory_space<vmem>>, vector<16x32xf32>
    %c0_111 = arith.constant 0 : index
    %c0_112 = arith.constant 0 : index
    %33 = vector.load %arg1[%c0_111, %c0_112] : memref<16x16xf32, #tpu.memory_space<vmem>>, vector<16x16xf32>
    %34 = arith.truncf %33 : vector<16x16xf32> to vector<16x16xbf16>
    %35 = vector.shape_cast %34 : vector<16x16xbf16> to vector<2x1x8x16xbf16>
    %36 = vector.shape_cast %35 : vector<2x1x8x16xbf16> to vector<2x1x8x16xbf16>
    %37 = vector.broadcast %36 : vector<2x1x8x16xbf16> to vector<2x4x8x16xbf16>
    %38 = vector.shape_cast %37 : vector<2x4x8x16xbf16> to vector<8x8x16xbf16>
    %c0_113 = arith.constant 0 : index
    %c0_114 = arith.constant 0 : index
    %c0_115 = arith.constant 0 : index
    %39 = vector.load %arg2[%c0_113, %c0_114, %c0_115] : memref<2x1x8xf32, #tpu.memory_space<vmem>>, vector<2x1x8xf32>
    %40 = vector.shape_cast %39 : vector<2x1x8xf32> to vector<2x1x1x8xf32>
    %41 = vector.shape_cast %40 : vector<2x1x1x8xf32> to vector<2x1x1x8xf32>
    %42 = vector.broadcast %41 : vector<2x1x1x8xf32> to vector<2x4x1x8xf32>
    %43 = vector.shape_cast %42 : vector<2x4x1x8xf32> to vector<8x1x8xf32>
    %44 = vector.extract_strided_slice %0 {offsets = [0, 0, 0, 0], sizes = [1, 4, 1, 8], strides = [1, 1, 1, 1]} : vector<2x4x1x8xf32> to vector<1x4x1x8xf32>
    %45 = vector.shape_cast %44 : vector<1x4x1x8xf32> to vector<4x1x8xf32>
    %46 = vector.extract_strided_slice %1 {offsets = [0, 0, 0], sizes = [1, 1, 32], strides = [1, 1, 1]} : vector<2x1x32xf32> to vector<1x1x32xf32>
    %47 = vector.shape_cast %46 : vector<1x1x32xf32> to vector<1x32xf32>
    %48 = vector.extract_strided_slice %2 {offsets = [0, 0, 0, 0], sizes = [1, 4, 1, 8], strides = [1, 1, 1, 1]} : vector<2x4x1x8xf32> to vector<1x4x1x8xf32>
    %49 = vector.shape_cast %48 : vector<1x4x1x8xf32> to vector<4x1x8xf32>
    %50 = vector.extract_strided_slice %3 {offsets = [0, 0, 0, 0], sizes = [1, 4, 1, 8], strides = [1, 1, 1, 1]} : vector<2x4x1x8xf32> to vector<1x4x1x8xf32>
    %51 = vector.shape_cast %50 : vector<1x4x1x8xf32> to vector<4x1x8xf32>
    %52 = vector.extract_strided_slice %4 {offsets = [0, 0, 0], sizes = [1, 1, 64], strides = [1, 1, 1]} : vector<2x1x64xf32> to vector<1x1x64xf32>
    %53 = vector.shape_cast %52 : vector<1x1x64xf32> to vector<1x64xf32>
    %54 = vector.extract_strided_slice %5 {offsets = [0, 0, 0], sizes = [1, 32, 64], strides = [1, 1, 1]} : vector<2x32x64xbf16> to vector<1x32x64xbf16>
    %55 = vector.shape_cast %54 : vector<1x32x64xbf16> to vector<32x64xbf16>
    %56 = vector.extract_strided_slice %6 {offsets = [0, 0, 0], sizes = [1, 1, 32], strides = [1, 1, 1]} : vector<2x1x32xf32> to vector<1x1x32xf32>
    %57 = vector.shape_cast %56 : vector<1x1x32xf32> to vector<1x32xf32>
    %58 = vector.extract_strided_slice %7 {offsets = [0, 0, 0], sizes = [1, 64, 32], strides = [1, 1, 1]} : vector<2x64x32xbf16> to vector<1x64x32xbf16>
    %59 = vector.shape_cast %58 : vector<1x64x32xbf16> to vector<64x32xbf16>
    %60 = vector.extract_strided_slice %8 {offsets = [0, 0, 0], sizes = [1, 1, 32], strides = [1, 1, 1]} : vector<2x1x32xf32> to vector<1x1x32xf32>
    %61 = vector.shape_cast %60 : vector<1x1x32xf32> to vector<1x32xf32>
    %62 = vector.extract_strided_slice %9 {offsets = [0, 0, 0], sizes = [1, 1, 32], strides = [1, 1, 1]} : vector<2x1x32xf32> to vector<1x1x32xf32>
    %63 = vector.shape_cast %62 : vector<1x1x32xf32> to vector<1x32xf32>
    %64 = vector.extract_strided_slice %10 {offsets = [0, 0, 0], sizes = [1, 1, 32], strides = [1, 1, 1]} : vector<2x1x32xf32> to vector<1x1x32xf32>
    %65 = vector.shape_cast %64 : vector<1x1x32xf32> to vector<1x32xf32>
    %66 = vector.extract_strided_slice %11 {offsets = [0, 0, 0], sizes = [1, 1, 32], strides = [1, 1, 1]} : vector<2x1x32xf32> to vector<1x1x32xf32>
    %67 = vector.shape_cast %66 : vector<1x1x32xf32> to vector<1x32xf32>
    %68 = vector.extract_strided_slice %12 {offsets = [0, 0, 0, 0], sizes = [1, 4, 16, 8], strides = [1, 1, 1, 1]} : vector<2x4x16x8xbf16> to vector<1x4x16x8xbf16>
    %69 = vector.shape_cast %68 : vector<1x4x16x8xbf16> to vector<4x16x8xbf16>
    %70 = vector.extract_strided_slice %13 {offsets = [0, 0, 0, 0], sizes = [1, 4, 8, 32], strides = [1, 1, 1, 1]} : vector<2x4x8x32xbf16> to vector<1x4x8x32xbf16>
    %71 = vector.shape_cast %70 : vector<1x4x8x32xbf16> to vector<4x8x32xbf16>
    %72 = vector.extract_strided_slice %14 {offsets = [0, 0, 0, 0], sizes = [1, 4, 32, 8], strides = [1, 1, 1, 1]} : vector<2x4x32x8xbf16> to vector<1x4x32x8xbf16>
    %73 = vector.shape_cast %72 : vector<1x4x32x8xbf16> to vector<4x32x8xbf16>
    %74 = vector.extract_strided_slice %15 {offsets = [0, 0, 0, 0], sizes = [1, 4, 16, 8], strides = [1, 1, 1, 1]} : vector<2x4x16x8xbf16> to vector<1x4x16x8xbf16>
    %75 = vector.shape_cast %74 : vector<1x4x16x8xbf16> to vector<4x16x8xbf16>
    %76 = vector.extract_strided_slice %16 {offsets = [0, 0, 0, 0], sizes = [1, 4, 1, 8], strides = [1, 1, 1, 1]} : vector<2x4x1x8xf32> to vector<1x4x1x8xf32>
    %77 = vector.shape_cast %76 : vector<1x4x1x8xf32> to vector<4x1x8xf32>
    %78 = vector.extract_strided_slice %17 {offsets = [0, 0, 0], sizes = [1, 1, 32], strides = [1, 1, 1]} : vector<2x1x32xf32> to vector<1x1x32xf32>
    %79 = vector.shape_cast %78 : vector<1x1x32xf32> to vector<1x32xf32>
    %80 = vector.extract_strided_slice %18 {offsets = [0, 0, 0, 0], sizes = [1, 4, 1, 8], strides = [1, 1, 1, 1]} : vector<2x4x1x8xf32> to vector<1x4x1x8xf32>
    %81 = vector.shape_cast %80 : vector<1x4x1x8xf32> to vector<4x1x8xf32>
    %82 = vector.extract_strided_slice %19 {offsets = [0, 0, 0, 0], sizes = [1, 4, 1, 8], strides = [1, 1, 1, 1]} : vector<2x4x1x8xf32> to vector<1x4x1x8xf32>
    %83 = vector.shape_cast %82 : vector<1x4x1x8xf32> to vector<4x1x8xf32>
    %84 = vector.extract_strided_slice %20 {offsets = [0, 0, 0], sizes = [1, 1, 64], strides = [1, 1, 1]} : vector<2x1x64xf32> to vector<1x1x64xf32>
    %85 = vector.shape_cast %84 : vector<1x1x64xf32> to vector<1x64xf32>
    %86 = vector.extract_strided_slice %21 {offsets = [0, 0, 0], sizes = [1, 32, 64], strides = [1, 1, 1]} : vector<2x32x64xbf16> to vector<1x32x64xbf16>
    %87 = vector.shape_cast %86 : vector<1x32x64xbf16> to vector<32x64xbf16>
    %88 = vector.extract_strided_slice %22 {offsets = [0, 0, 0], sizes = [1, 1, 32], strides = [1, 1, 1]} : vector<2x1x32xf32> to vector<1x1x32xf32>
    %89 = vector.shape_cast %88 : vector<1x1x32xf32> to vector<1x32xf32>
    %90 = vector.extract_strided_slice %23 {offsets = [0, 0, 0], sizes = [1, 64, 32], strides = [1, 1, 1]} : vector<2x64x32xbf16> to vector<1x64x32xbf16>
    %91 = vector.shape_cast %90 : vector<1x64x32xbf16> to vector<64x32xbf16>
    %92 = vector.extract_strided_slice %24 {offsets = [0, 0, 0], sizes = [1, 1, 32], strides = [1, 1, 1]} : vector<2x1x32xf32> to vector<1x1x32xf32>
    %93 = vector.shape_cast %92 : vector<1x1x32xf32> to vector<1x32xf32>
    %94 = vector.extract_strided_slice %25 {offsets = [0, 0, 0], sizes = [1, 1, 32], strides = [1, 1, 1]} : vector<2x1x32xf32> to vector<1x1x32xf32>
    %95 = vector.shape_cast %94 : vector<1x1x32xf32> to vector<1x32xf32>
    %96 = vector.extract_strided_slice %26 {offsets = [0, 0, 0], sizes = [1, 1, 32], strides = [1, 1, 1]} : vector<2x1x32xf32> to vector<1x1x32xf32>
    %97 = vector.shape_cast %96 : vector<1x1x32xf32> to vector<1x32xf32>
    %98 = vector.extract_strided_slice %27 {offsets = [0, 0, 0], sizes = [1, 1, 32], strides = [1, 1, 1]} : vector<2x1x32xf32> to vector<1x1x32xf32>
    %99 = vector.shape_cast %98 : vector<1x1x32xf32> to vector<1x32xf32>
    %100 = vector.extract_strided_slice %28 {offsets = [0, 0, 0, 0], sizes = [1, 4, 32, 8], strides = [1, 1, 1, 1]} : vector<2x4x32x8xbf16> to vector<1x4x32x8xbf16>
    %101 = vector.shape_cast %100 : vector<1x4x32x8xbf16> to vector<4x32x8xbf16>
    %102 = vector.extract_strided_slice %29 {offsets = [0, 0, 0, 0], sizes = [1, 4, 8, 32], strides = [1, 1, 1, 1]} : vector<2x4x8x32xbf16> to vector<1x4x8x32xbf16>
    %103 = vector.shape_cast %102 : vector<1x4x8x32xbf16> to vector<4x8x32xbf16>
    %104 = vector.extract_strided_slice %30 {offsets = [0, 0, 0, 0], sizes = [1, 4, 32, 8], strides = [1, 1, 1, 1]} : vector<2x4x32x8xbf16> to vector<1x4x32x8xbf16>
    %105 = vector.shape_cast %104 : vector<1x4x32x8xbf16> to vector<4x32x8xbf16>
    %106 = vector.extract_strided_slice %31 {offsets = [0, 0, 0, 0], sizes = [1, 4, 32, 8], strides = [1, 1, 1, 1]} : vector<2x4x32x8xbf16> to vector<1x4x32x8xbf16>
    %107 = vector.shape_cast %106 : vector<1x4x32x8xbf16> to vector<4x32x8xbf16>
    %108 = arith.truncf %32 : vector<16x32xf32> to vector<16x32xbf16>
    %109 = vector.shape_cast %108 : vector<16x32xbf16> to vector<2x1x8x32xbf16>
    %110 = vector.shape_cast %109 : vector<2x1x8x32xbf16> to vector<2x1x8x32xbf16>
    %111 = vector.broadcast %110 : vector<2x1x8x32xbf16> to vector<2x4x8x32xbf16>
    %112 = vector.shape_cast %111 : vector<2x4x8x32xbf16> to vector<8x8x32xbf16>
    %113 = vector.shape_cast %73 : vector<4x32x8xbf16> to vector<1x4x32x8xbf16>
    %114 = vector.shape_cast %113 : vector<1x4x32x8xbf16> to vector<1x4x32x8xbf16>
    %115 = vector.broadcast %114 : vector<1x4x32x8xbf16> to vector<2x4x32x8xbf16>
    %116 = vector.shape_cast %115 : vector<2x4x32x8xbf16> to vector<8x32x8xbf16>
    "tpu.trace_start"() <{level = 10 : i32, message = "bte,bed->btd"}> : () -> ()
    %cst = arith.constant dense<0.000000e+00> : vector<8x8x8xf32>
    %117 = tpu.matmul %112, %116, %cst {dimension_numbers = #tpu.dot_dimension_numbers<[2], [1], [1], [2], [0, 0, 0, 1, 1, 2], [0], [0]>} : vector<8x8x32xbf16>, vector<8x32x8xbf16>, vector<8x8x8xf32> -> vector<8x8x8xf32>
    "tpu.trace_stop"() : () -> ()
    %118 = vector.shape_cast %49 : vector<4x1x8xf32> to vector<1x4x1x8xf32>
    %119 = vector.shape_cast %118 : vector<1x4x1x8xf32> to vector<1x4x1x8xf32>
    %120 = vector.broadcast %119 : vector<1x4x1x8xf32> to vector<2x4x1x8xf32>
    %121 = vector.shape_cast %120 : vector<2x4x1x8xf32> to vector<8x1x8xf32>
    %122 = vector.broadcast %121 : vector<8x1x8xf32> to vector<8x8x8xf32>
    %123 = arith.addf %117, %122 : vector<8x8x8xf32>
    %124 = vector.shape_cast %69 : vector<4x16x8xbf16> to vector<1x4x16x8xbf16>
    %125 = vector.shape_cast %124 : vector<1x4x16x8xbf16> to vector<1x4x16x8xbf16>
    %126 = vector.broadcast %125 : vector<1x4x16x8xbf16> to vector<2x4x16x8xbf16>
    %127 = vector.shape_cast %126 : vector<2x4x16x8xbf16> to vector<8x16x8xbf16>
    "tpu.trace_start"() <{level = 10 : i32, message = "bse,bed->bsd"}> : () -> ()
    %cst_116 = arith.constant dense<0.000000e+00> : vector<8x8x8xf32>
    %128 = tpu.matmul %38, %127, %cst_116 {dimension_numbers = #tpu.dot_dimension_numbers<[2], [1], [1], [2], [0, 0, 0, 1, 1, 2], [0], [0]>} : vector<8x8x16xbf16>, vector<8x16x8xbf16>, vector<8x8x8xf32> -> vector<8x8x8xf32>
    "tpu.trace_stop"() : () -> ()
    %129 = vector.shape_cast %45 : vector<4x1x8xf32> to vector<1x4x1x8xf32>
    %130 = vector.shape_cast %129 : vector<1x4x1x8xf32> to vector<1x4x1x8xf32>
    %131 = vector.broadcast %130 : vector<1x4x1x8xf32> to vector<2x4x1x8xf32>
    %132 = vector.shape_cast %131 : vector<2x4x1x8xf32> to vector<8x1x8xf32>
    %133 = vector.broadcast %132 : vector<8x1x8xf32> to vector<8x8x8xf32>
    %134 = arith.addf %128, %133 : vector<8x8x8xf32>
    %135 = vector.shape_cast %75 : vector<4x16x8xbf16> to vector<1x4x16x8xbf16>
    %136 = vector.shape_cast %135 : vector<1x4x16x8xbf16> to vector<1x4x16x8xbf16>
    %137 = vector.broadcast %136 : vector<1x4x16x8xbf16> to vector<2x4x16x8xbf16>
    %138 = vector.shape_cast %137 : vector<2x4x16x8xbf16> to vector<8x16x8xbf16>
    "tpu.trace_start"() <{level = 10 : i32, message = "bse,bed->bsd"}> : () -> ()
    %cst_117 = arith.constant dense<0.000000e+00> : vector<8x8x8xf32>
    %139 = tpu.matmul %38, %138, %cst_117 {dimension_numbers = #tpu.dot_dimension_numbers<[2], [1], [1], [2], [0, 0, 0, 1, 1, 2], [0], [0]>} : vector<8x8x16xbf16>, vector<8x16x8xbf16>, vector<8x8x8xf32> -> vector<8x8x8xf32>
    "tpu.trace_stop"() : () -> ()
    %140 = vector.shape_cast %51 : vector<4x1x8xf32> to vector<1x4x1x8xf32>
    %141 = vector.shape_cast %140 : vector<1x4x1x8xf32> to vector<1x4x1x8xf32>
    %142 = vector.broadcast %141 : vector<1x4x1x8xf32> to vector<2x4x1x8xf32>
    %143 = vector.shape_cast %142 : vector<2x4x1x8xf32> to vector<8x1x8xf32>
    %144 = vector.broadcast %143 : vector<8x1x8xf32> to vector<8x8x8xf32>
    %145 = arith.addf %139, %144 : vector<8x8x8xf32>
    "tpu.trace_start"() <{level = 10 : i32, message = "btd,bsd->bts"}> : () -> ()
    %cst_118 = arith.constant dense<0.000000e+00> : vector<8x8x8xf32>
    %146 = tpu.matmul %123, %134, %cst_118 {dimension_numbers = #tpu.dot_dimension_numbers<[2], [2], [1], [1], [0, 0, 0, 1, 1, 1], [0], [0]>} : vector<8x8x8xf32>, vector<8x8x8xf32>, vector<8x8x8xf32> -> vector<8x8x8xf32>
    "tpu.trace_stop"() : () -> ()
    %147 = vector.broadcast %43 : vector<8x1x8xf32> to vector<8x8x8xf32>
    %148 = arith.addf %146, %147 : vector<8x8x8xf32>
    %cst_119 = arith.constant dense<0xFF800000> : vector<8x8xf32>
    %149 = vector.multi_reduction <maximumf>, %148, %cst_119 [2] : vector<8x8x8xf32> to vector<8x8xf32>
    %150 = vector.shape_cast %149 : vector<8x8xf32> to vector<8x8x1xf32>
    %151 = vector.broadcast %150 : vector<8x8x1xf32> to vector<8x8x8xf32>
    %152 = arith.subf %148, %151 : vector<8x8x8xf32>
    %153 = math.exp %152 : vector<8x8x8xf32>
    %cst_120 = arith.constant dense<0.000000e+00> : vector<8x8xf32>
    %154 = vector.multi_reduction <add>, %153, %cst_120 [2] : vector<8x8x8xf32> to vector<8x8xf32>
    %155 = vector.shape_cast %154 : vector<8x8xf32> to vector<8x8x1xf32>
    %156 = tpu.reciprocal %155 {approx = true} : vector<8x8x1xf32> -> vector<8x8x1xf32>
    %157 = vector.broadcast %156 : vector<8x8x1xf32> to vector<8x8x8xf32>
    %158 = arith.mulf %153, %157 : vector<8x8x8xf32>
    "tpu.trace_start"() <{level = 10 : i32, message = "bts,bsd->btd"}> : () -> ()
    %cst_121 = arith.constant dense<0.000000e+00> : vector<8x8x8xf32>
    %159 = tpu.matmul %158, %145, %cst_121 {dimension_numbers = #tpu.dot_dimension_numbers<[2], [1], [1], [2], [0, 0, 0, 1, 1, 2], [0], [0]>} : vector<8x8x8xf32>, vector<8x8x8xf32>, vector<8x8x8xf32> -> vector<8x8x8xf32>
    "tpu.trace_stop"() : () -> ()
    %160 = arith.truncf %159 : vector<8x8x8xf32> to vector<8x8x8xbf16>
    %161 = vector.shape_cast %71 : vector<4x8x32xbf16> to vector<1x4x8x32xbf16>
    %162 = vector.shape_cast %161 : vector<1x4x8x32xbf16> to vector<1x4x8x32xbf16>
    %163 = vector.broadcast %162 : vector<1x4x8x32xbf16> to vector<2x4x8x32xbf16>
    %164 = vector.shape_cast %163 : vector<2x4x8x32xbf16> to vector<8x8x32xbf16>
    "tpu.trace_start"() <{level = 10 : i32, message = "btd,bde->bte"}> : () -> ()
    %cst_122 = arith.constant dense<0.000000e+00> : vector<8x8x32xf32>
    %165 = tpu.matmul %160, %164, %cst_122 {dimension_numbers = #tpu.dot_dimension_numbers<[2], [1], [1], [2], [0, 0, 0, 1, 1, 2], [0], [0]>} : vector<8x8x8xbf16>, vector<8x8x32xbf16>, vector<8x8x32xf32> -> vector<8x8x32xf32>
    "tpu.trace_stop"() : () -> ()
    %166 = vector.shape_cast %165 : vector<8x8x32xf32> to vector<2x4x8x32xf32>
    %167 = vector.extract_strided_slice %166 {offsets = [0, 0, 0, 0], sizes = [2, 1, 8, 32], strides = [1, 1, 1, 1]} : vector<2x4x8x32xf32> to vector<2x1x8x32xf32>
    %168 = vector.shape_cast %167 : vector<2x1x8x32xf32> to vector<2x8x32xf32>
    %169 = vector.extract_strided_slice %166 {offsets = [0, 1, 0, 0], sizes = [2, 1, 8, 32], strides = [1, 1, 1, 1]} : vector<2x4x8x32xf32> to vector<2x1x8x32xf32>
    %170 = vector.shape_cast %169 : vector<2x1x8x32xf32> to vector<2x8x32xf32>
    %171 = arith.addf %168, %170 : vector<2x8x32xf32>
    %172 = vector.extract_strided_slice %166 {offsets = [0, 2, 0, 0], sizes = [2, 1, 8, 32], strides = [1, 1, 1, 1]} : vector<2x4x8x32xf32> to vector<2x1x8x32xf32>
    %173 = vector.shape_cast %172 : vector<2x1x8x32xf32> to vector<2x8x32xf32>
    %174 = arith.addf %171, %173 : vector<2x8x32xf32>
    %175 = vector.extract_strided_slice %166 {offsets = [0, 3, 0, 0], sizes = [2, 1, 8, 32], strides = [1, 1, 1, 1]} : vector<2x4x8x32xf32> to vector<2x1x8x32xf32>
    %176 = vector.shape_cast %175 : vector<2x1x8x32xf32> to vector<2x8x32xf32>
    %177 = arith.addf %174, %176 : vector<2x8x32xf32>
    %178 = vector.shape_cast %177 : vector<2x8x32xf32> to vector<16x32xf32>
    %179 = vector.broadcast %47 : vector<1x32xf32> to vector<16x32xf32>
    %180 = arith.addf %178, %179 : vector<16x32xf32>
    %181 = arith.addf %180, %32 : vector<16x32xf32>
    %cst_123 = arith.constant dense<0.000000e+00> : vector<16xf32>
    %182 = vector.multi_reduction <add>, %181, %cst_123 [1] : vector<16x32xf32> to vector<16xf32>
    %183 = vector.shape_cast %182 : vector<16xf32> to vector<16x1xf32>
    %cst_124 = arith.constant 3.200000e+01 : f32
    %184 = vector.broadcast %cst_124 : f32 to vector<16x1xf32>
    %185 = arith.divf %183, %184 : vector<16x1xf32>
    %186 = vector.broadcast %185 : vector<16x1xf32> to vector<16x32xf32>
    %187 = arith.subf %181, %186 : vector<16x32xf32>
    %188 = arith.mulf %187, %187 : vector<16x32xf32>
    %cst_125 = arith.constant dense<0.000000e+00> : vector<16xf32>
    %189 = vector.multi_reduction <add>, %188, %cst_125 [1] : vector<16x32xf32> to vector<16xf32>
    %190 = vector.shape_cast %189 : vector<16xf32> to vector<16x1xf32>
    %cst_126 = arith.constant 3.200000e+01 : f32
    %191 = vector.broadcast %cst_126 : f32 to vector<16x1xf32>
    %192 = arith.divf %190, %191 : vector<16x1xf32>
    %cst_127 = arith.constant 9.99999974E-6 : f32
    %193 = vector.broadcast %cst_127 : f32 to vector<16x1xf32>
    %194 = arith.addf %192, %193 : vector<16x1xf32>
    %195 = math.rsqrt %194 : vector<16x1xf32>
    %196 = vector.broadcast %195 : vector<16x1xf32> to vector<16x32xf32>
    %197 = arith.mulf %187, %196 : vector<16x32xf32>
    %198 = vector.broadcast %63 : vector<1x32xf32> to vector<16x32xf32>
    %199 = arith.mulf %197, %198 : vector<16x32xf32>
    %200 = vector.broadcast %61 : vector<1x32xf32> to vector<16x32xf32>
    %201 = arith.addf %199, %200 : vector<16x32xf32>
    %202 = arith.truncf %201 : vector<16x32xf32> to vector<16x32xbf16>
    %cst_128 = arith.constant dense<0.000000e+00> : vector<16x64xf32>
    %203 = tpu.matmul %202, %55, %cst_128 {dimension_numbers = #tpu.dot_dimension_numbers<[1], [0], [0], [1], [0, 0, 1, 1], [], []>} : vector<16x32xbf16>, vector<32x64xbf16>, vector<16x64xf32> -> vector<16x64xf32>
    %204 = vector.broadcast %53 : vector<1x64xf32> to vector<16x64xf32>
    %205 = arith.addf %203, %204 : vector<16x64xf32>
    %cst_129 = arith.constant 0.000000e+00 : f32
    %206 = vector.broadcast %cst_129 : f32 to vector<16x64xf32>
    %207 = arith.maximumf %205, %206 : vector<16x64xf32>
    %208 = arith.truncf %207 : vector<16x64xf32> to vector<16x64xbf16>
    %cst_130 = arith.constant dense<0.000000e+00> : vector<16x32xf32>
    %209 = tpu.matmul %208, %59, %cst_130 {dimension_numbers = #tpu.dot_dimension_numbers<[1], [0], [0], [1], [0, 0, 1, 1], [], []>} : vector<16x64xbf16>, vector<64x32xbf16>, vector<16x32xf32> -> vector<16x32xf32>
    %210 = vector.broadcast %57 : vector<1x32xf32> to vector<16x32xf32>
    %211 = arith.addf %209, %210 : vector<16x32xf32>
    %212 = arith.addf %211, %201 : vector<16x32xf32>
    %cst_131 = arith.constant dense<0.000000e+00> : vector<16xf32>
    %213 = vector.multi_reduction <add>, %212, %cst_131 [1] : vector<16x32xf32> to vector<16xf32>
    %214 = vector.shape_cast %213 : vector<16xf32> to vector<16x1xf32>
    %cst_132 = arith.constant 3.200000e+01 : f32
    %215 = vector.broadcast %cst_132 : f32 to vector<16x1xf32>
    %216 = arith.divf %214, %215 : vector<16x1xf32>
    %217 = vector.broadcast %216 : vector<16x1xf32> to vector<16x32xf32>
    %218 = arith.subf %212, %217 : vector<16x32xf32>
    %219 = arith.mulf %218, %218 : vector<16x32xf32>
    %cst_133 = arith.constant dense<0.000000e+00> : vector<16xf32>
    %220 = vector.multi_reduction <add>, %219, %cst_133 [1] : vector<16x32xf32> to vector<16xf32>
    %221 = vector.shape_cast %220 : vector<16xf32> to vector<16x1xf32>
    %cst_134 = arith.constant 3.200000e+01 : f32
    %222 = vector.broadcast %cst_134 : f32 to vector<16x1xf32>
    %223 = arith.divf %221, %222 : vector<16x1xf32>
    %cst_135 = arith.constant 9.99999974E-6 : f32
    %224 = vector.broadcast %cst_135 : f32 to vector<16x1xf32>
    %225 = arith.addf %223, %224 : vector<16x1xf32>
    %226 = math.rsqrt %225 : vector<16x1xf32>
    %227 = vector.broadcast %226 : vector<16x1xf32> to vector<16x32xf32>
    %228 = arith.mulf %218, %227 : vector<16x32xf32>
    %229 = vector.broadcast %67 : vector<1x32xf32> to vector<16x32xf32>
    %230 = arith.mulf %228, %229 : vector<16x32xf32>
    %231 = vector.broadcast %65 : vector<1x32xf32> to vector<16x32xf32>
    %232 = arith.addf %230, %231 : vector<16x32xf32>
    %233 = arith.truncf %232 : vector<16x32xf32> to vector<16x32xbf16>
    %234 = vector.shape_cast %233 : vector<16x32xbf16> to vector<2x1x8x32xbf16>
    %235 = vector.shape_cast %234 : vector<2x1x8x32xbf16> to vector<2x1x8x32xbf16>
    %236 = vector.broadcast %235 : vector<2x1x8x32xbf16> to vector<2x4x8x32xbf16>
    %237 = vector.shape_cast %236 : vector<2x4x8x32xbf16> to vector<8x8x32xbf16>
    %238 = vector.shape_cast %105 : vector<4x32x8xbf16> to vector<1x4x32x8xbf16>
    %239 = vector.shape_cast %238 : vector<1x4x32x8xbf16> to vector<1x4x32x8xbf16>
    %240 = vector.broadcast %239 : vector<1x4x32x8xbf16> to vector<2x4x32x8xbf16>
    %241 = vector.shape_cast %240 : vector<2x4x32x8xbf16> to vector<8x32x8xbf16>
    "tpu.trace_start"() <{level = 10 : i32, message = "bte,bed->btd"}> : () -> ()
    %cst_136 = arith.constant dense<0.000000e+00> : vector<8x8x8xf32>
    %242 = tpu.matmul %237, %241, %cst_136 {dimension_numbers = #tpu.dot_dimension_numbers<[2], [1], [1], [2], [0, 0, 0, 1, 1, 2], [0], [0]>} : vector<8x8x32xbf16>, vector<8x32x8xbf16>, vector<8x8x8xf32> -> vector<8x8x8xf32>
    "tpu.trace_stop"() : () -> ()
    %243 = vector.shape_cast %81 : vector<4x1x8xf32> to vector<1x4x1x8xf32>
    %244 = vector.shape_cast %243 : vector<1x4x1x8xf32> to vector<1x4x1x8xf32>
    %245 = vector.broadcast %244 : vector<1x4x1x8xf32> to vector<2x4x1x8xf32>
    %246 = vector.shape_cast %245 : vector<2x4x1x8xf32> to vector<8x1x8xf32>
    %247 = vector.broadcast %246 : vector<8x1x8xf32> to vector<8x8x8xf32>
    %248 = arith.addf %242, %247 : vector<8x8x8xf32>
    %249 = vector.shape_cast %101 : vector<4x32x8xbf16> to vector<1x4x32x8xbf16>
    %250 = vector.shape_cast %249 : vector<1x4x32x8xbf16> to vector<1x4x32x8xbf16>
    %251 = vector.broadcast %250 : vector<1x4x32x8xbf16> to vector<2x4x32x8xbf16>
    %252 = vector.shape_cast %251 : vector<2x4x32x8xbf16> to vector<8x32x8xbf16>
    "tpu.trace_start"() <{level = 10 : i32, message = "bse,bed->bsd"}> : () -> ()
    %cst_137 = arith.constant dense<0.000000e+00> : vector<8x8x8xf32>
    %253 = tpu.matmul %237, %252, %cst_137 {dimension_numbers = #tpu.dot_dimension_numbers<[2], [1], [1], [2], [0, 0, 0, 1, 1, 2], [0], [0]>} : vector<8x8x32xbf16>, vector<8x32x8xbf16>, vector<8x8x8xf32> -> vector<8x8x8xf32>
    "tpu.trace_stop"() : () -> ()
    %254 = vector.shape_cast %77 : vector<4x1x8xf32> to vector<1x4x1x8xf32>
    %255 = vector.shape_cast %254 : vector<1x4x1x8xf32> to vector<1x4x1x8xf32>
    %256 = vector.broadcast %255 : vector<1x4x1x8xf32> to vector<2x4x1x8xf32>
    %257 = vector.shape_cast %256 : vector<2x4x1x8xf32> to vector<8x1x8xf32>
    %258 = vector.broadcast %257 : vector<8x1x8xf32> to vector<8x8x8xf32>
    %259 = arith.addf %253, %258 : vector<8x8x8xf32>
    %260 = vector.shape_cast %107 : vector<4x32x8xbf16> to vector<1x4x32x8xbf16>
    %261 = vector.shape_cast %260 : vector<1x4x32x8xbf16> to vector<1x4x32x8xbf16>
    %262 = vector.broadcast %261 : vector<1x4x32x8xbf16> to vector<2x4x32x8xbf16>
    %263 = vector.shape_cast %262 : vector<2x4x32x8xbf16> to vector<8x32x8xbf16>
    "tpu.trace_start"() <{level = 10 : i32, message = "bse,bed->bsd"}> : () -> ()
    %cst_138 = arith.constant dense<0.000000e+00> : vector<8x8x8xf32>
    %264 = tpu.matmul %237, %263, %cst_138 {dimension_numbers = #tpu.dot_dimension_numbers<[2], [1], [1], [2], [0, 0, 0, 1, 1, 2], [0], [0]>} : vector<8x8x32xbf16>, vector<8x32x8xbf16>, vector<8x8x8xf32> -> vector<8x8x8xf32>
    "tpu.trace_stop"() : () -> ()
    %265 = vector.shape_cast %83 : vector<4x1x8xf32> to vector<1x4x1x8xf32>
    %266 = vector.shape_cast %265 : vector<1x4x1x8xf32> to vector<1x4x1x8xf32>
    %267 = vector.broadcast %266 : vector<1x4x1x8xf32> to vector<2x4x1x8xf32>
    %268 = vector.shape_cast %267 : vector<2x4x1x8xf32> to vector<8x1x8xf32>
    %269 = vector.broadcast %268 : vector<8x1x8xf32> to vector<8x8x8xf32>
    %270 = arith.addf %264, %269 : vector<8x8x8xf32>
    "tpu.trace_start"() <{level = 10 : i32, message = "btd,bsd->bts"}> : () -> ()
    %cst_139 = arith.constant dense<0.000000e+00> : vector<8x8x8xf32>
    %271 = tpu.matmul %248, %259, %cst_139 {dimension_numbers = #tpu.dot_dimension_numbers<[2], [2], [1], [1], [0, 0, 0, 1, 1, 1], [0], [0]>} : vector<8x8x8xf32>, vector<8x8x8xf32>, vector<8x8x8xf32> -> vector<8x8x8xf32>
    "tpu.trace_stop"() : () -> ()
    %cst_140 = arith.constant dense<0xFF800000> : vector<8x8xf32>
    %272 = vector.multi_reduction <maximumf>, %271, %cst_140 [2] : vector<8x8x8xf32> to vector<8x8xf32>
    %273 = vector.shape_cast %272 : vector<8x8xf32> to vector<8x8x1xf32>
    %274 = vector.broadcast %273 : vector<8x8x1xf32> to vector<8x8x8xf32>
    %275 = arith.subf %271, %274 : vector<8x8x8xf32>
    %276 = math.exp %275 : vector<8x8x8xf32>
    %cst_141 = arith.constant dense<0.000000e+00> : vector<8x8xf32>
    %277 = vector.multi_reduction <add>, %276, %cst_141 [2] : vector<8x8x8xf32> to vector<8x8xf32>
    %278 = vector.shape_cast %277 : vector<8x8xf32> to vector<8x8x1xf32>
    %279 = tpu.reciprocal %278 {approx = true} : vector<8x8x1xf32> -> vector<8x8x1xf32>
    %280 = vector.broadcast %279 : vector<8x8x1xf32> to vector<8x8x8xf32>
    %281 = arith.mulf %276, %280 : vector<8x8x8xf32>
    "tpu.trace_start"() <{level = 10 : i32, message = "bts,bsd->btd"}> : () -> ()
    %cst_142 = arith.constant dense<0.000000e+00> : vector<8x8x8xf32>
    %282 = tpu.matmul %281, %270, %cst_142 {dimension_numbers = #tpu.dot_dimension_numbers<[2], [1], [1], [2], [0, 0, 0, 1, 1, 2], [0], [0]>} : vector<8x8x8xf32>, vector<8x8x8xf32>, vector<8x8x8xf32> -> vector<8x8x8xf32>
    "tpu.trace_stop"() : () -> ()
    %283 = arith.truncf %282 : vector<8x8x8xf32> to vector<8x8x8xbf16>
    %284 = vector.shape_cast %103 : vector<4x8x32xbf16> to vector<1x4x8x32xbf16>
    %285 = vector.shape_cast %284 : vector<1x4x8x32xbf16> to vector<1x4x8x32xbf16>
    %286 = vector.broadcast %285 : vector<1x4x8x32xbf16> to vector<2x4x8x32xbf16>
    %287 = vector.shape_cast %286 : vector<2x4x8x32xbf16> to vector<8x8x32xbf16>
    "tpu.trace_start"() <{level = 10 : i32, message = "btd,bde->bte"}> : () -> ()
    %cst_143 = arith.constant dense<0.000000e+00> : vector<8x8x32xf32>
    %288 = tpu.matmul %283, %287, %cst_143 {dimension_numbers = #tpu.dot_dimension_numbers<[2], [1], [1], [2], [0, 0, 0, 1, 1, 2], [0], [0]>} : vector<8x8x8xbf16>, vector<8x8x32xbf16>, vector<8x8x32xf32> -> vector<8x8x32xf32>
    "tpu.trace_stop"() : () -> ()
    %289 = vector.shape_cast %288 : vector<8x8x32xf32> to vector<2x4x8x32xf32>
    %290 = vector.extract_strided_slice %289 {offsets = [0, 0, 0, 0], sizes = [2, 1, 8, 32], strides = [1, 1, 1, 1]} : vector<2x4x8x32xf32> to vector<2x1x8x32xf32>
    %291 = vector.shape_cast %290 : vector<2x1x8x32xf32> to vector<2x8x32xf32>
    %292 = vector.extract_strided_slice %289 {offsets = [0, 1, 0, 0], sizes = [2, 1, 8, 32], strides = [1, 1, 1, 1]} : vector<2x4x8x32xf32> to vector<2x1x8x32xf32>
    %293 = vector.shape_cast %292 : vector<2x1x8x32xf32> to vector<2x8x32xf32>
    %294 = arith.addf %291, %293 : vector<2x8x32xf32>
    %295 = vector.extract_strided_slice %289 {offsets = [0, 2, 0, 0], sizes = [2, 1, 8, 32], strides = [1, 1, 1, 1]} : vector<2x4x8x32xf32> to vector<2x1x8x32xf32>
    %296 = vector.shape_cast %295 : vector<2x1x8x32xf32> to vector<2x8x32xf32>
    %297 = arith.addf %294, %296 : vector<2x8x32xf32>
    %298 = vector.extract_strided_slice %289 {offsets = [0, 3, 0, 0], sizes = [2, 1, 8, 32], strides = [1, 1, 1, 1]} : vector<2x4x8x32xf32> to vector<2x1x8x32xf32>
    %299 = vector.shape_cast %298 : vector<2x1x8x32xf32> to vector<2x8x32xf32>
    %300 = arith.addf %297, %299 : vector<2x8x32xf32>
    %301 = vector.shape_cast %300 : vector<2x8x32xf32> to vector<16x32xf32>
    %302 = vector.broadcast %79 : vector<1x32xf32> to vector<16x32xf32>
    %303 = arith.addf %301, %302 : vector<16x32xf32>
    %304 = arith.addf %303, %232 : vector<16x32xf32>
    %cst_144 = arith.constant dense<0.000000e+00> : vector<16xf32>
    %305 = vector.multi_reduction <add>, %304, %cst_144 [1] : vector<16x32xf32> to vector<16xf32>
    %306 = vector.shape_cast %305 : vector<16xf32> to vector<16x1xf32>
    %cst_145 = arith.constant 3.200000e+01 : f32
    %307 = vector.broadcast %cst_145 : f32 to vector<16x1xf32>
    %308 = arith.divf %306, %307 : vector<16x1xf32>
    %309 = vector.broadcast %308 : vector<16x1xf32> to vector<16x32xf32>
    %310 = arith.subf %304, %309 : vector<16x32xf32>
    %311 = arith.mulf %310, %310 : vector<16x32xf32>
    %cst_146 = arith.constant dense<0.000000e+00> : vector<16xf32>
    %312 = vector.multi_reduction <add>, %311, %cst_146 [1] : vector<16x32xf32> to vector<16xf32>
    %313 = vector.shape_cast %312 : vector<16xf32> to vector<16x1xf32>
    %cst_147 = arith.constant 3.200000e+01 : f32
    %314 = vector.broadcast %cst_147 : f32 to vector<16x1xf32>
    %315 = arith.divf %313, %314 : vector<16x1xf32>
    %cst_148 = arith.constant 9.99999974E-6 : f32
    %316 = vector.broadcast %cst_148 : f32 to vector<16x1xf32>
    %317 = arith.addf %315, %316 : vector<16x1xf32>
    %318 = math.rsqrt %317 : vector<16x1xf32>
    %319 = vector.broadcast %318 : vector<16x1xf32> to vector<16x32xf32>
    %320 = arith.mulf %310, %319 : vector<16x32xf32>
    %321 = vector.broadcast %95 : vector<1x32xf32> to vector<16x32xf32>
    %322 = arith.mulf %320, %321 : vector<16x32xf32>
    %323 = vector.broadcast %93 : vector<1x32xf32> to vector<16x32xf32>
    %324 = arith.addf %322, %323 : vector<16x32xf32>
    %325 = arith.truncf %324 : vector<16x32xf32> to vector<16x32xbf16>
    %cst_149 = arith.constant dense<0.000000e+00> : vector<16x64xf32>
    %326 = tpu.matmul %325, %87, %cst_149 {dimension_numbers = #tpu.dot_dimension_numbers<[1], [0], [0], [1], [0, 0, 1, 1], [], []>} : vector<16x32xbf16>, vector<32x64xbf16>, vector<16x64xf32> -> vector<16x64xf32>
    %327 = vector.broadcast %85 : vector<1x64xf32> to vector<16x64xf32>
    %328 = arith.addf %326, %327 : vector<16x64xf32>
    %cst_150 = arith.constant 0.000000e+00 : f32
    %329 = vector.broadcast %cst_150 : f32 to vector<16x64xf32>
    %330 = arith.maximumf %328, %329 : vector<16x64xf32>
    %331 = arith.truncf %330 : vector<16x64xf32> to vector<16x64xbf16>
    %cst_151 = arith.constant dense<0.000000e+00> : vector<16x32xf32>
    %332 = tpu.matmul %331, %91, %cst_151 {dimension_numbers = #tpu.dot_dimension_numbers<[1], [0], [0], [1], [0, 0, 1, 1], [], []>} : vector<16x64xbf16>, vector<64x32xbf16>, vector<16x32xf32> -> vector<16x32xf32>
    %333 = vector.broadcast %89 : vector<1x32xf32> to vector<16x32xf32>
    %334 = arith.addf %332, %333 : vector<16x32xf32>
    %335 = arith.addf %334, %324 : vector<16x32xf32>
    %cst_152 = arith.constant dense<0.000000e+00> : vector<16xf32>
    %336 = vector.multi_reduction <add>, %335, %cst_152 [1] : vector<16x32xf32> to vector<16xf32>
    %337 = vector.shape_cast %336 : vector<16xf32> to vector<16x1xf32>
    %cst_153 = arith.constant 3.200000e+01 : f32
    %338 = vector.broadcast %cst_153 : f32 to vector<16x1xf32>
    %339 = arith.divf %337, %338 : vector<16x1xf32>
    %340 = vector.broadcast %339 : vector<16x1xf32> to vector<16x32xf32>
    %341 = arith.subf %335, %340 : vector<16x32xf32>
    %342 = arith.mulf %341, %341 : vector<16x32xf32>
    %cst_154 = arith.constant dense<0.000000e+00> : vector<16xf32>
    %343 = vector.multi_reduction <add>, %342, %cst_154 [1] : vector<16x32xf32> to vector<16xf32>
    %344 = vector.shape_cast %343 : vector<16xf32> to vector<16x1xf32>
    %cst_155 = arith.constant 3.200000e+01 : f32
    %345 = vector.broadcast %cst_155 : f32 to vector<16x1xf32>
    %346 = arith.divf %344, %345 : vector<16x1xf32>
    %cst_156 = arith.constant 9.99999974E-6 : f32
    %347 = vector.broadcast %cst_156 : f32 to vector<16x1xf32>
    %348 = arith.addf %346, %347 : vector<16x1xf32>
    %349 = math.rsqrt %348 : vector<16x1xf32>
    %350 = vector.broadcast %349 : vector<16x1xf32> to vector<16x32xf32>
    %351 = arith.mulf %341, %350 : vector<16x32xf32>
    %352 = vector.broadcast %99 : vector<1x32xf32> to vector<16x32xf32>
    %353 = arith.mulf %351, %352 : vector<16x32xf32>
    %354 = vector.broadcast %97 : vector<1x32xf32> to vector<16x32xf32>
    %355 = arith.addf %353, %354 : vector<16x32xf32>
    %356 = vector.extract_strided_slice %0 {offsets = [1, 0, 0, 0], sizes = [1, 4, 1, 8], strides = [1, 1, 1, 1]} : vector<2x4x1x8xf32> to vector<1x4x1x8xf32>
    %357 = vector.shape_cast %356 : vector<1x4x1x8xf32> to vector<4x1x8xf32>
    %358 = vector.extract_strided_slice %1 {offsets = [1, 0, 0], sizes = [1, 1, 32], strides = [1, 1, 1]} : vector<2x1x32xf32> to vector<1x1x32xf32>
    %359 = vector.shape_cast %358 : vector<1x1x32xf32> to vector<1x32xf32>
    %360 = vector.extract_strided_slice %2 {offsets = [1, 0, 0, 0], sizes = [1, 4, 1, 8], strides = [1, 1, 1, 1]} : vector<2x4x1x8xf32> to vector<1x4x1x8xf32>
    %361 = vector.shape_cast %360 : vector<1x4x1x8xf32> to vector<4x1x8xf32>
    %362 = vector.extract_strided_slice %3 {offsets = [1, 0, 0, 0], sizes = [1, 4, 1, 8], strides = [1, 1, 1, 1]} : vector<2x4x1x8xf32> to vector<1x4x1x8xf32>
    %363 = vector.shape_cast %362 : vector<1x4x1x8xf32> to vector<4x1x8xf32>
    %364 = vector.extract_strided_slice %4 {offsets = [1, 0, 0], sizes = [1, 1, 64], strides = [1, 1, 1]} : vector<2x1x64xf32> to vector<1x1x64xf32>
    %365 = vector.shape_cast %364 : vector<1x1x64xf32> to vector<1x64xf32>
    %366 = vector.extract_strided_slice %5 {offsets = [1, 0, 0], sizes = [1, 32, 64], strides = [1, 1, 1]} : vector<2x32x64xbf16> to vector<1x32x64xbf16>
    %367 = vector.shape_cast %366 : vector<1x32x64xbf16> to vector<32x64xbf16>
    %368 = vector.extract_strided_slice %6 {offsets = [1, 0, 0], sizes = [1, 1, 32], strides = [1, 1, 1]} : vector<2x1x32xf32> to vector<1x1x32xf32>
    %369 = vector.shape_cast %368 : vector<1x1x32xf32> to vector<1x32xf32>
    %370 = vector.extract_strided_slice %7 {offsets = [1, 0, 0], sizes = [1, 64, 32], strides = [1, 1, 1]} : vector<2x64x32xbf16> to vector<1x64x32xbf16>
    %371 = vector.shape_cast %370 : vector<1x64x32xbf16> to vector<64x32xbf16>
    %372 = vector.extract_strided_slice %8 {offsets = [1, 0, 0], sizes = [1, 1, 32], strides = [1, 1, 1]} : vector<2x1x32xf32> to vector<1x1x32xf32>
    %373 = vector.shape_cast %372 : vector<1x1x32xf32> to vector<1x32xf32>
    %374 = vector.extract_strided_slice %9 {offsets = [1, 0, 0], sizes = [1, 1, 32], strides = [1, 1, 1]} : vector<2x1x32xf32> to vector<1x1x32xf32>
    %375 = vector.shape_cast %374 : vector<1x1x32xf32> to vector<1x32xf32>
    %376 = vector.extract_strided_slice %10 {offsets = [1, 0, 0], sizes = [1, 1, 32], strides = [1, 1, 1]} : vector<2x1x32xf32> to vector<1x1x32xf32>
    %377 = vector.shape_cast %376 : vector<1x1x32xf32> to vector<1x32xf32>
    %378 = vector.extract_strided_slice %11 {offsets = [1, 0, 0], sizes = [1, 1, 32], strides = [1, 1, 1]} : vector<2x1x32xf32> to vector<1x1x32xf32>
    %379 = vector.shape_cast %378 : vector<1x1x32xf32> to vector<1x32xf32>
    %380 = vector.extract_strided_slice %12 {offsets = [1, 0, 0, 0], sizes = [1, 4, 16, 8], strides = [1, 1, 1, 1]} : vector<2x4x16x8xbf16> to vector<1x4x16x8xbf16>
    %381 = vector.shape_cast %380 : vector<1x4x16x8xbf16> to vector<4x16x8xbf16>
    %382 = vector.extract_strided_slice %13 {offsets = [1, 0, 0, 0], sizes = [1, 4, 8, 32], strides = [1, 1, 1, 1]} : vector<2x4x8x32xbf16> to vector<1x4x8x32xbf16>
    %383 = vector.shape_cast %382 : vector<1x4x8x32xbf16> to vector<4x8x32xbf16>
    %384 = vector.extract_strided_slice %14 {offsets = [1, 0, 0, 0], sizes = [1, 4, 32, 8], strides = [1, 1, 1, 1]} : vector<2x4x32x8xbf16> to vector<1x4x32x8xbf16>
    %385 = vector.shape_cast %384 : vector<1x4x32x8xbf16> to vector<4x32x8xbf16>
    %386 = vector.extract_strided_slice %15 {offsets = [1, 0, 0, 0], sizes = [1, 4, 16, 8], strides = [1, 1, 1, 1]} : vector<2x4x16x8xbf16> to vector<1x4x16x8xbf16>
    %387 = vector.shape_cast %386 : vector<1x4x16x8xbf16> to vector<4x16x8xbf16>
    %388 = vector.extract_strided_slice %16 {offsets = [1, 0, 0, 0], sizes = [1, 4, 1, 8], strides = [1, 1, 1, 1]} : vector<2x4x1x8xf32> to vector<1x4x1x8xf32>
    %389 = vector.shape_cast %388 : vector<1x4x1x8xf32> to vector<4x1x8xf32>
    %390 = vector.extract_strided_slice %17 {offsets = [1, 0, 0], sizes = [1, 1, 32], strides = [1, 1, 1]} : vector<2x1x32xf32> to vector<1x1x32xf32>
    %391 = vector.shape_cast %390 : vector<1x1x32xf32> to vector<1x32xf32>
    %392 = vector.extract_strided_slice %18 {offsets = [1, 0, 0, 0], sizes = [1, 4, 1, 8], strides = [1, 1, 1, 1]} : vector<2x4x1x8xf32> to vector<1x4x1x8xf32>
    %393 = vector.shape_cast %392 : vector<1x4x1x8xf32> to vector<4x1x8xf32>
    %394 = vector.extract_strided_slice %19 {offsets = [1, 0, 0, 0], sizes = [1, 4, 1, 8], strides = [1, 1, 1, 1]} : vector<2x4x1x8xf32> to vector<1x4x1x8xf32>
    %395 = vector.shape_cast %394 : vector<1x4x1x8xf32> to vector<4x1x8xf32>
    %396 = vector.extract_strided_slice %20 {offsets = [1, 0, 0], sizes = [1, 1, 64], strides = [1, 1, 1]} : vector<2x1x64xf32> to vector<1x1x64xf32>
    %397 = vector.shape_cast %396 : vector<1x1x64xf32> to vector<1x64xf32>
    %398 = vector.extract_strided_slice %21 {offsets = [1, 0, 0], sizes = [1, 32, 64], strides = [1, 1, 1]} : vector<2x32x64xbf16> to vector<1x32x64xbf16>
    %399 = vector.shape_cast %398 : vector<1x32x64xbf16> to vector<32x64xbf16>
    %400 = vector.extract_strided_slice %22 {offsets = [1, 0, 0], sizes = [1, 1, 32], strides = [1, 1, 1]} : vector<2x1x32xf32> to vector<1x1x32xf32>
    %401 = vector.shape_cast %400 : vector<1x1x32xf32> to vector<1x32xf32>
    %402 = vector.extract_strided_slice %23 {offsets = [1, 0, 0], sizes = [1, 64, 32], strides = [1, 1, 1]} : vector<2x64x32xbf16> to vector<1x64x32xbf16>
    %403 = vector.shape_cast %402 : vector<1x64x32xbf16> to vector<64x32xbf16>
    %404 = vector.extract_strided_slice %24 {offsets = [1, 0, 0], sizes = [1, 1, 32], strides = [1, 1, 1]} : vector<2x1x32xf32> to vector<1x1x32xf32>
    %405 = vector.shape_cast %404 : vector<1x1x32xf32> to vector<1x32xf32>
    %406 = vector.extract_strided_slice %25 {offsets = [1, 0, 0], sizes = [1, 1, 32], strides = [1, 1, 1]} : vector<2x1x32xf32> to vector<1x1x32xf32>
    %407 = vector.shape_cast %406 : vector<1x1x32xf32> to vector<1x32xf32>
    %408 = vector.extract_strided_slice %26 {offsets = [1, 0, 0], sizes = [1, 1, 32], strides = [1, 1, 1]} : vector<2x1x32xf32> to vector<1x1x32xf32>
    %409 = vector.shape_cast %408 : vector<1x1x32xf32> to vector<1x32xf32>
    %410 = vector.extract_strided_slice %27 {offsets = [1, 0, 0], sizes = [1, 1, 32], strides = [1, 1, 1]} : vector<2x1x32xf32> to vector<1x1x32xf32>
    %411 = vector.shape_cast %410 : vector<1x1x32xf32> to vector<1x32xf32>
    %412 = vector.extract_strided_slice %28 {offsets = [1, 0, 0, 0], sizes = [1, 4, 32, 8], strides = [1, 1, 1, 1]} : vector<2x4x32x8xbf16> to vector<1x4x32x8xbf16>
    %413 = vector.shape_cast %412 : vector<1x4x32x8xbf16> to vector<4x32x8xbf16>
    %414 = vector.extract_strided_slice %29 {offsets = [1, 0, 0, 0], sizes = [1, 4, 8, 32], strides = [1, 1, 1, 1]} : vector<2x4x8x32xbf16> to vector<1x4x8x32xbf16>
    %415 = vector.shape_cast %414 : vector<1x4x8x32xbf16> to vector<4x8x32xbf16>
    %416 = vector.extract_strided_slice %30 {offsets = [1, 0, 0, 0], sizes = [1, 4, 32, 8], strides = [1, 1, 1, 1]} : vector<2x4x32x8xbf16> to vector<1x4x32x8xbf16>
    %417 = vector.shape_cast %416 : vector<1x4x32x8xbf16> to vector<4x32x8xbf16>
    %418 = vector.extract_strided_slice %31 {offsets = [1, 0, 0, 0], sizes = [1, 4, 32, 8], strides = [1, 1, 1, 1]} : vector<2x4x32x8xbf16> to vector<1x4x32x8xbf16>
    %419 = vector.shape_cast %418 : vector<1x4x32x8xbf16> to vector<4x32x8xbf16>
    %420 = arith.truncf %355 : vector<16x32xf32> to vector<16x32xbf16>
    %421 = vector.shape_cast %420 : vector<16x32xbf16> to vector<2x1x8x32xbf16>
    %422 = vector.shape_cast %421 : vector<2x1x8x32xbf16> to vector<2x1x8x32xbf16>
    %423 = vector.broadcast %422 : vector<2x1x8x32xbf16> to vector<2x4x8x32xbf16>
    %424 = vector.shape_cast %423 : vector<2x4x8x32xbf16> to vector<8x8x32xbf16>
    %425 = vector.shape_cast %385 : vector<4x32x8xbf16> to vector<1x4x32x8xbf16>
    %426 = vector.shape_cast %425 : vector<1x4x32x8xbf16> to vector<1x4x32x8xbf16>
    %427 = vector.broadcast %426 : vector<1x4x32x8xbf16> to vector<2x4x32x8xbf16>
    %428 = vector.shape_cast %427 : vector<2x4x32x8xbf16> to vector<8x32x8xbf16>
    "tpu.trace_start"() <{level = 10 : i32, message = "bte,bed->btd"}> : () -> ()
    %cst_157 = arith.constant dense<0.000000e+00> : vector<8x8x8xf32>
    %429 = tpu.matmul %424, %428, %cst_157 {dimension_numbers = #tpu.dot_dimension_numbers<[2], [1], [1], [2], [0, 0, 0, 1, 1, 2], [0], [0]>} : vector<8x8x32xbf16>, vector<8x32x8xbf16>, vector<8x8x8xf32> -> vector<8x8x8xf32>
    "tpu.trace_stop"() : () -> ()
    %430 = vector.shape_cast %361 : vector<4x1x8xf32> to vector<1x4x1x8xf32>
    %431 = vector.shape_cast %430 : vector<1x4x1x8xf32> to vector<1x4x1x8xf32>
    %432 = vector.broadcast %431 : vector<1x4x1x8xf32> to vector<2x4x1x8xf32>
    %433 = vector.shape_cast %432 : vector<2x4x1x8xf32> to vector<8x1x8xf32>
    %434 = vector.broadcast %433 : vector<8x1x8xf32> to vector<8x8x8xf32>
    %435 = arith.addf %429, %434 : vector<8x8x8xf32>
    %436 = vector.shape_cast %381 : vector<4x16x8xbf16> to vector<1x4x16x8xbf16>
    %437 = vector.shape_cast %436 : vector<1x4x16x8xbf16> to vector<1x4x16x8xbf16>
    %438 = vector.broadcast %437 : vector<1x4x16x8xbf16> to vector<2x4x16x8xbf16>
    %439 = vector.shape_cast %438 : vector<2x4x16x8xbf16> to vector<8x16x8xbf16>
    "tpu.trace_start"() <{level = 10 : i32, message = "bse,bed->bsd"}> : () -> ()
    %cst_158 = arith.constant dense<0.000000e+00> : vector<8x8x8xf32>
    %440 = tpu.matmul %38, %439, %cst_158 {dimension_numbers = #tpu.dot_dimension_numbers<[2], [1], [1], [2], [0, 0, 0, 1, 1, 2], [0], [0]>} : vector<8x8x16xbf16>, vector<8x16x8xbf16>, vector<8x8x8xf32> -> vector<8x8x8xf32>
    "tpu.trace_stop"() : () -> ()
    %441 = vector.shape_cast %357 : vector<4x1x8xf32> to vector<1x4x1x8xf32>
    %442 = vector.shape_cast %441 : vector<1x4x1x8xf32> to vector<1x4x1x8xf32>
    %443 = vector.broadcast %442 : vector<1x4x1x8xf32> to vector<2x4x1x8xf32>
    %444 = vector.shape_cast %443 : vector<2x4x1x8xf32> to vector<8x1x8xf32>
    %445 = vector.broadcast %444 : vector<8x1x8xf32> to vector<8x8x8xf32>
    %446 = arith.addf %440, %445 : vector<8x8x8xf32>
    %447 = vector.shape_cast %387 : vector<4x16x8xbf16> to vector<1x4x16x8xbf16>
    %448 = vector.shape_cast %447 : vector<1x4x16x8xbf16> to vector<1x4x16x8xbf16>
    %449 = vector.broadcast %448 : vector<1x4x16x8xbf16> to vector<2x4x16x8xbf16>
    %450 = vector.shape_cast %449 : vector<2x4x16x8xbf16> to vector<8x16x8xbf16>
    "tpu.trace_start"() <{level = 10 : i32, message = "bse,bed->bsd"}> : () -> ()
    %cst_159 = arith.constant dense<0.000000e+00> : vector<8x8x8xf32>
    %451 = tpu.matmul %38, %450, %cst_159 {dimension_numbers = #tpu.dot_dimension_numbers<[2], [1], [1], [2], [0, 0, 0, 1, 1, 2], [0], [0]>} : vector<8x8x16xbf16>, vector<8x16x8xbf16>, vector<8x8x8xf32> -> vector<8x8x8xf32>
    "tpu.trace_stop"() : () -> ()
    %452 = vector.shape_cast %363 : vector<4x1x8xf32> to vector<1x4x1x8xf32>
    %453 = vector.shape_cast %452 : vector<1x4x1x8xf32> to vector<1x4x1x8xf32>
    %454 = vector.broadcast %453 : vector<1x4x1x8xf32> to vector<2x4x1x8xf32>
    %455 = vector.shape_cast %454 : vector<2x4x1x8xf32> to vector<8x1x8xf32>
    %456 = vector.broadcast %455 : vector<8x1x8xf32> to vector<8x8x8xf32>
    %457 = arith.addf %451, %456 : vector<8x8x8xf32>
    "tpu.trace_start"() <{level = 10 : i32, message = "btd,bsd->bts"}> : () -> ()
    %cst_160 = arith.constant dense<0.000000e+00> : vector<8x8x8xf32>
    %458 = tpu.matmul %435, %446, %cst_160 {dimension_numbers = #tpu.dot_dimension_numbers<[2], [2], [1], [1], [0, 0, 0, 1, 1, 1], [0], [0]>} : vector<8x8x8xf32>, vector<8x8x8xf32>, vector<8x8x8xf32> -> vector<8x8x8xf32>
    "tpu.trace_stop"() : () -> ()
    %459 = vector.broadcast %43 : vector<8x1x8xf32> to vector<8x8x8xf32>
    %460 = arith.addf %458, %459 : vector<8x8x8xf32>
    %cst_161 = arith.constant dense<0xFF800000> : vector<8x8xf32>
    %461 = vector.multi_reduction <maximumf>, %460, %cst_161 [2] : vector<8x8x8xf32> to vector<8x8xf32>
    %462 = vector.shape_cast %461 : vector<8x8xf32> to vector<8x8x1xf32>
    %463 = vector.broadcast %462 : vector<8x8x1xf32> to vector<8x8x8xf32>
    %464 = arith.subf %460, %463 : vector<8x8x8xf32>
    %465 = math.exp %464 : vector<8x8x8xf32>
    %cst_162 = arith.constant dense<0.000000e+00> : vector<8x8xf32>
    %466 = vector.multi_reduction <add>, %465, %cst_162 [2] : vector<8x8x8xf32> to vector<8x8xf32>
    %467 = vector.shape_cast %466 : vector<8x8xf32> to vector<8x8x1xf32>
    %468 = tpu.reciprocal %467 {approx = true} : vector<8x8x1xf32> -> vector<8x8x1xf32>
    %469 = vector.broadcast %468 : vector<8x8x1xf32> to vector<8x8x8xf32>
    %470 = arith.mulf %465, %469 : vector<8x8x8xf32>
    "tpu.trace_start"() <{level = 10 : i32, message = "bts,bsd->btd"}> : () -> ()
    %cst_163 = arith.constant dense<0.000000e+00> : vector<8x8x8xf32>
    %471 = tpu.matmul %470, %457, %cst_163 {dimension_numbers = #tpu.dot_dimension_numbers<[2], [1], [1], [2], [0, 0, 0, 1, 1, 2], [0], [0]>} : vector<8x8x8xf32>, vector<8x8x8xf32>, vector<8x8x8xf32> -> vector<8x8x8xf32>
    "tpu.trace_stop"() : () -> ()
    %472 = arith.truncf %471 : vector<8x8x8xf32> to vector<8x8x8xbf16>
    %473 = vector.shape_cast %383 : vector<4x8x32xbf16> to vector<1x4x8x32xbf16>
    %474 = vector.shape_cast %473 : vector<1x4x8x32xbf16> to vector<1x4x8x32xbf16>
    %475 = vector.broadcast %474 : vector<1x4x8x32xbf16> to vector<2x4x8x32xbf16>
    %476 = vector.shape_cast %475 : vector<2x4x8x32xbf16> to vector<8x8x32xbf16>
    "tpu.trace_start"() <{level = 10 : i32, message = "btd,bde->bte"}> : () -> ()
    %cst_164 = arith.constant dense<0.000000e+00> : vector<8x8x32xf32>
    %477 = tpu.matmul %472, %476, %cst_164 {dimension_numbers = #tpu.dot_dimension_numbers<[2], [1], [1], [2], [0, 0, 0, 1, 1, 2], [0], [0]>} : vector<8x8x8xbf16>, vector<8x8x32xbf16>, vector<8x8x32xf32> -> vector<8x8x32xf32>
    "tpu.trace_stop"() : () -> ()
    %478 = vector.shape_cast %477 : vector<8x8x32xf32> to vector<2x4x8x32xf32>
    %479 = vector.extract_strided_slice %478 {offsets = [0, 0, 0, 0], sizes = [2, 1, 8, 32], strides = [1, 1, 1, 1]} : vector<2x4x8x32xf32> to vector<2x1x8x32xf32>
    %480 = vector.shape_cast %479 : vector<2x1x8x32xf32> to vector<2x8x32xf32>
    %481 = vector.extract_strided_slice %478 {offsets = [0, 1, 0, 0], sizes = [2, 1, 8, 32], strides = [1, 1, 1, 1]} : vector<2x4x8x32xf32> to vector<2x1x8x32xf32>
    %482 = vector.shape_cast %481 : vector<2x1x8x32xf32> to vector<2x8x32xf32>
    %483 = arith.addf %480, %482 : vector<2x8x32xf32>
    %484 = vector.extract_strided_slice %478 {offsets = [0, 2, 0, 0], sizes = [2, 1, 8, 32], strides = [1, 1, 1, 1]} : vector<2x4x8x32xf32> to vector<2x1x8x32xf32>
    %485 = vector.shape_cast %484 : vector<2x1x8x32xf32> to vector<2x8x32xf32>
    %486 = arith.addf %483, %485 : vector<2x8x32xf32>
    %487 = vector.extract_strided_slice %478 {offsets = [0, 3, 0, 0], sizes = [2, 1, 8, 32], strides = [1, 1, 1, 1]} : vector<2x4x8x32xf32> to vector<2x1x8x32xf32>
    %488 = vector.shape_cast %487 : vector<2x1x8x32xf32> to vector<2x8x32xf32>
    %489 = arith.addf %486, %488 : vector<2x8x32xf32>
    %490 = vector.shape_cast %489 : vector<2x8x32xf32> to vector<16x32xf32>
    %491 = vector.broadcast %359 : vector<1x32xf32> to vector<16x32xf32>
    %492 = arith.addf %490, %491 : vector<16x32xf32>
    %493 = arith.addf %492, %355 : vector<16x32xf32>
    %cst_165 = arith.constant dense<0.000000e+00> : vector<16xf32>
    %494 = vector.multi_reduction <add>, %493, %cst_165 [1] : vector<16x32xf32> to vector<16xf32>
    %495 = vector.shape_cast %494 : vector<16xf32> to vector<16x1xf32>
    %cst_166 = arith.constant 3.200000e+01 : f32
    %496 = vector.broadcast %cst_166 : f32 to vector<16x1xf32>
    %497 = arith.divf %495, %496 : vector<16x1xf32>
    %498 = vector.broadcast %497 : vector<16x1xf32> to vector<16x32xf32>
    %499 = arith.subf %493, %498 : vector<16x32xf32>
    %500 = arith.mulf %499, %499 : vector<16x32xf32>
    %cst_167 = arith.constant dense<0.000000e+00> : vector<16xf32>
    %501 = vector.multi_reduction <add>, %500, %cst_167 [1] : vector<16x32xf32> to vector<16xf32>
    %502 = vector.shape_cast %501 : vector<16xf32> to vector<16x1xf32>
    %cst_168 = arith.constant 3.200000e+01 : f32
    %503 = vector.broadcast %cst_168 : f32 to vector<16x1xf32>
    %504 = arith.divf %502, %503 : vector<16x1xf32>
    %cst_169 = arith.constant 9.99999974E-6 : f32
    %505 = vector.broadcast %cst_169 : f32 to vector<16x1xf32>
    %506 = arith.addf %504, %505 : vector<16x1xf32>
    %507 = math.rsqrt %506 : vector<16x1xf32>
    %508 = vector.broadcast %507 : vector<16x1xf32> to vector<16x32xf32>
    %509 = arith.mulf %499, %508 : vector<16x32xf32>
    %510 = vector.broadcast %375 : vector<1x32xf32> to vector<16x32xf32>
    %511 = arith.mulf %509, %510 : vector<16x32xf32>
    %512 = vector.broadcast %373 : vector<1x32xf32> to vector<16x32xf32>
    %513 = arith.addf %511, %512 : vector<16x32xf32>
    %514 = arith.truncf %513 : vector<16x32xf32> to vector<16x32xbf16>
    %cst_170 = arith.constant dense<0.000000e+00> : vector<16x64xf32>
    %515 = tpu.matmul %514, %367, %cst_170 {dimension_numbers = #tpu.dot_dimension_numbers<[1], [0], [0], [1], [0, 0, 1, 1], [], []>} : vector<16x32xbf16>, vector<32x64xbf16>, vector<16x64xf32> -> vector<16x64xf32>
    %516 = vector.broadcast %365 : vector<1x64xf32> to vector<16x64xf32>
    %517 = arith.addf %515, %516 : vector<16x64xf32>
    %cst_171 = arith.constant 0.000000e+00 : f32
    %518 = vector.broadcast %cst_171 : f32 to vector<16x64xf32>
    %519 = arith.maximumf %517, %518 : vector<16x64xf32>
    %520 = arith.truncf %519 : vector<16x64xf32> to vector<16x64xbf16>
    %cst_172 = arith.constant dense<0.000000e+00> : vector<16x32xf32>
    %521 = tpu.matmul %520, %371, %cst_172 {dimension_numbers = #tpu.dot_dimension_numbers<[1], [0], [0], [1], [0, 0, 1, 1], [], []>} : vector<16x64xbf16>, vector<64x32xbf16>, vector<16x32xf32> -> vector<16x32xf32>
    %522 = vector.broadcast %369 : vector<1x32xf32> to vector<16x32xf32>
    %523 = arith.addf %521, %522 : vector<16x32xf32>
    %524 = arith.addf %523, %513 : vector<16x32xf32>
    %cst_173 = arith.constant dense<0.000000e+00> : vector<16xf32>
    %525 = vector.multi_reduction <add>, %524, %cst_173 [1] : vector<16x32xf32> to vector<16xf32>
    %526 = vector.shape_cast %525 : vector<16xf32> to vector<16x1xf32>
    %cst_174 = arith.constant 3.200000e+01 : f32
    %527 = vector.broadcast %cst_174 : f32 to vector<16x1xf32>
    %528 = arith.divf %526, %527 : vector<16x1xf32>
    %529 = vector.broadcast %528 : vector<16x1xf32> to vector<16x32xf32>
    %530 = arith.subf %524, %529 : vector<16x32xf32>
    %531 = arith.mulf %530, %530 : vector<16x32xf32>
    %cst_175 = arith.constant dense<0.000000e+00> : vector<16xf32>
    %532 = vector.multi_reduction <add>, %531, %cst_175 [1] : vector<16x32xf32> to vector<16xf32>
    %533 = vector.shape_cast %532 : vector<16xf32> to vector<16x1xf32>
    %cst_176 = arith.constant 3.200000e+01 : f32
    %534 = vector.broadcast %cst_176 : f32 to vector<16x1xf32>
    %535 = arith.divf %533, %534 : vector<16x1xf32>
    %cst_177 = arith.constant 9.99999974E-6 : f32
    %536 = vector.broadcast %cst_177 : f32 to vector<16x1xf32>
    %537 = arith.addf %535, %536 : vector<16x1xf32>
    %538 = math.rsqrt %537 : vector<16x1xf32>
    %539 = vector.broadcast %538 : vector<16x1xf32> to vector<16x32xf32>
    %540 = arith.mulf %530, %539 : vector<16x32xf32>
    %541 = vector.broadcast %379 : vector<1x32xf32> to vector<16x32xf32>
    %542 = arith.mulf %540, %541 : vector<16x32xf32>
    %543 = vector.broadcast %377 : vector<1x32xf32> to vector<16x32xf32>
    %544 = arith.addf %542, %543 : vector<16x32xf32>
    %545 = arith.truncf %544 : vector<16x32xf32> to vector<16x32xbf16>
    %546 = vector.shape_cast %545 : vector<16x32xbf16> to vector<2x1x8x32xbf16>
    %547 = vector.shape_cast %546 : vector<2x1x8x32xbf16> to vector<2x1x8x32xbf16>
    %548 = vector.broadcast %547 : vector<2x1x8x32xbf16> to vector<2x4x8x32xbf16>
    %549 = vector.shape_cast %548 : vector<2x4x8x32xbf16> to vector<8x8x32xbf16>
    %550 = vector.shape_cast %417 : vector<4x32x8xbf16> to vector<1x4x32x8xbf16>
    %551 = vector.shape_cast %550 : vector<1x4x32x8xbf16> to vector<1x4x32x8xbf16>
    %552 = vector.broadcast %551 : vector<1x4x32x8xbf16> to vector<2x4x32x8xbf16>
    %553 = vector.shape_cast %552 : vector<2x4x32x8xbf16> to vector<8x32x8xbf16>
    "tpu.trace_start"() <{level = 10 : i32, message = "bte,bed->btd"}> : () -> ()
    %cst_178 = arith.constant dense<0.000000e+00> : vector<8x8x8xf32>
    %554 = tpu.matmul %549, %553, %cst_178 {dimension_numbers = #tpu.dot_dimension_numbers<[2], [1], [1], [2], [0, 0, 0, 1, 1, 2], [0], [0]>} : vector<8x8x32xbf16>, vector<8x32x8xbf16>, vector<8x8x8xf32> -> vector<8x8x8xf32>
    "tpu.trace_stop"() : () -> ()
    %555 = vector.shape_cast %393 : vector<4x1x8xf32> to vector<1x4x1x8xf32>
    %556 = vector.shape_cast %555 : vector<1x4x1x8xf32> to vector<1x4x1x8xf32>
    %557 = vector.broadcast %556 : vector<1x4x1x8xf32> to vector<2x4x1x8xf32>
    %558 = vector.shape_cast %557 : vector<2x4x1x8xf32> to vector<8x1x8xf32>
    %559 = vector.broadcast %558 : vector<8x1x8xf32> to vector<8x8x8xf32>
    %560 = arith.addf %554, %559 : vector<8x8x8xf32>
    %561 = vector.shape_cast %413 : vector<4x32x8xbf16> to vector<1x4x32x8xbf16>
    %562 = vector.shape_cast %561 : vector<1x4x32x8xbf16> to vector<1x4x32x8xbf16>
    %563 = vector.broadcast %562 : vector<1x4x32x8xbf16> to vector<2x4x32x8xbf16>
    %564 = vector.shape_cast %563 : vector<2x4x32x8xbf16> to vector<8x32x8xbf16>
    "tpu.trace_start"() <{level = 10 : i32, message = "bse,bed->bsd"}> : () -> ()
    %cst_179 = arith.constant dense<0.000000e+00> : vector<8x8x8xf32>
    %565 = tpu.matmul %549, %564, %cst_179 {dimension_numbers = #tpu.dot_dimension_numbers<[2], [1], [1], [2], [0, 0, 0, 1, 1, 2], [0], [0]>} : vector<8x8x32xbf16>, vector<8x32x8xbf16>, vector<8x8x8xf32> -> vector<8x8x8xf32>
    "tpu.trace_stop"() : () -> ()
    %566 = vector.shape_cast %389 : vector<4x1x8xf32> to vector<1x4x1x8xf32>
    %567 = vector.shape_cast %566 : vector<1x4x1x8xf32> to vector<1x4x1x8xf32>
    %568 = vector.broadcast %567 : vector<1x4x1x8xf32> to vector<2x4x1x8xf32>
    %569 = vector.shape_cast %568 : vector<2x4x1x8xf32> to vector<8x1x8xf32>
    %570 = vector.broadcast %569 : vector<8x1x8xf32> to vector<8x8x8xf32>
    %571 = arith.addf %565, %570 : vector<8x8x8xf32>
    %572 = vector.shape_cast %419 : vector<4x32x8xbf16> to vector<1x4x32x8xbf16>
    %573 = vector.shape_cast %572 : vector<1x4x32x8xbf16> to vector<1x4x32x8xbf16>
    %574 = vector.broadcast %573 : vector<1x4x32x8xbf16> to vector<2x4x32x8xbf16>
    %575 = vector.shape_cast %574 : vector<2x4x32x8xbf16> to vector<8x32x8xbf16>
    "tpu.trace_start"() <{level = 10 : i32, message = "bse,bed->bsd"}> : () -> ()
    %cst_180 = arith.constant dense<0.000000e+00> : vector<8x8x8xf32>
    %576 = tpu.matmul %549, %575, %cst_180 {dimension_numbers = #tpu.dot_dimension_numbers<[2], [1], [1], [2], [0, 0, 0, 1, 1, 2], [0], [0]>} : vector<8x8x32xbf16>, vector<8x32x8xbf16>, vector<8x8x8xf32> -> vector<8x8x8xf32>
    "tpu.trace_stop"() : () -> ()
    %577 = vector.shape_cast %395 : vector<4x1x8xf32> to vector<1x4x1x8xf32>
    %578 = vector.shape_cast %577 : vector<1x4x1x8xf32> to vector<1x4x1x8xf32>
    %579 = vector.broadcast %578 : vector<1x4x1x8xf32> to vector<2x4x1x8xf32>
    %580 = vector.shape_cast %579 : vector<2x4x1x8xf32> to vector<8x1x8xf32>
    %581 = vector.broadcast %580 : vector<8x1x8xf32> to vector<8x8x8xf32>
    %582 = arith.addf %576, %581 : vector<8x8x8xf32>
    "tpu.trace_start"() <{level = 10 : i32, message = "btd,bsd->bts"}> : () -> ()
    %cst_181 = arith.constant dense<0.000000e+00> : vector<8x8x8xf32>
    %583 = tpu.matmul %560, %571, %cst_181 {dimension_numbers = #tpu.dot_dimension_numbers<[2], [2], [1], [1], [0, 0, 0, 1, 1, 1], [0], [0]>} : vector<8x8x8xf32>, vector<8x8x8xf32>, vector<8x8x8xf32> -> vector<8x8x8xf32>
    "tpu.trace_stop"() : () -> ()
    %cst_182 = arith.constant dense<0xFF800000> : vector<8x8xf32>
    %584 = vector.multi_reduction <maximumf>, %583, %cst_182 [2] : vector<8x8x8xf32> to vector<8x8xf32>
    %585 = vector.shape_cast %584 : vector<8x8xf32> to vector<8x8x1xf32>
    %586 = vector.broadcast %585 : vector<8x8x1xf32> to vector<8x8x8xf32>
    %587 = arith.subf %583, %586 : vector<8x8x8xf32>
    %588 = math.exp %587 : vector<8x8x8xf32>
    %cst_183 = arith.constant dense<0.000000e+00> : vector<8x8xf32>
    %589 = vector.multi_reduction <add>, %588, %cst_183 [2] : vector<8x8x8xf32> to vector<8x8xf32>
    %590 = vector.shape_cast %589 : vector<8x8xf32> to vector<8x8x1xf32>
    %591 = tpu.reciprocal %590 {approx = true} : vector<8x8x1xf32> -> vector<8x8x1xf32>
    %592 = vector.broadcast %591 : vector<8x8x1xf32> to vector<8x8x8xf32>
    %593 = arith.mulf %588, %592 : vector<8x8x8xf32>
    "tpu.trace_start"() <{level = 10 : i32, message = "bts,bsd->btd"}> : () -> ()
    %cst_184 = arith.constant dense<0.000000e+00> : vector<8x8x8xf32>
    %594 = tpu.matmul %593, %582, %cst_184 {dimension_numbers = #tpu.dot_dimension_numbers<[2], [1], [1], [2], [0, 0, 0, 1, 1, 2], [0], [0]>} : vector<8x8x8xf32>, vector<8x8x8xf32>, vector<8x8x8xf32> -> vector<8x8x8xf32>
    "tpu.trace_stop"() : () -> ()
    %595 = arith.truncf %594 : vector<8x8x8xf32> to vector<8x8x8xbf16>
    %596 = vector.shape_cast %415 : vector<4x8x32xbf16> to vector<1x4x8x32xbf16>
    %597 = vector.shape_cast %596 : vector<1x4x8x32xbf16> to vector<1x4x8x32xbf16>
    %598 = vector.broadcast %597 : vector<1x4x8x32xbf16> to vector<2x4x8x32xbf16>
    %599 = vector.shape_cast %598 : vector<2x4x8x32xbf16> to vector<8x8x32xbf16>
    "tpu.trace_start"() <{level = 10 : i32, message = "btd,bde->bte"}> : () -> ()
    %cst_185 = arith.constant dense<0.000000e+00> : vector<8x8x32xf32>
    %600 = tpu.matmul %595, %599, %cst_185 {dimension_numbers = #tpu.dot_dimension_numbers<[2], [1], [1], [2], [0, 0, 0, 1, 1, 2], [0], [0]>} : vector<8x8x8xbf16>, vector<8x8x32xbf16>, vector<8x8x32xf32> -> vector<8x8x32xf32>
    "tpu.trace_stop"() : () -> ()
    %601 = vector.shape_cast %600 : vector<8x8x32xf32> to vector<2x4x8x32xf32>
    %602 = vector.extract_strided_slice %601 {offsets = [0, 0, 0, 0], sizes = [2, 1, 8, 32], strides = [1, 1, 1, 1]} : vector<2x4x8x32xf32> to vector<2x1x8x32xf32>
    %603 = vector.shape_cast %602 : vector<2x1x8x32xf32> to vector<2x8x32xf32>
    %604 = vector.extract_strided_slice %601 {offsets = [0, 1, 0, 0], sizes = [2, 1, 8, 32], strides = [1, 1, 1, 1]} : vector<2x4x8x32xf32> to vector<2x1x8x32xf32>
    %605 = vector.shape_cast %604 : vector<2x1x8x32xf32> to vector<2x8x32xf32>
    %606 = arith.addf %603, %605 : vector<2x8x32xf32>
    %607 = vector.extract_strided_slice %601 {offsets = [0, 2, 0, 0], sizes = [2, 1, 8, 32], strides = [1, 1, 1, 1]} : vector<2x4x8x32xf32> to vector<2x1x8x32xf32>
    %608 = vector.shape_cast %607 : vector<2x1x8x32xf32> to vector<2x8x32xf32>
    %609 = arith.addf %606, %608 : vector<2x8x32xf32>
    %610 = vector.extract_strided_slice %601 {offsets = [0, 3, 0, 0], sizes = [2, 1, 8, 32], strides = [1, 1, 1, 1]} : vector<2x4x8x32xf32> to vector<2x1x8x32xf32>
    %611 = vector.shape_cast %610 : vector<2x1x8x32xf32> to vector<2x8x32xf32>
    %612 = arith.addf %609, %611 : vector<2x8x32xf32>
    %613 = vector.shape_cast %612 : vector<2x8x32xf32> to vector<16x32xf32>
    %614 = vector.broadcast %391 : vector<1x32xf32> to vector<16x32xf32>
    %615 = arith.addf %613, %614 : vector<16x32xf32>
    %616 = arith.addf %615, %544 : vector<16x32xf32>
    %cst_186 = arith.constant dense<0.000000e+00> : vector<16xf32>
    %617 = vector.multi_reduction <add>, %616, %cst_186 [1] : vector<16x32xf32> to vector<16xf32>
    %618 = vector.shape_cast %617 : vector<16xf32> to vector<16x1xf32>
    %cst_187 = arith.constant 3.200000e+01 : f32
    %619 = vector.broadcast %cst_187 : f32 to vector<16x1xf32>
    %620 = arith.divf %618, %619 : vector<16x1xf32>
    %621 = vector.broadcast %620 : vector<16x1xf32> to vector<16x32xf32>
    %622 = arith.subf %616, %621 : vector<16x32xf32>
    %623 = arith.mulf %622, %622 : vector<16x32xf32>
    %cst_188 = arith.constant dense<0.000000e+00> : vector<16xf32>
    %624 = vector.multi_reduction <add>, %623, %cst_188 [1] : vector<16x32xf32> to vector<16xf32>
    %625 = vector.shape_cast %624 : vector<16xf32> to vector<16x1xf32>
    %cst_189 = arith.constant 3.200000e+01 : f32
    %626 = vector.broadcast %cst_189 : f32 to vector<16x1xf32>
    %627 = arith.divf %625, %626 : vector<16x1xf32>
    %cst_190 = arith.constant 9.99999974E-6 : f32
    %628 = vector.broadcast %cst_190 : f32 to vector<16x1xf32>
    %629 = arith.addf %627, %628 : vector<16x1xf32>
    %630 = math.rsqrt %629 : vector<16x1xf32>
    %631 = vector.broadcast %630 : vector<16x1xf32> to vector<16x32xf32>
    %632 = arith.mulf %622, %631 : vector<16x32xf32>
    %633 = vector.broadcast %407 : vector<1x32xf32> to vector<16x32xf32>
    %634 = arith.mulf %632, %633 : vector<16x32xf32>
    %635 = vector.broadcast %405 : vector<1x32xf32> to vector<16x32xf32>
    %636 = arith.addf %634, %635 : vector<16x32xf32>
    %637 = arith.truncf %636 : vector<16x32xf32> to vector<16x32xbf16>
    %cst_191 = arith.constant dense<0.000000e+00> : vector<16x64xf32>
    %638 = tpu.matmul %637, %399, %cst_191 {dimension_numbers = #tpu.dot_dimension_numbers<[1], [0], [0], [1], [0, 0, 1, 1], [], []>} : vector<16x32xbf16>, vector<32x64xbf16>, vector<16x64xf32> -> vector<16x64xf32>
    %639 = vector.broadcast %397 : vector<1x64xf32> to vector<16x64xf32>
    %640 = arith.addf %638, %639 : vector<16x64xf32>
    %cst_192 = arith.constant 0.000000e+00 : f32
    %641 = vector.broadcast %cst_192 : f32 to vector<16x64xf32>
    %642 = arith.maximumf %640, %641 : vector<16x64xf32>
    %643 = arith.truncf %642 : vector<16x64xf32> to vector<16x64xbf16>
    %cst_193 = arith.constant dense<0.000000e+00> : vector<16x32xf32>
    %644 = tpu.matmul %643, %403, %cst_193 {dimension_numbers = #tpu.dot_dimension_numbers<[1], [0], [0], [1], [0, 0, 1, 1], [], []>} : vector<16x64xbf16>, vector<64x32xbf16>, vector<16x32xf32> -> vector<16x32xf32>
    %645 = vector.broadcast %401 : vector<1x32xf32> to vector<16x32xf32>
    %646 = arith.addf %644, %645 : vector<16x32xf32>
    %647 = arith.addf %646, %636 : vector<16x32xf32>
    %cst_194 = arith.constant dense<0.000000e+00> : vector<16xf32>
    %648 = vector.multi_reduction <add>, %647, %cst_194 [1] : vector<16x32xf32> to vector<16xf32>
    %649 = vector.shape_cast %648 : vector<16xf32> to vector<16x1xf32>
    %cst_195 = arith.constant 3.200000e+01 : f32
    %650 = vector.broadcast %cst_195 : f32 to vector<16x1xf32>
    %651 = arith.divf %649, %650 : vector<16x1xf32>
    %652 = vector.broadcast %651 : vector<16x1xf32> to vector<16x32xf32>
    %653 = arith.subf %647, %652 : vector<16x32xf32>
    %654 = arith.mulf %653, %653 : vector<16x32xf32>
    %cst_196 = arith.constant dense<0.000000e+00> : vector<16xf32>
    %655 = vector.multi_reduction <add>, %654, %cst_196 [1] : vector<16x32xf32> to vector<16xf32>
    %656 = vector.shape_cast %655 : vector<16xf32> to vector<16x1xf32>
    %cst_197 = arith.constant 3.200000e+01 : f32
    %657 = vector.broadcast %cst_197 : f32 to vector<16x1xf32>
    %658 = arith.divf %656, %657 : vector<16x1xf32>
    %cst_198 = arith.constant 9.99999974E-6 : f32
    %659 = vector.broadcast %cst_198 : f32 to vector<16x1xf32>
    %660 = arith.addf %658, %659 : vector<16x1xf32>
    %661 = math.rsqrt %660 : vector<16x1xf32>
    %662 = vector.broadcast %661 : vector<16x1xf32> to vector<16x32xf32>
    %663 = arith.mulf %653, %662 : vector<16x32xf32>
    %664 = vector.broadcast %411 : vector<1x32xf32> to vector<16x32xf32>
    %665 = arith.mulf %663, %664 : vector<16x32xf32>
    %666 = vector.broadcast %409 : vector<1x32xf32> to vector<16x32xf32>
    %667 = arith.addf %665, %666 : vector<16x32xf32>
    %668 = arith.addf %667, %32 : vector<16x32xf32>
    %c0_199 = arith.constant 0 : index
    %c0_200 = arith.constant 0 : index
    %669 = vector.load %arg35[%c0_199, %c0_200] : memref<16x32xf32, #tpu.memory_space<vmem>>, vector<16x32xf32>
    tpu.vector_store %arg35[%c0_199, %c0_200], %668 {strides = array<i32>} : memref<16x32xf32, #tpu.memory_space<vmem>>, vector<16x32xf32>,
    return
  }
}

</mosaic_0001>

<bundles_post_ra>
// kernel: cos_forward.1
= control target key start
LH: loop header
LB: loop body
LE: loop exit
PB: predicated region body
PF: predicated region fallthrough
CT: control target
= control target key end

     0   :  { %v15243_v0 = vmov 0.0   ;;  %s15244_s3 = smov 17   ;;  %vm15245_vm0 = vmmov 0   ;;  %s15246_s10 = smov 15   ;;  %vm501_vm1 = vcmask 261120   ;;  %vm894_vm2 = vcmask 130048   ;;  %s16965_s0 = inlined_call_operand.smem [shape: u32[36], index: -1, kind: input, shape index: {}] }
   0x1   :  { %13640 = vmatprep.subr.bf16.mxu0 %v15243_v0  ;;  %13648 = vmatprep.subr.bf16.mxu1 %v15243_v0  ;;  %s15290_s6 = sld [smem:[%s16965_s0 + %s15244_s3]]   ;;  %s15247_s14 = smov 1   ;;  %vm1619_vm3 = vcmask 64512   ;;  %vm2911_vm4 = vcmask 1043456   ;;  %vm3420_vm5 = vcmask 523264  }
   0x2   :  { %13644 = vmatprep.mubr.msk.bf16.mxu0 %vm15245_vm0, %v15243_v0  ;;  %13652 = vmatprep.mubr.msk.bf16.mxu1 %vm15245_vm0, %v15243_v0  ;;  %s15299_s9 = sld [smem:[%s16965_s0]]   ;;  %s15248_s18 = smov 18  }
   0x3   :  { %s15307_s13 = sld [smem:[%s16965_s0 + %s15246_s10]]   ;;  %s15249_s22 = smov 3  }
   0x4   :  { %s15345_s17 = sld [smem:[%s16965_s0 + %s15247_s14]]   ;;  %s15250_s26 = smov 5  }
   0x5   :  { %s15406_s21 = sld [smem:[%s16965_s0 + %s15248_s18]]   ;;  %s15251_s30 = smov 6  }
   0x6   :  { %s15471_s25 = sld [smem:[%s16965_s0 + %s15249_s22]]   ;;  %s15252_s4 = smov 2  }
   0x7   :  { %v14973_v1 = vld [vmem:[%s15290_s6 + $0x8] sm:$0xff]   ;;  %v14974_v2 = vld [vmem:[%s15290_s6 + $0x18] sm:$0xff]   ;;  %v14975_v3 = vld [vmem:[%s15290_s6] sm:$0xff]   ;;  %s15478_s29 = sld [smem:[%s16965_s0 + %s15250_s26]]   ;;  %s15253_s10 = smov 16  }
   0x8   :  { %16981 = sst [smem:[#allocation2_spill]] %s15299_s9  ;;  %13641 = vmatpush3.bf16.msra.mxu0 %v14973_v1  ;;  %13649 = vmatpush3.bf16.msra.mxu1 %v14974_v2  ;;  %v14976_v4 = vld [vmem:[%s15290_s6 + $0x10] sm:$0xff]   ;;  %v447_v5 = vld [vmem:[%s15299_s9] sm:$0xff]  ;;  %v14977_v7 = vld [vmem:[%s15290_s6 + $0x28] sm:$0xff]   ;;  %s15254_s15 = smov 4  }
   0x9   :  { %13642 = vmatprep.subr.bf16.mxu0 %v15243_v0  ;;  %13650 = vmatprep.subr.bf16.mxu1 %v15243_v0  ;;  %v13152_v6 = vpack.c.bf16 %v447_v5, %v447_v5  ;;  %v14978_v8 = vld [vmem:[%s15290_s6 + $0x38] sm:$0xff]   ;;  %v14979_v9 = vld [vmem:[%s15290_s6 + $0x20] sm:$0xff]   ;;  %v14980_v10 = vld [vmem:[%s15290_s6 + $0x30] sm:$0xff]   ;;  %s15525_s3 = sld [smem:[%s16965_s0 + %s15251_s30]]   ;;  %s15255_s19 = smov 8  }
   0xa   :  { %v448_v11 = vld [vmem:[%s15299_s9 + $0x8] sm:$0xff]  ;;  %v14981_v13 = vld [vmem:[%s15307_s13] sm:$0xff]   ;;  %v14983_v17 = vld [vmem:[%s15307_s13 + $0x10] sm:$0xff]   ;;  %s15560_s8 = sld [smem:[%s16965_s0 + %s15252_s4]]   ;;  %s15256_s24 = smov 10  }
   0xb   :  { %v13153_v12 = vpack.c.bf16 %v448_v11, %v448_v11  ;;  %v14982_v14 = vld [vmem:[%s15307_s13 + $0x8] sm:$0xff]   ;;  %v449_v15 = vld [vmem:[%s15345_s17] sm:$0xff]  ;;  %v14984_v18 = vld [vmem:[%s15307_s13 + $0x18] sm:$0xff]   ;;  %s15629_s14 = sld [smem:[%s16965_s0 + %s15253_s10]]   ;;  %s15257_s30 = smov 12  }
   0xc   :  { %13643 = vmatpush3.bf16.msra.mxu0 %v14975_v3  ;;  %13651 = vmatpush3.bf16.msra.mxu1 %v14976_v4  ;;  %v15365_v16 = vpack.c.bf16 %v449_v15, %v449_v15  ;;  %v450_v19 = vld [vmem:[%s15345_s17 + $0x8] sm:$0xff]  ;;  %v14985_v21 = vld [vmem:[%s15406_s21] sm:$0xff]   ;;  %v14986_v22 = vld [vmem:[%s15406_s21 + $0x10] sm:$0xff]   ;;  %s15674_s18 = sld [smem:[%s16965_s0 + %s15254_s15]]   ;;  %s15258_s5 = smov 11  }
   0xd   :  { %13656 = vmatprep.subr.bf16.mxu0 %v15243_v0  ;;  %13664 = vmatprep.subr.bf16.mxu1 %v15243_v0  ;;  %v15390_v20 = vpack.c.bf16 %v450_v19, %v450_v19  ;;  %v14987_v23 = vld [vmem:[%s15406_s21 + $0x8] sm:$0xff]   ;;  %v14988_v24 = vld [vmem:[%s15406_s21 + $0x18] sm:$0xff]   ;;  %v12750_v56 = vld [vmem:[%s15471_s25] ss:$0 sm:$0xff]  ;;  %s15686_s23 = sld [smem:[%s16965_s0 + %s15255_s19]]   ;;  %s15259_s12 = smov 7  }
   0xe   :  { %v12751_v59 = vld [vmem:[%s15471_s25 + $0x1] ss:$0 sm:$0xff]  ;;  %v12730_v60 = vld [vmem:[%s15478_s29] ss:$0 sm:$0xff]  ;;  %s15695_s28 = sld [smem:[%s16965_s0 + %s15256_s24]]   ;;  %s15260_s19 = smov 9  }
   0xf   :  { %13645 = vmatmul.mubr.msk.bf16.vlgmr.msra.gmra.mxu0 %vm501_vm1, %v13152_v6  ;;  %13653 = vmatmul.mubr.msk.bf16.vlgmr.msra.gmra.mxu1 %vm501_vm1, %v13152_v6  ;;  %v12731_v5 = vld [vmem:[%s15478_s29 + $0x1] ss:$0 sm:$0xff]  ;;  %s15702_s4 = sld [smem:[%s16965_s0 + %s15257_s30]]   ;;  %s15261_s26 = smov 33  }
  0x10   :  { %13657 = vmatpush3.bf16.msra.mxu0 %v14977_v7  ;;  %13665 = vmatpush3.bf16.msra.mxu1 %v14978_v8  ;;  %s15707_s11 = sld [smem:[%s16965_s0 + %s15258_s5]]   ;;  %s15262_s2 = smov 31  }
  0x11   :  { %13658 = vmatprep.subr.bf16.mxu0 %v15243_v0  ;;  %13666 = vmatprep.subr.bf16.mxu1 %v15243_v0  ;;  %s15723_s17 = sld [smem:[%s16965_s0 + %s15259_s12]]   ;;  %s15263_s12 = smov 34  }
  0x12   :  { %13660 = vmatprep.mubr.msk.bf16.mxu0 %vm15245_vm0, %v15243_v0  ;;  %13668 = vmatprep.mubr.msk.bf16.mxu1 %vm15245_vm0, %v15243_v0  ;;  %s15732_s24 = sld [smem:[%s16965_s0 + %s15260_s19]]   ;;  %s15264_s20 = smov 14  }
  0x13   :  { %s15742_s1 = sld [smem:[%s16965_s0 + %s15261_s26]]   ;;  %s15265_s30 = smov 13  }
  0x14   :  { %13659 = vmatpush3.bf16.msra.mxu0 %v14979_v9  ;;  %13667 = vmatpush3.bf16.msra.mxu1 %v14980_v10  ;;  %s15755_s10 = sld [smem:[%s16965_s0 + %s15262_s2]]   ;;  %s15267_s22 = smov 21  }
  0x15   :  { %13672 = vmatprep.subr.bf16.mxu0 %v15243_v0  ;;  %13680 = vmatprep.subr.bf16.mxu1 %v15243_v0  ;;  %s15760_s19 = sld [smem:[%s16965_s0 + %s15263_s12]]   ;;  %s15266_s12 = smov 19  }
  0x16   :  { %s15765_s27 = sld [smem:[%s16965_s0 + %s15264_s20]]   ;;  %s15268_s5 = smov 22  }
  0x17   :  { %13661 = vmatmul.mubr.msk.bf16.vlgmr.msra.gmra.mxu0 %vm501_vm1, %v13152_v6  ;;  %13669 = vmatmul.mubr.msk.bf16.vlgmr.msra.gmra.mxu1 %vm501_vm1, %v13152_v6  ;;  %s15770_s7 = sld [smem:[%s16965_s0 + %s15265_s30]]   ;;  %s15271_s30 = smov 24  }
  0x18   :  { %13673 = vmatpush3.bf16.msra.mxu0 %v14973_v1  ;;  %13681 = vmatpush3.bf16.msra.mxu1 %v14974_v2  ;;  %s15949_s20 = sld [smem:[%s16965_s0 + %s15266_s12]]   ;;  %s15270_s12 = smov 20  }
  0x19   :  { %13674 = vmatprep.subr.bf16.mxu0 %v15243_v0  ;;  %13682 = vmatprep.subr.bf16.mxu1 %v15243_v0  ;;  %s15958_s2 = sld [smem:[%s16965_s0 + %s15267_s22]]   ;;  %s15269_s22 = smov 32  }
  0x1a   :  { %13676 = vmatprep.mubr.msk.bf16.mxu0 %vm15245_vm0, %v15243_v0  ;;  %13684 = vmatprep.mubr.msk.bf16.mxu1 %vm15245_vm0, %v15243_v0  ;;  %s15990_s16 = sld [smem:[%s16965_s0 + %s15268_s5]]  }
  0x1b   :  { %s16098_s5 = sld [smem:[%s16965_s0 + %s15269_s22]]  }
  0x1c   :  { %13675 = vmatpush3.bf16.msra.mxu0 %v14975_v3  ;;  %13683 = vmatpush3.bf16.msra.mxu1 %v14976_v4  ;;  %s16143_s26 = sld [smem:[%s16965_s0 + %s15270_s12]]   ;;  %s15277_s12 = smov 30  }
  0x1d   :  { %13688 = vmatprep.subr.bf16.mxu0 %v15243_v0  ;;  %13696 = vmatprep.subr.bf16.mxu1 %v15243_v0  ;;  %s16155_s22 = sld [smem:[%s16965_s0 + %s15271_s30]]   ;;  %s15273_s30 = smov 28  }
  0x1f   :  { %13677 = vmatmul.mubr.msk.bf16.vlgmr.msra.gmra.mxu0 %vm501_vm1, %v13153_v12  ;;  %13685 = vmatmul.mubr.msk.bf16.vlgmr.msra.gmra.mxu1 %vm501_vm1, %v13153_v12  ;;  %16982 = sst [smem:[#allocation3_spill]] %s15958_s2 }
  0x20   :  { %13689 = vmatpush3.bf16.msra.mxu0 %v14977_v7  ;;  %13697 = vmatpush3.bf16.msra.mxu1 %v14978_v8  ;;  %v12752_v8 = vld [vmem:[%s15471_s25 + $0x2] ss:$0 sm:$0xff]  ;;  %16983 = sst [smem:[#allocation4_spill]] %s15990_s16 }
  0x21   :  { %13690 = vmatprep.subr.bf16.mxu0 %v15243_v0  ;;  %13698 = vmatprep.subr.bf16.mxu1 %v15243_v0  ;;  %16984 = sst [smem:[#allocation5_spill]] %s16098_s5 }
  0x22   :  { %13692 = vmatprep.mubr.msk.bf16.mxu0 %vm15245_vm0, %v15243_v0  ;;  %13700 = vmatprep.mubr.msk.bf16.mxu1 %vm15245_vm0, %v15243_v0  ;;  %16985 = sst [smem:[#allocation6_spill]] %s16143_s26 }
  0x23   :  { %16986 = sst [smem:[#allocation7_spill]] %s16155_s22 }
  0x24   :  { %13691 = vmatpush3.bf16.msra.mxu0 %v14979_v9  ;;  %13699 = vmatpush3.bf16.msra.mxu1 %v14980_v10  ;;  %v12753_v10 = vld [vmem:[%s15471_s25 + $0x3] ss:$0 sm:$0xff] }
  0x25   :  { %13704 = vmatprep.subr.bf16.mxu0 %v15243_v0  ;;  %13710 = vmatprep.subr.bf16.mxu1 %v15243_v0 }
  0x27   :  { %13693 = vmatmul.mubr.msk.bf16.vlgmr.msra.gmra.mxu0 %vm501_vm1, %v13153_v12  ;;  %13701 = vmatmul.mubr.msk.bf16.vlgmr.msra.gmra.mxu1 %vm501_vm1, %v13153_v12 }
  0x28   :  { %13705 = vmatpush3.bf16.msra.mxu0 %v14981_v13  ;;  %13711 = vmatpush3.bf16.msra.mxu1 %v14982_v14 }
  0x29   :  { %13706 = vmatprep.mubr.msk.bf16.mxu0 %vm15245_vm0, %v15243_v0  ;;  %13712 = vmatprep.mubr.msk.bf16.mxu1 %vm15245_vm0, %v15243_v0 }
  0x2a   :  { %13716 = vmatprep.subr.bf16.mxu0 %v15243_v0  ;;  %13722 = vmatprep.subr.bf16.mxu1 %v15243_v0 }
  0x2f   :  { %13707 = vmatmul.mubr.msk.bf16.vlgmr.msra.gmra.mxu0 %vm894_vm2, %v15365_v16  ;;  %13713 = vmatmul.mubr.msk.bf16.vlgmr.msra.gmra.mxu1 %vm894_vm2, %v15365_v16 }
  0x30   :  { %13717 = vmatpush3.bf16.msra.mxu0 %v14983_v17  ;;  %13723 = vmatpush3.bf16.msra.mxu1 %v14984_v18 }
  0x31   :  { %13718 = vmatprep.mubr.msk.bf16.mxu0 %vm15245_vm0, %v15243_v0  ;;  %13724 = vmatprep.mubr.msk.bf16.mxu1 %vm15245_vm0, %v15243_v0 }
  0x32   :  { %13728 = vmatprep.subr.bf16.mxu0 %v15243_v0  ;;  %13734 = vmatprep.subr.bf16.mxu1 %v15243_v0 }
  0x37   :  { %13719 = vmatmul.mubr.msk.bf16.vlgmr.msra.gmra.mxu0 %vm894_vm2, %v15365_v16  ;;  %13725 = vmatmul.mubr.msk.bf16.vlgmr.msra.gmra.mxu1 %vm894_vm2, %v15365_v16 }
  0x38   :  { %13729 = vmatpush3.bf16.msra.mxu0 %v14981_v13  ;;  %13735 = vmatpush3.bf16.msra.mxu1 %v14982_v14  ;;  %v12732_v13 = vld [vmem:[%s15478_s29 + $0x2] ss:$0 sm:$0xff] }
  0x39   :  { %13730 = vmatprep.mubr.msk.bf16.mxu0 %vm15245_vm0, %v15243_v0  ;;  %13736 = vmatprep.mubr.msk.bf16.mxu1 %vm15245_vm0, %v15243_v0 }
  0x3a   :  { %13740 = vmatprep.subr.bf16.mxu0 %v15243_v0  ;;  %13746 = vmatprep.subr.bf16.mxu1 %v15243_v0 }
  0x3f   :  { %13731 = vmatmul.mubr.msk.bf16.vlgmr.msra.gmra.mxu0 %vm894_vm2, %v15390_v20  ;;  %13737 = vmatmul.mubr.msk.bf16.vlgmr.msra.gmra.mxu1 %vm894_vm2, %v15390_v20 }
  0x40   :  { %13741 = vmatpush3.bf16.msra.mxu0 %v14983_v17  ;;  %13747 = vmatpush3.bf16.msra.mxu1 %v14984_v18  ;;  %v12733_v17 = vld [vmem:[%s15478_s29 + $0x3] ss:$0 sm:$0xff] }
  0x41   :  { %13742 = vmatprep.mubr.msk.bf16.mxu0 %vm15245_vm0, %v15243_v0  ;;  %13748 = vmatprep.mubr.msk.bf16.mxu1 %vm15245_vm0, %v15243_v0 }
  0x42   :  { %13752 = vmatprep.subr.bf16.mxu0 %v15243_v0  ;;  %13758 = vmatprep.subr.bf16.mxu1 %v15243_v0 }
  0x47   :  { %13743 = vmatmul.mubr.msk.bf16.vlgmr.msra.gmra.mxu0 %vm894_vm2, %v15390_v20  ;;  %13749 = vmatmul.mubr.msk.bf16.vlgmr.msra.gmra.mxu1 %vm894_vm2, %v15390_v20 }
  0x48   :  { %13754 = vmatprep.mubr.msk.bf16.mxu0 %vm15245_vm0, %v15243_v0  ;;  %13760 = vmatprep.mubr.msk.bf16.mxu1 %vm15245_vm0, %v15243_v0 }
  0x49   :  { %13753 = vmatpush3.bf16.msra.mxu0 %v14985_v21  ;;  %13759 = vmatpush3.bf16.msra.mxu1 %v14987_v23 }
  0x4a   :  { %13764 = vmatprep.subr.bf16.mxu0 %v15243_v0  ;;  %13770 = vmatprep.subr.bf16.mxu1 %v15243_v0 }
  0x4f   :  { %13755 = vmatmul.mubr.msk.bf16.vlgmr.msra.gmra.mxu0 %vm894_vm2, %v15365_v16  ;;  %13761 = vmatmul.mubr.msk.bf16.vlgmr.msra.gmra.mxu1 %vm894_vm2, %v15365_v16 }
  0x50   :  { %13766 = vmatprep.mubr.msk.bf16.mxu0 %vm15245_vm0, %v15243_v0  ;;  %13765 = vmatpush3.bf16.msra.mxu0 %v14986_v22 }
  0x51   :  { %13776 = vmatprep.subr.bf16.mxu0 %v15243_v0  ;;  %13772 = vmatprep.mubr.msk.bf16.mxu1 %vm15245_vm0, %v15243_v0 }
  0x52   :  { %13771 = vmatpush3.bf16.msra.mxu1 %v14988_v24 }
  0x53   :  { %13782 = vmatprep.subr.bf16.mxu1 %v15243_v0 }
  0x57   :  { %13767 = vmatmul.mubr.msk.bf16.vlgmr.msra.gmra.mxu0 %vm894_vm2, %v15365_v16  ;;  %13773 = vmatmul.mubr.msk.bf16.vlgmr.msra.gmra.mxu1 %vm894_vm2, %v15365_v16 }
  0x58   :  { %13777 = vmatpush3.bf16.msra.mxu0 %v14985_v21  ;;  %13778 = vmatprep.mubr.msk.bf16.mxu0 %vm15245_vm0, %v15243_v0 }
  0x59   :  { %13788 = vmatprep.subr.bf16.mxu0 %v15243_v0  ;;  %13783 = vmatpush3.bf16.msra.mxu1 %v14987_v23 }
  0x5a   :  { %13784 = vmatprep.mubr.msk.bf16.mxu1 %vm15245_vm0, %v15243_v0  ;;  %13794 = vmatprep.subr.bf16.mxu1 %v15243_v0 }
  0x5f   :  { %13779 = vmatmul.mubr.msk.bf16.vlgmr.msra.gmra.mxu0 %vm894_vm2, %v15390_v20  ;;  %13785 = vmatmul.mubr.msk.bf16.vlgmr.msra.gmra.mxu1 %vm894_vm2, %v15390_v20 }
  0x60   :  { %13789 = vmatpush3.bf16.msra.mxu0 %v14986_v22  ;;  %13790 = vmatprep.mubr.msk.bf16.mxu0 %vm15245_vm0, %v15243_v0 }
  0x61   :  { %13800 = vmatprep.subr.mxu0 %v15243_v0  ;;  %13795 = vmatpush3.bf16.msra.mxu1 %v14988_v24 }
  0x62   :  { %13796 = vmatprep.mubr.msk.bf16.mxu1 %vm15245_vm0, %v15243_v0  ;;  %13815 = vmatprep.subr.mxu1 %v15243_v0 }
  0x67   :  { %13791 = vmatmul.mubr.msk.bf16.vlgmr.msra.gmra.mxu0 %vm894_vm2, %v15390_v20  ;;  %13797 = vmatmul.mubr.msk.bf16.vlgmr.msra.gmra.mxu1 %vm894_vm2, %v15390_v20 }
  0x68   :  { %13802 = vmatprep.mubr.msk.f32.mxu0 %vm15245_vm0, %v15243_v0  ;;  %13817 = vmatprep.mubr.msk.f32.mxu1 %vm15245_vm0, %v15243_v0 }
  0xcf   :  { %v539_v25 = vpop.f32.mrf.mxu0  ;;  %v591_v26 = vpop.f32.mrf.mxu1 }
  0xd0   :  { %v540_v3 = vadd.f32 %v12730_v60, %v539_v25  ;;  %v592_v11 = vadd.f32 %v12731_v5, %v591_v26 }
  0xd1   :  { %v13646_v27 = vpop.f32.mrf.mxu0  ;;  %v13654_v28 = vpop.f32.mrf.mxu1 }
  0xd3   :  { %v542_v29 = vpop.f32.mrf.mxu0  ;;  %v594_v30 = vpop.f32.mrf.mxu1 }
  0xd5   :  { %v13647_v31 = vpop.f32.mrf.mxu0  ;;  %v13655_v32 = vpop.f32.mrf.mxu1 }
  0xd7   :  { %v15460_v33 = vpop.f32.mrf.mxu0  ;;  %v15462_v34 = vpop.f32.mrf.mxu1 }
  0xd8   :  { %v644_v22 = vadd.f32 %v12732_v13, %v15460_v33  ;;  %v696_v24 = vadd.f32 %v12733_v17, %v15462_v34 }
  0xd9   :  { %v13662_v35 = vpop.f32.mrf.mxu0  ;;  %v13670_v36 = vpop.f32.mrf.mxu1 }
  0xdb   :  { %v646_v37 = vpop.f32.mrf.mxu0  ;;  %v698_v38 = vpop.f32.mrf.mxu1 }
  0xdd   :  { %v13663_v39 = vpop.f32.mrf.mxu0  ;;  %v13671_v40 = vpop.f32.mrf.mxu1 }
  0xdf   :  { %v15464_v41 = vpop.f32.mrf.mxu0  ;;  %v15466_v42 = vpop.f32.mrf.mxu1 }
  0xe0   :  { %v739_v34 = vadd.f32 %v12730_v60, %v15464_v41  ;;  %v779_v36 = vadd.f32 %v12731_v5, %v15466_v42 }
  0xe1   :  { %v13678_v43 = vpop.f32.mrf.mxu0  ;;  %v13686_v44 = vpop.f32.mrf.mxu1 }
  0xe3   :  { %v741_v45 = vpop.f32.mrf.mxu0  ;;  %v781_v46 = vpop.f32.mrf.mxu1 }
  0xe5   :  { %v13679_v47 = vpop.f32.mrf.mxu0  ;;  %v13687_v48 = vpop.f32.mrf.mxu1 }
  0xe7   :  { %v15473_v49 = vpop.f32.mrf.mxu0  ;;  %v15480_v50 = vpop.f32.mrf.mxu1 }
  0xe8   :  { %v819_v46 = vadd.f32 %v12732_v13, %v15473_v49  ;;  %v859_v48 = vadd.f32 %v12733_v17, %v15480_v50 }
  0xe9   :  { %v13694_v51 = vpop.f32.mrf.mxu0  ;;  %v13702_v52 = vpop.f32.mrf.mxu1 }
  0xeb   :  { %v821_v53 = vpop.f32.mrf.mxu0  ;;  %v861_v54 = vpop.f32.mrf.mxu1 }
  0xec   :  { %v12766_v54 = vld [vmem:[%s15525_s3] ss:$0 sm:$0xff] }
  0xed   :  { %v13695_v55 = vpop.f32.mrf.mxu0  ;;  %v13703_v57 = vpop.f32.mrf.mxu1 }
  0xef   :  { %v932_v58 = vpop.f32.mrf.mxu0  ;;  %v978_v62 = vpop.f32.mrf.mxu1 }
  0xf0   :  { %v933_v61 = vadd.f32 %v12750_v56, %v932_v58  ;;  %v979_v1 = vadd.f32 %v12751_v59, %v978_v62 }
  0xf1   :  { %v13708_v63 = vpop.f32.mrf.mxu0  ;;  %v13714_v2 = vpop.f32.mrf.mxu1 }
  0xf2   :  { %13801 = vmatpush3.xpose.msk.msra.mxu0 %vm1619_vm3, %v933_v61 }
  0xf3   :  { %v935_v4 = vpop.f32.mrf.mxu0  ;;  %13805 = vmatprep.subr.mxu0 %v15243_v0  ;;  %v981_v6 = vpop.f32.mrf.mxu1 }
  0xf5   :  { %v13709_v7 = vpop.f32.mrf.mxu0  ;;  %13803 = vmatmul.mubr.msk.f32.vlgmr.msra.gmra.mxu0 %vm1619_vm3, %v540_v3  ;;  %v13715_v9 = vpop.f32.mrf.mxu1 }
  0xf6   :  { %13806 = vmatpush3.xpose.msk.msra.mxu0 %vm1619_vm3, %v979_v1  ;;  %13807 = vmatprep.mubr.msk.f32.mxu0 %vm15245_vm0, %v15243_v0 }
  0xf7   :  { %v1024_v12 = vpop.f32.mrf.mxu0  ;;  %13810 = vmatprep.subr.mxu0 %v15243_v0  ;;  %v1070_v15 = vpop.f32.mrf.mxu1 }
  0xf8   :  { %v1025_v14 = vadd.f32 %v12752_v8, %v1024_v12  ;;  %v1071_v18 = vadd.f32 %v12753_v10, %v1070_v15 }
  0xf9   :  { %v13720_v19 = vpop.f32.mrf.mxu0  ;;  %13808 = vmatmul.mubr.msk.f32.vlgmr.msra.gmra.mxu0 %vm1619_vm3, %v592_v11  ;;  %v13726_v21 = vpop.f32.mrf.mxu1 }
  0xfa   :  { %13811 = vmatpush3.xpose.msk.msra.mxu0 %vm1619_vm3, %v1025_v14  ;;  %13812 = vmatprep.mubr.msk.f32.mxu0 %vm15245_vm0, %v15243_v0 }
  0xfb   :  { %13816 = vmatpush3.xpose.msk.msra.mxu1 %vm1619_vm3, %v1071_v18  ;;  %v1027_v23 = vpop.f32.mrf.mxu0  ;;  %13820 = vmatprep.subr.mxu0 %v15243_v0  ;;  %v1073_v25 = vpop.f32.mrf.mxu1 }
  0xfc   :  { %13825 = vmatprep.subr.mxu1 %v15243_v0 }
  0xfd   :  { %v13721_v26 = vpop.f32.mrf.mxu0  ;;  %13813 = vmatmul.mubr.msk.f32.vlgmr.msra.gmra.mxu0 %vm1619_vm3, %v644_v22  ;;  %v13727_v27 = vpop.f32.mrf.mxu1 }
  0xfe   :  { %13818 = vmatmul.mubr.msk.f32.vlgmr.msra.gmra.mxu1 %vm1619_vm3, %v696_v24  ;;  %13822 = vmatprep.mubr.msk.f32.mxu0 %vm15245_vm0, %v15243_v0 }
  0xff   :  { %v1113_v28 = vpop.f32.mrf.mxu0  ;;  %13827 = vmatprep.mubr.msk.f32.mxu1 %vm15245_vm0, %v15243_v0  ;;  %v1153_v30 = vpop.f32.mrf.mxu1 }
 0x100   :  { %v1114_v29 = vadd.f32 %v12750_v56, %v1113_v28  ;;  %v1154_v31 = vadd.f32 %v12751_v59, %v1153_v30  ;;  %v12767_v59 = vld [vmem:[%s15525_s3 + $0x1] ss:$0 sm:$0xff] }
 0x101   :  { %v13732_v32 = vpop.f32.mrf.mxu0  ;;  %v13738_v33 = vpop.f32.mrf.mxu1 }
 0x102   :  { %13821 = vmatpush3.xpose.msk.msra.mxu0 %vm1619_vm3, %v1114_v29  ;;  %13826 = vmatpush3.xpose.msk.msra.mxu1 %vm1619_vm3, %v1154_v31  ;;  %v12782_v29 = vld [vmem:[%s15560_s8] ss:$0 sm:$0xff] }
 0x103   :  { %v1116_v35 = vpop.f32.mrf.mxu0  ;;  %13830 = vmatprep.subr.mxu0 %v15243_v0  ;;  %v1156_v37 = vpop.f32.mrf.mxu1  ;;  %13835 = vmatprep.subr.mxu1 %v15243_v0 }
 0x105   :  { %v13733_v38 = vpop.f32.mrf.mxu0  ;;  %13823 = vmatmul.mubr.msk.f32.vlgmr.msra.gmra.mxu0 %vm1619_vm3, %v739_v34  ;;  %v13739_v39 = vpop.f32.mrf.mxu1  ;;  %13828 = vmatmul.mubr.msk.f32.vlgmr.msra.gmra.mxu1 %vm1619_vm3, %v779_v36 }
 0x106   :  { %13832 = vmatprep.mubr.msk.f32.mxu0 %vm15245_vm0, %v15243_v0  ;;  %13837 = vmatprep.mubr.msk.f32.mxu1 %vm15245_vm0, %v15243_v0 }
 0x107   :  { %v1193_v40 = vpop.f32.mrf.mxu0  ;;  %v1233_v42 = vpop.f32.mrf.mxu1 }
 0x108   :  { %v1194_v41 = vadd.f32 %v12752_v8, %v1193_v40  ;;  %v1234_v43 = vadd.f32 %v12753_v10, %v1233_v42 }
 0x109   :  { %v13744_v44 = vpop.f32.mrf.mxu0  ;;  %v13750_v45 = vpop.f32.mrf.mxu1 }
 0x10a   :  { %13831 = vmatpush3.xpose.msk.msra.mxu0 %vm1619_vm3, %v1194_v41  ;;  %13836 = vmatpush3.xpose.msk.msra.mxu1 %vm1619_vm3, %v1234_v43  ;;  %v12783_v45 = vld [vmem:[%s15560_s8 + $0x1] ss:$0 sm:$0xff] }
 0x10b   :  { %v1196_v47 = vpop.f32.mrf.mxu0  ;;  %13840 = vmatprep.subr.mxu0 %v15243_v0  ;;  %v1236_v51 = vpop.f32.mrf.mxu1  ;;  %13845 = vmatprep.subr.mxu1 %v15243_v0 }
 0x10d   :  { %v13745_v52 = vpop.f32.mrf.mxu0  ;;  %13833 = vmatmul.mubr.msk.f32.vlgmr.msra.gmra.mxu0 %vm1619_vm3, %v819_v46  ;;  %13838 = vmatmul.mubr.msk.f32.vlgmr.msra.gmra.mxu1 %vm1619_vm3, %v859_v48  ;;  %v13751_v53 = vpop.f32.mrf.mxu1 }
 0x10e   :  { %13842 = vmatprep.mubr.msk.f32.mxu0 %vm15245_vm0, %v15243_v0  ;;  %13847 = vmatprep.mubr.msk.f32.mxu1 %vm15245_vm0, %v15243_v0 }
 0x10f   :  { %v1303_v49 = vpop.f32.mrf.mxu0  ;;  %v1349_v61 = vpop.f32.mrf.mxu1 }
 0x110   :  { %v1304_v55 = vadd.f32 %v12766_v54, %v1303_v49  ;;  %v1350_v63 = vadd.f32 %v12767_v59, %v1349_v61 }
 0x111   :  { %v13756_v50 = vpop.f32.mrf.mxu0  ;;  %v13762_v1 = vpop.f32.mrf.mxu1 }
 0x112   :  { %13841 = vmatpush3.msra.mxu0 %v1304_v55  ;;  %13846 = vmatpush3.msra.mxu1 %v1350_v63 }
 0x113   :  { %v1306_v56 = vpop.f32.mrf.mxu0  ;;  %13850 = vmatprep.subr.mxu0 %v15243_v0  ;;  %v1352_v3 = vpop.f32.mrf.mxu1  ;;  %13855 = vmatprep.subr.mxu1 %v15243_v0 }
 0x115   :  { %v13757_v57 = vpop.f32.mrf.mxu0  ;;  %v13763_v6 = vpop.f32.mrf.mxu1 }
 0x117   :  { %v15543_v58 = vpop.f32.mrf.mxu0  ;;  %v15549_v8 = vpop.f32.mrf.mxu1 }
 0x119   :  { %v13768_v60 = vpop.f32.mrf.mxu0  ;;  %v13774_v10 = vpop.f32.mrf.mxu1 }
 0x11b   :  { %v1398_v62 = vpop.f32.mrf.mxu0  ;;  %v1444_v12 = vpop.f32.mrf.mxu1 }
 0x11d   :  { %v13769_v2 = vpop.f32.mrf.mxu0  ;;  %v13775_v14 = vpop.f32.mrf.mxu1 }
 0x11f   :  { %v1481_v4 = vpop.f32.mrf.mxu0  ;;  %v1521_v17 = vpop.f32.mrf.mxu1 }
 0x120   :  { %v15547_v5 = vadd.f32 %v12766_v54, %v1481_v4  ;;  %v15553_v19 = vadd.f32 %v12767_v59, %v1521_v17 }
 0x121   :  { %v13780_v7 = vpop.f32.mrf.mxu0  ;;  %v13786_v21 = vpop.f32.mrf.mxu1 }
 0x123   :  { %v1484_v9 = vpop.f32.mrf.mxu0  ;;  %v1524_v23 = vpop.f32.mrf.mxu1 }
 0x125   :  { %v13781_v11 = vpop.f32.mrf.mxu0  ;;  %v13787_v24 = vpop.f32.mrf.mxu1 }
 0x127   :  { %v15551_v13 = vpop.f32.mrf.mxu0  ;;  %v15555_v25 = vpop.f32.mrf.mxu1 }
 0x129   :  { %v13792_v15 = vpop.f32.mrf.mxu0  ;;  %v13798_v26 = vpop.f32.mrf.mxu1 }
 0x12b   :  { %v1564_v18 = vpop.f32.mrf.mxu0  ;;  %v1604_v27 = vpop.f32.mrf.mxu1 }
 0x12d   :  { %v13793_v22 = vpop.f32.mrf.mxu0  ;;  %v13799_v28 = vpop.f32.mrf.mxu1 }
 0x1b5   :  { %v1692_v30 = vpop.f32.mrf.mxu0 }
 0x1b6   :  { %v1693_v31 = vadd.f32 %v12782_v29, %v1692_v30 }
 0x1b7   :  { %v13804_v32 = vpop.f32.mrf.mxu0 }
 0x1b8   :  { %v2228_v33 = vsel %vm1619_vm3, %v1693_v31, -inf }
 0x1b9   :  { %2229 = vmax.xlane.f32.xlu0 %v2228_v33  ;;  %v1768_v34 = vpop.f32.mrf.mxu0 }
 0x1ba   :  { %v1769_v35 = vadd.f32 %v12782_v29, %v1768_v34 }
 0x1bb   :  { %v13809_v36 = vpop.f32.mrf.mxu0 }
 0x1bc   :  { %v2231_v37 = vsel %vm1619_vm3, %v1769_v35, -inf }
 0x1bd   :  { %2232 = vmax.xlane.f32.xlu0 %v2231_v37  ;;  %v1844_v38 = vpop.f32.mrf.mxu0 }
 0x1be   :  { %v1920_v39 = vpop.f32.mrf.mxu1  ;;  %v1845_v40 = vadd.f32 %v12782_v29, %v1844_v38 }
 0x1bf   :  { %v13814_v41 = vpop.f32.mrf.mxu0  ;;  %v1921_v42 = vadd.f32 %v12782_v29, %v1920_v39 }
 0x1c0   :  { %v13819_v43 = vpop.f32.mrf.mxu1  ;;  %v2234_v44 = vsel %vm1619_vm3, %v1845_v40, -inf }
 0x1c1   :  { %2235 = vmax.xlane.f32.xlu1 %v2234_v44  ;;  %v2237_v46 = vsel %vm1619_vm3, %v1921_v42, -inf }
 0x1c5   :  { %2238 = vmax.xlane.f32.xlu1 %v2237_v46  ;;  %v1996_v47 = vpop.f32.mrf.mxu0  ;;  %v2072_v48 = vpop.f32.mrf.mxu1 }
 0x1c6   :  { %v1997_v51 = vadd.f32 %v12783_v45, %v1996_v47  ;;  %v2073_v52 = vadd.f32 %v12783_v45, %v2072_v48 }
 0x1c7   :  { %v13824_v53 = vpop.f32.mrf.mxu0  ;;  %v13829_v54 = vpop.f32.mrf.mxu1 }
 0x1c8   :  { %v2240_v49 = vsel %vm1619_vm3, %v1997_v51, -inf  ;;  %v2243_v55 = vsel %vm1619_vm3, %v2073_v52, -inf  ;;  %v12768_v54 = vld [vmem:[%s15525_s3 + $0x2] ss:$0 sm:$0xff] }
 0x1c9   :  { %2241 = vmax.xlane.f32.xlu0 %v2240_v49  ;;  %2244 = vmax.xlane.f32.xlu1 %v2243_v55 }
 0x1cd   :  { %v2148_v50 = vpop.f32.mrf.mxu0  ;;  %v2224_v57 = vpop.f32.mrf.mxu1 }
 0x1ce   :  { %v2149_v56 = vadd.f32 %v12783_v45, %v2148_v50  ;;  %v2225_v59 = vadd.f32 %v12783_v45, %v2224_v57  ;;  %v1396_v50 = vadd.f32 %v12768_v54, %v15543_v58  ;;  %v12769_v57 = vld [vmem:[%s15525_s3 + $0x3] ss:$0 sm:$0xff] }
 0x1cf   :  { %v13834_v60 = vpop.f32.mrf.mxu0  ;;  %v13839_v61 = vpop.f32.mrf.mxu1 }
 0x1d0   :  { %v2246_v62 = vsel %vm1619_vm3, %v2149_v56, -inf  ;;  %v2249_v63 = vsel %vm1619_vm3, %v2225_v59, -inf }
 0x1d1   :  { %2247 = vmax.xlane.f32.xlu0 %v2246_v62  ;;  %2250 = vmax.xlane.f32.xlu1 %v2249_v63  ;;  %v1442_v62 = vadd.f32 %v12769_v57, %v15549_v8 }
 0x242   :  { %v2230_v1 = vpop.xlane.xlu0 %2229 }
 0x243   :  { %v2252_v2 = vsub.f32 %v1693_v31, %v2230_v1 }
 0x245   :  { %v2260_v3 = vmul.f32 1.442695, %v2252_v2 }
 0x246   :  { %v2233_v4 = vpop.xlane.xlu0 %2232 }
 0x247   :  { %15077 = vpow2.f32 %v2260_v3  ;;  %v2253_v6 = vsub.f32 %v1769_v35, %v2233_v4 }
 0x249   :  { %v2262_v7 = vmul.f32 1.442695, %v2253_v6 }
 0x24a   :  { %v2236_v9 = vpop.xlane.xlu1 %2235 }
 0x24b   :  { %15079 = vpow2.f32 %v2262_v7  ;;  %v2254_v10 = vsub.f32 %v1845_v40, %v2236_v9 }
 0x24d   :  { %v2264_v11 = vmul.f32 1.442695, %v2254_v10  ;;  %v1602_v10 = vadd.f32 %v12769_v57, %v15555_v25 }
 0x24e   :  { %v2239_v12 = vpop.xlane.xlu1 %2238 }
 0x24f   :  { %15081 = vpow2.f32 %v2264_v11  ;;  %v2255_v14 = vsub.f32 %v1921_v42, %v2239_v12  ;;  %v225_v12 = vld [vmem:[%s15629_s14] sm:$0xf] }
 0x251   :  { %v2266_v15 = vmul.f32 1.442695, %v2255_v14  ;;  %v2913_v14 = vsel %vm2911_vm4, %v225_v12, 0 }
 0x252   :  { %v2242_v17 = vpop.xlane.xlu0 %2241  ;;  %v2245_v18 = vpop.xlane.xlu1 %2244 }
 0x253   :  { %15083 = vpow2.f32 %v2266_v15  ;;  %v2256_v21 = vsub.f32 %v1997_v51, %v2242_v17  ;;  %v2257_v23 = vsub.f32 %v2073_v52, %v2245_v18  ;;  %v226_v15 = vld [vmem:[%s15629_s14 + $0x4] sm:$0xf]  ;;  %v227_v18 = vld [vmem:[%s15629_s14 + $0x8] sm:$0xf] }
 0x254   :  { %v15078_v22 = vpop.eup %15077  ;;  %v2959_v17 = vsel %vm2911_vm4, %v226_v15, 0 }
 0x255   :  { %v2268_v24 = vmul.f32 1.442695, %v2256_v21  ;;  %v2276_v26 = vsel %vm1619_vm3, %v15078_v22, 0.0  ;;  %v2270_v27 = vmul.f32 1.442695, %v2257_v23  ;;  %v3005_v23 = vsel %vm2911_vm4, %v227_v18, 0 }
 0x256   :  { %2277 = vadd.xlane.f32.xlu0 %v2276_v26  ;;  %v228_v26 = vld [vmem:[%s15629_s14 + $0xc] sm:$0xf] }
 0x257   :  { %15085 = vpow2.f32 %v2268_v24 }
 0x258   :  { %v15080_v28 = vpop.eup %15079  ;;  %15087 = vpow2.f32 %v2270_v27 }
 0x259   :  { %v2279_v29 = vsel %vm1619_vm3, %v15080_v28, 0.0 }
 0x25a   :  { %2280 = vadd.xlane.f32.xlu1 %v2279_v29  ;;  %v2248_v30 = vpop.xlane.xlu0 %2247  ;;  %v2251_v31 = vpop.xlane.xlu1 %2250  ;;  %v3051_v29 = vsel %vm2911_vm4, %v228_v26, 0 }
 0x25b   :  { %v2258_v32 = vsub.f32 %v2149_v56, %v2248_v30  ;;  %v2259_v34 = vsub.f32 %v2225_v59, %v2251_v31 }
 0x25c   :  { %v15082_v33 = vpop.eup %15081 }
 0x25d   :  { %v2272_v35 = vmul.f32 1.442695, %v2258_v32  ;;  %v2282_v36 = vsel %vm1619_vm3, %v15082_v33, 0.0  ;;  %v2274_v37 = vmul.f32 1.442695, %v2259_v34 }
 0x25e   :  { %2283 = vadd.xlane.f32.xlu0 %v2282_v36 }
 0x25f   :  { %15089 = vpow2.f32 %v2272_v35 }
 0x260   :  { %v15084_v38 = vpop.eup %15083  ;;  %15091 = vpow2.f32 %v2274_v37 }
 0x261   :  { %v2285_v39 = vsel %vm1619_vm3, %v15084_v38, 0.0 }
 0x262   :  { %2286 = vadd.xlane.f32.xlu1 %v2285_v39 }
 0x264   :  { %v15086_v40 = vpop.eup %15085 }
 0x265   :  { %v15088_v41 = vpop.eup %15087  ;;  %v2288_v42 = vsel %vm1619_vm3, %v15086_v40, 0.0 }
 0x266   :  { %v2291_v43 = vsel %vm1619_vm3, %v15088_v41, 0.0  ;;  %2289 = vadd.xlane.f32.xlu0 %v2288_v42 }
 0x267   :  { %2292 = vadd.xlane.f32.xlu1 %v2291_v43 }
 0x26c   :  { %v15578_v44 = vpop.eup %15089 }
 0x26d   :  { %v15580_v45 = vpop.eup %15091  ;;  %v2294_v46 = vsel %vm1619_vm3, %v15578_v44, 0.0 }
 0x26e   :  { %v2297_v47 = vsel %vm1619_vm3, %v15580_v45, 0.0  ;;  %2295 = vadd.xlane.f32.xlu0 %v2294_v46 }
 0x26f   :  { %2298 = vadd.xlane.f32.xlu1 %v2297_v47 }
 0x2df   :  { %v2278_v48 = vpop.xlane.xlu0 %2277 }
 0x2e0   :  { %15093 = vrcp.f32 %v2278_v48 }
 0x2e3   :  { %v2281_v51 = vpop.xlane.xlu1 %2280 }
 0x2e4   :  { %15095 = vrcp.f32 %v2281_v51 }
 0x2e7   :  { %v2284_v52 = vpop.xlane.xlu0 %2283 }
 0x2e8   :  { %15097 = vrcp.f32 %v2284_v52 }
 0x2eb   :  { %v2287_v53 = vpop.xlane.xlu1 %2286 }
 0x2ec   :  { %15099 = vrcp.f32 %v2287_v53 }
 0x2ed   :  { %v15094_v49 = vpop.eup %15093 }
 0x2ee   :  { %v2308_v55 = vmul.f32 %v15094_v49, %v15078_v22 }
 0x2ef   :  { %v2290_v56 = vpop.xlane.xlu0 %2289 }
 0x2f0   :  { %v2293_v59 = vpop.xlane.xlu1 %2292  ;;  %15101 = vrcp.f32 %v2290_v56  ;;  %13843 = vmatmul.mubr.msk.f32.vlgmr.msra.gmra.mxu0 %vm1619_vm3, %v2308_v55 }
 0x2f1   :  { %v15096_v60 = vpop.eup %15095  ;;  %15103 = vrcp.f32 %v2293_v59  ;;  %13851 = vmatpush3.msra.mxu0 %v1396_v50  ;;  %13852 = vmatprep.mubr.msk.f32.mxu0 %vm15245_vm0, %v15243_v0 }
 0x2f2   :  { %v2309_v61 = vmul.f32 %v15096_v60, %v15080_v28  ;;  %13860 = vmatprep.subr.mxu0 %v15243_v0 }
 0x2f4   :  { %13848 = vmatmul.mubr.msk.f32.vlgmr.msra.gmra.mxu1 %vm1619_vm3, %v2309_v61 }
 0x2f5   :  { %v15098_v58 = vpop.eup %15097  ;;  %13856 = vmatpush3.msra.mxu1 %v1442_v62  ;;  %13857 = vmatprep.mubr.msk.f32.mxu1 %vm15245_vm0, %v15243_v0 }
 0x2f6   :  { %v2310_v63 = vmul.f32 %v15098_v58, %v15082_v33  ;;  %13865 = vmatprep.subr.mxu1 %v15243_v0  ;;  %v12816_v58 = vld [vmem:[%s15674_s18] ss:$0 sm:$0xff] }
 0x2f7   :  { %v2296_v1 = vpop.xlane.xlu0 %2295 }
 0x2f8   :  { %v2299_v2 = vpop.xlane.xlu1 %2298  ;;  %15105 = vrcp.f32 %v2296_v1  ;;  %13853 = vmatmul.mubr.msk.f32.vlgmr.msra.gmra.mxu0 %vm1619_vm3, %v2310_v63 }
 0x2f9   :  { %v15100_v3 = vpop.eup %15099  ;;  %15107 = vrcp.f32 %v2299_v2  ;;  %13861 = vmatpush3.msra.mxu0 %v15547_v5  ;;  %13862 = vmatprep.mubr.msk.f32.mxu0 %vm15245_vm0, %v15243_v0  ;;  %v1562_v5 = vadd.f32 %v12768_v54, %v15551_v13 }
 0x2fa   :  { %v2311_v8 = vmul.f32 %v15100_v3, %v15084_v38  ;;  %13870 = vmatprep.subr.mxu0 %v15243_v0 }
 0x2fc   :  { %13858 = vmatmul.mubr.msk.f32.vlgmr.msra.gmra.mxu1 %vm1619_vm3, %v2311_v8 }
 0x2fd   :  { %v15102_v4 = vpop.eup %15101  ;;  %13866 = vmatpush3.msra.mxu1 %v15553_v19  ;;  %13867 = vmatprep.mubr.msk.f32.mxu1 %vm15245_vm0, %v15243_v0 }
 0x2fe   :  { %v15104_v6 = vpop.eup %15103  ;;  %13875 = vmatprep.subr.mxu1 %v15243_v0  ;;  %v2312_v7 = vmul.f32 %v15102_v4, %v15086_v40 }
 0x2ff   :  { %v2313_v9 = vmul.f32 %v15104_v6, %v15088_v41 }
 0x300   :  { %13863 = vmatmul.mubr.msk.f32.vlgmr.msra.gmra.mxu0 %vm1619_vm3, %v2312_v7  ;;  %v15237_v7 = vld [vmem:[%s15299_s9] sm:$0xff] }
 0x301   :  { %13868 = vmatmul.mubr.msk.f32.vlgmr.msra.gmra.mxu1 %vm1619_vm3, %v2313_v9  ;;  %13871 = vmatpush3.msra.mxu0 %v1562_v5 }
 0x302   :  { %13876 = vmatpush3.msra.mxu1 %v1602_v10  ;;  %13872 = vmatprep.mubr.msk.f32.mxu0 %vm15245_vm0, %v15243_v0 }
 0x303   :  { %13877 = vmatprep.mubr.msk.f32.mxu1 %vm15245_vm0, %v15243_v0  ;;  %13880 = vmatprep.subr.bf16.mxu0 %v15243_v0 }
 0x304   :  { %13886 = vmatprep.subr.bf16.mxu1 %v15243_v0 }
 0x305   :  { %v15106_v13 = vpop.eup %15105 }
 0x306   :  { %v15108_v19 = vpop.eup %15107  ;;  %v2314_v25 = vmul.f32 %v15106_v13, %v15578_v44 }
 0x307   :  { %v2315_v11 = vmul.f32 %v15108_v19, %v15580_v45 }
 0x308   :  { %13873 = vmatmul.mubr.msk.f32.vlgmr.msra.gmra.mxu0 %vm1619_vm3, %v2314_v25 }
 0x309   :  { %13878 = vmatmul.mubr.msk.f32.vlgmr.msra.gmra.mxu1 %vm1619_vm3, %v2315_v11  ;;  %13882 = vmatprep.mubr.msk.bf16.mxu0 %vm15245_vm0, %v15243_v0 }
 0x30a   :  { %13888 = vmatprep.mubr.msk.bf16.mxu1 %vm15245_vm0, %v15243_v0  ;;  %13881 = vmatpush3.bf16.msra.mxu0 %v2913_v14 }
 0x30b   :  { %13892 = vmatprep.subr.bf16.mxu0 %v15243_v0  ;;  %13887 = vmatpush3.bf16.msra.mxu1 %v2959_v17 }
 0x30c   :  { %13898 = vmatprep.subr.bf16.mxu1 %v15243_v0 }
 0x3b0   :  { %v2385_v21 = vpop.f32.mrf.mxu0 }
 0x3b1   :  { %v2900_v22 = vpack.c.bf16 %v2385_v21, %v2385_v21 }
 0x3b2   :  { %v13844_v24 = vpop.f32.mrf.mxu0 }
 0x3b3   :  { %13883 = vmatmul.mubr.msk.bf16.vlgmr.msra.gmra.mxu0 %vm1619_vm3, %v2900_v22 }
 0x3b4   :  { %v2458_v27 = vpop.f32.mrf.mxu1  ;;  %13893 = vmatpush3.bf16.msra.mxu0 %v3005_v23  ;;  %13894 = vmatprep.mubr.msk.bf16.mxu0 %vm15245_vm0, %v15243_v0 }
 0x3b5   :  { %v2901_v28 = vpack.c.bf16 %v2458_v27, %v2458_v27  ;;  %13904 = vmatprep.subr.bf16.mxu0 %v15243_v0 }
 0x3b6   :  { %v13849_v30 = vpop.f32.mrf.mxu1 }
 0x3b7   :  { %13889 = vmatmul.mubr.msk.bf16.vlgmr.msra.gmra.mxu1 %vm1619_vm3, %v2901_v28 }
 0x3b8   :  { %v2531_v31 = vpop.f32.mrf.mxu0  ;;  %13899 = vmatpush3.bf16.msra.mxu1 %v3051_v29  ;;  %13900 = vmatprep.mubr.msk.bf16.mxu1 %vm15245_vm0, %v15243_v0 }
 0x3b9   :  { %v2902_v32 = vpack.c.bf16 %v2531_v31, %v2531_v31  ;;  %13910 = vmatprep.subr.bf16.mxu1 %v15243_v0  ;;  %v15238_v31 = vld [vmem:[%s15299_s9 + $0x8] sm:$0xff]  ;;  %s15272_s9 = smov 26  }
 0x3ba   :  { %v13854_v33 = vpop.f32.mrf.mxu0 }
 0x3bb   :  { %13895 = vmatmul.mubr.msk.bf16.vlgmr.msra.gmra.mxu0 %vm1619_vm3, %v2902_v32 }
 0x3bc   :  { %v2604_v34 = vpop.f32.mrf.mxu1  ;;  %13905 = vmatpush3.bf16.msra.mxu0 %v2913_v14  ;;  %13906 = vmatprep.mubr.msk.bf16.mxu0 %vm15245_vm0, %v15243_v0 }
 0x3bd   :  { %v2903_v35 = vpack.c.bf16 %v2604_v34, %v2604_v34  ;;  %13916 = vmatprep.subr.bf16.mxu0 %v15243_v0 }
 0x3be   :  { %v13859_v36 = vpop.f32.mrf.mxu1 }
 0x3bf   :  { %13901 = vmatmul.mubr.msk.bf16.vlgmr.msra.gmra.mxu1 %vm1619_vm3, %v2903_v35 }
 0x3c0   :  { %v2677_v37 = vpop.f32.mrf.mxu0  ;;  %13911 = vmatpush3.bf16.msra.mxu1 %v2959_v17  ;;  %13912 = vmatprep.mubr.msk.bf16.mxu1 %vm15245_vm0, %v15243_v0 }
 0x3c1   :  { %v2904_v38 = vpack.c.bf16 %v2677_v37, %v2677_v37  ;;  %v2750_v39 = vpop.f32.mrf.mxu1  ;;  %13922 = vmatprep.subr.bf16.mxu1 %v15243_v0 }
 0x3c2   :  { %v13864_v40 = vpop.f32.mrf.mxu0  ;;  %v2905_v42 = vpack.c.bf16 %v2750_v39, %v2750_v39 }
 0x3c3   :  { %v13869_v41 = vpop.f32.mrf.mxu1  ;;  %13907 = vmatmul.mubr.msk.bf16.vlgmr.msra.gmra.mxu0 %vm1619_vm3, %v2904_v38 }
 0x3c4   :  { %13917 = vmatpush3.bf16.msra.mxu0 %v3005_v23  ;;  %13918 = vmatprep.mubr.msk.bf16.mxu0 %vm15245_vm0, %v15243_v0 }
 0x3c5   :  { %13928 = vmatprep.subr.bf16.mxu0 %v15243_v0 }
 0x3c7   :  { %13913 = vmatmul.mubr.msk.bf16.vlgmr.msra.gmra.mxu1 %vm1619_vm3, %v2905_v42 }
 0x3c8   :  { %v2823_v43 = vpop.f32.mrf.mxu0  ;;  %13923 = vmatpush3.bf16.msra.mxu1 %v3051_v29  ;;  %13924 = vmatprep.mubr.msk.bf16.mxu1 %vm15245_vm0, %v15243_v0 }
 0x3c9   :  { %v2906_v44 = vpack.c.bf16 %v2823_v43, %v2823_v43  ;;  %v2896_v45 = vpop.f32.mrf.mxu1  ;;  %13936 = vmatprep.subr.bf16.mxu1 %v15243_v0 }
 0x3ca   :  { %v13874_v46 = vpop.f32.mrf.mxu0  ;;  %v2907_v48 = vpack.c.bf16 %v2896_v45, %v2896_v45  ;;  %v14989_v45 = vld [vmem:[%s15686_s23 + $0x8] sm:$0xff]  }
 0x3cb   :  { %v13879_v47 = vpop.f32.mrf.mxu1  ;;  %13919 = vmatmul.mubr.msk.bf16.vlgmr.msra.gmra.mxu0 %vm1619_vm3, %v2906_v44  ;;  %v14990_v46 = vld [vmem:[%s15686_s23] sm:$0xff]  }
 0x3cc   :  { %13932 = vmatprep.mubr.msk.bf16.mxu0 %vm15245_vm0, %v15243_v0  ;;  %13929 = vmatpush3.bf16.msra.mxu0 %v14989_v45  ;;  %v14991_v47 = vld [vmem:[%s15695_s28 + $0x18] sm:$0xff]  }
 0x3cd   :  { %13930 = vmatprep.subr.bf16.mxu0 %v15243_v0 }
 0x3cf   :  { %13925 = vmatmul.mubr.msk.bf16.vlgmr.msra.gmra.mxu1 %vm1619_vm3, %v2907_v48 }
 0x3d0   :  { %13944 = vmatprep.mubr.msk.bf16.mxu1 %vm15245_vm0, %v15243_v0  ;;  %13931 = vmatpush3.bf16.msra.mxu0 %v14990_v46 }
 0x3d1   :  { %13948 = vmatprep.subr.bf16.mxu0 %v15243_v0  ;;  %13937 = vmatpush3.bf16.msra.mxu1 %v14991_v47 }
 0x3d2   :  { %13938 = vmatprep.subr.bf16.mxu1 %v15243_v0 }
 0x473   :  { %v2949_v51 = vpop.f32.mrf.mxu0 }
 0x475   :  { %v13884_v52 = vpop.f32.mrf.mxu0 }
 0x477   :  { %v2952_v53 = vpop.f32.mrf.mxu0  ;;  %v2995_v54 = vpop.f32.mrf.mxu1 }
 0x478   :  { %v3265_v57 = vadd.f32 %v2995_v54, %v2949_v51 }
 0x479   :  { %v13885_v49 = vpop.f32.mrf.mxu0  ;;  %v13890_v55 = vpop.f32.mrf.mxu1 }
 0x47b   :  { %v2998_v50 = vpop.f32.mrf.mxu1  ;;  %v3041_v56 = vpop.f32.mrf.mxu0 }
 0x47c   :  { %v3267_v61 = vadd.f32 %v3265_v57, %v3041_v56  ;;  %v12817_v56 = vld [vmem:[%s15702_s4] ss:$0 sm:$0xff] }
 0x47d   :  { %v13891_v59 = vpop.f32.mrf.mxu1  ;;  %v13896_v60 = vpop.f32.mrf.mxu0 }
 0x47f   :  { %v3044_v62 = vpop.f32.mrf.mxu0  ;;  %v3087_v63 = vpop.f32.mrf.mxu1 }
 0x480   :  { %v3269_v1 = vadd.f32 %v3267_v61, %v3087_v63  ;;  %v12818_v61 = vld [vmem:[%s15707_s11] ss:$0 sm:$0xff] }
 0x481   :  { %v13897_v2 = vpop.f32.mrf.mxu0  ;;  %v13902_v3 = vpop.f32.mrf.mxu1 }
 0x482   :  { %v3277_v8 = vadd.f32 %v12816_v58, %v3269_v1  ;;  %v14992_v2 = vld [vmem:[%s15695_s28 + $0x10] sm:$0xff]   ;;  %v14993_v3 = vld [vmem:[%s15695_s28 + $0x8] sm:$0xff]  }
 0x483   :  { %v3090_v4 = vpop.f32.mrf.mxu1  ;;  %v3130_v6 = vpop.f32.mrf.mxu0  ;;  %13939 = vmatpush3.bf16.msra.mxu1 %v14992_v2  ;;  %v15004_v2 = vld [vmem:[%s15755_s10] sm:$0xff]  }
 0x484   :  { %v3279_v5 = vadd.f32 %v15237_v7, %v3277_v8  ;;  %13940 = vmatprep.subr.bf16.mxu1 %v15243_v0  ;;  %v14994_v8 = vld [vmem:[%s15695_s28] sm:$0xff]  }
 0x485   :  { %v13903_v9 = vpop.f32.mrf.mxu1  ;;  %v13908_v10 = vpop.f32.mrf.mxu0  ;;  %v12819_v4 = vld [vmem:[%s15723_s17] ss:$0 sm:$0xff] }
 0x486   :  { %v3281_v13 = vsel %vm501_vm1, %v3279_v5, 0.0 }
 0x487   :  { %v3173_v19 = vpop.f32.mrf.mxu1  ;;  %3282 = vadd.xlane.f32.xlu0 %v3281_v13  ;;  %v3133_v25 = vpop.f32.mrf.mxu0  ;;  %13941 = vmatpush3.bf16.msra.mxu1 %v14993_v3  ;;  %v15005_v3 = vld [vmem:[%s15755_s10 + $0x28] sm:$0xff]  }
 0x488   :  { %v3266_v17 = vadd.f32 %v3173_v19, %v3130_v6  ;;  %13942 = vmatprep.subr.bf16.mxu1 %v15243_v0 }
 0x489   :  { %v13909_v11 = vpop.f32.mrf.mxu0  ;;  %v13914_v12 = vpop.f32.mrf.mxu1 }
 0x48a   :  { %v12823_v12 = vld [vmem:[%s15732_s24] ss:$0 sm:$0xff] }
 0x48b   :  { %v3176_v14 = vpop.f32.mrf.mxu1  ;;  %v3216_v15 = vpop.f32.mrf.mxu0  ;;  %13943 = vmatpush3.bf16.msra.mxu1 %v14994_v8  ;;  %v15006_v8 = vld [vmem:[%s15755_s10 + $0x20] sm:$0xff]  }
 0x48c   :  { %v3268_v22 = vadd.f32 %v3266_v17, %v3216_v15  ;;  %13964 = vmatprep.subr.bf16.mxu1 %v15243_v0 }
 0x48d   :  { %v13915_v18 = vpop.f32.mrf.mxu1  ;;  %v13920_v21 = vpop.f32.mrf.mxu0 }
 0x48f   :  { %v3219_v23 = vpop.f32.mrf.mxu0  ;;  %v3259_v24 = vpop.f32.mrf.mxu1 }
 0x490   :  { %v3270_v26 = vadd.f32 %v3268_v22, %v3259_v24 }
 0x491   :  { %v13921_v27 = vpop.f32.mrf.mxu0  ;;  %v13926_v28 = vpop.f32.mrf.mxu1 }
 0x492   :  { %v3278_v29 = vadd.f32 %v12816_v58, %v3270_v26 }
 0x493   :  { %v3262_v30 = vpop.f32.mrf.mxu1 }
 0x494   :  { %v3280_v32 = vadd.f32 %v15238_v31, %v3278_v29 }
 0x495   :  { %v13927_v33 = vpop.f32.mrf.mxu1 }
 0x496   :  { %v3284_v34 = vsel %vm501_vm1, %v3280_v32, 0.0 }
 0x497   :  { %3285 = vadd.xlane.f32.xlu1 %v3284_v34 }
 0x510   :  { %v3283_v35 = vpop.xlane.xlu0 %3282 }
 0x511   :  { %v3288_v36 = vmul.f32 0.03125, %v3283_v35 }
 0x513   :  { %v3290_v37 = vsub.f32 %v3279_v5, %v3288_v36 }
 0x515   :  { %v3292_v38 = vmul.f32 %v3290_v37, %v3290_v37 }
 0x517   :  { %v3294_v39 = vsel %vm501_vm1, %v3292_v38, 0.0  ;;  %v14995_v38 = vld [vmem:[%s15742_s1 + $0x8] sm:$0xff]  }
 0x518   :  { %3295 = vadd.xlane.f32.xlu0 %v3294_v39  ;;  %v14996_v39 = vld [vmem:[%s15742_s1 + $0x28] sm:$0xff]  }
 0x520   :  { %v3286_v40 = vpop.xlane.xlu1 %3285 }
 0x521   :  { %v3289_v41 = vmul.f32 0.03125, %v3286_v40  ;;  %v14997_v40 = vld [vmem:[%s15742_s1] sm:$0xff]  }
 0x523   :  { %v3291_v42 = vsub.f32 %v3280_v32, %v3289_v41  ;;  %v14998_v41 = vld [vmem:[%s15742_s1 + $0x20] sm:$0xff]  }
 0x525   :  { %v3293_v43 = vmul.f32 %v3291_v42, %v3291_v42 }
 0x527   :  { %v3297_v44 = vsel %vm501_vm1, %v3293_v43, 0.0 }
 0x528   :  { %3298 = vadd.xlane.f32.xlu1 %v3297_v44 }
 0x5a1   :  { %v3296_v48 = vpop.xlane.xlu0 %3295 }
 0x5a2   :  { %v3300_v51 = vmul.f32 0.03125, %v3296_v48 }
 0x5a4   :  { %v3302_v52 = vadd.f32 1e-05, %v3300_v51  ;;  %v12829_v51 = vld [vmem:[%s15765_s27] ss:$0 sm:$0xff] }
 0x5a6   :  { %15109 = vrsqrt.f32 %v3302_v52 }
 0x5b1   :  { %v3299_v53 = vpop.xlane.xlu1 %3298 }
 0x5b2   :  { %v3301_v54 = vmul.f32 0.03125, %v3299_v53  ;;  %v12830_v53 = vld [vmem:[%s15770_s7] ss:$0 sm:$0xff] }
 0x5b3   :  { %v15110_v55 = vpop.eup %15109 }
 0x5b4   :  { %v3303_v49 = vadd.f32 1e-05, %v3301_v54  ;;  %v3306_v50 = vmul.f32 %v15110_v55, %v3290_v37 }
 0x5b6   :  { %15111 = vrsqrt.f32 %v3303_v49  ;;  %v3314_v60 = vmul.f32 %v12817_v56, %v3306_v50 }
 0x5b8   :  { %v3322_v58 = vadd.f32 %v12818_v61, %v3314_v60  ;;  %v15000_v60 = vld [vmem:[%s15742_s1 + $0x10] sm:$0xff]  }
 0x5c3   :  { %v15112_v57 = vpop.eup %15111 }
 0x5c4   :  { %v3307_v59 = vmul.f32 %v15112_v57, %v3291_v42 }
 0x5c6   :  { %v3315_v62 = vmul.f32 %v12817_v56, %v3307_v59  ;;  %v14999_v56 = vld [vmem:[%s15742_s1 + $0x18] sm:$0xff]  }
 0x5c8   :  { %v3323_v63 = vadd.f32 %v12818_v61, %v3315_v62  ;;  %v15001_v62 = vld [vmem:[%s15742_s1 + $0x38] sm:$0xff]  }
 0x5ca   :  { %v3324_v1 = vpack.c.bf16 %v3323_v63, %v3322_v58 }
 0x5cc   :  { %13933 = vmatmul.mubr.msk.bf16.vlgmr.msra.gmra.mxu0 %vm501_vm1, %v3324_v1  ;;  %v15003_v1 = vld [vmem:[%s15755_s10 + $0x8] sm:$0xff]  }
 0x5cd   :  { %13952 = vmatprep.mubr.msk.bf16.mxu0 %vm15245_vm0, %v15243_v0  ;;  %13949 = vmatpush3.bf16.msra.mxu0 %v14995_v38 }
 0x5ce   :  { %13950 = vmatprep.subr.bf16.mxu0 %v15243_v0 }
 0x5d1   :  { %13951 = vmatpush3.bf16.msra.mxu0 %v14997_v40 }
 0x5d2   :  { %13956 = vmatprep.subr.bf16.mxu0 %v15243_v0 }
 0x68c   :  { %v3380_v6 = vpop.f32.mrf.mxu0 }
 0x68d   :  { %v3381_v5 = vadd.f32 %v12819_v4, %v3380_v6  ;;  %v15008_v6 = vld [vmem:[%s15755_s10 + $0x10] sm:$0xff]  }
 0x68e   :  { %v13934_v7 = vpop.f32.mrf.mxu0 }
 0x68f   :  { %v3387_v19 = vmax.f32 %v3381_v5, 0.0  ;;  %v15009_v7 = vld [vmem:[%s15755_s10 + $0x38] sm:$0xff]   ;;  %v15010_v5 = vld [vmem:[%s15755_s10 + $0x30] sm:$0xff]  }
 0x690   :  { %v3383_v9 = vpop.f32.mrf.mxu0 }
 0x691   :  { %v3384_v10 = vadd.f32 %v12819_v4, %v3383_v9  ;;  %v15007_v4 = vld [vmem:[%s15755_s10 + $0x18] sm:$0xff]   ;;  %v15011_v9 = vld [vmem:[%s15760_s19 + $0x8] sm:$0xff]  }
 0x692   :  { %v13935_v13 = vpop.f32.mrf.mxu0 }
 0x693   :  { %v3388_v25 = vmax.f32 %v3384_v10, 0.0  ;;  %v15012_v10 = vld [vmem:[%s15760_s19] sm:$0xff]   ;;  %v15013_v13 = vld [vmem:[%s15760_s19 + $0x28] sm:$0xff]  }
 0x695   :  { %v3389_v11 = vpack.c.bf16 %v3388_v25, %v3387_v19  ;;  %v15014_v19 = vld [vmem:[%s15760_s19 + $0x20] sm:$0xff]   ;;  %v15015_v25 = vld [vmem:[%s15760_s19 + $0x18] sm:$0xff]  }
 0x697   :  { %13945 = vmatmul.mubr.msk.bf16.vlgmr.msra.gmra.mxu1 %vm3420_vm5, %v3389_v11  ;;  %v15016_v11 = vld [vmem:[%s15760_s19 + $0x10] sm:$0xff]  }
 0x698   :  { %13968 = vmatprep.mubr.msk.bf16.mxu1 %vm15245_vm0, %v15243_v0  ;;  %13965 = vmatpush3.bf16.msra.mxu1 %v14996_v39 }
 0x699   :  { %13966 = vmatprep.subr.bf16.mxu1 %v15243_v0 }
 0x69c   :  { %13967 = vmatpush3.bf16.msra.mxu1 %v14998_v41 }
 0x69d   :  { %13980 = vmatprep.subr.bf16.mxu1 %v15243_v0 }
 0x757   :  { %v3458_v14 = vpop.f32.mrf.mxu1 }
 0x758   :  { %v3459_v15 = vadd.f32 %v12823_v12, %v3458_v14  ;;  %v15018_v14 = vld [vmem:[%s15760_s19 + $0x30] sm:$0xff]  }
 0x759   :  { %v13946_v17 = vpop.f32.mrf.mxu1 }
 0x75a   :  { %v3465_v18 = vadd.f32 %v3459_v15, %v3322_v58 }
 0x75b   :  { %v3461_v21 = vpop.f32.mrf.mxu1 }
 0x75c   :  { %v3462_v22 = vadd.f32 %v12823_v12, %v3461_v21  ;;  %v3467_v23 = vsel %vm501_vm1, %v3465_v18, 0.0  ;;  %v15017_v12 = vld [vmem:[%s15760_s19 + $0x38] sm:$0xff]  }
 0x75d   :  { %3468 = vadd.xlane.f32.xlu0 %v3467_v23  ;;  %v13947_v24 = vpop.f32.mrf.mxu1 }
 0x75e   :  { %v3466_v26 = vadd.f32 %v3462_v22, %v3323_v63  ;;  %v15002_v63 = vld [vmem:[%s15742_s1 + $0x30] sm:$0xff]  }
 0x760   :  { %v3470_v27 = vsel %vm501_vm1, %v3466_v26, 0.0 }
 0x761   :  { %3471 = vadd.xlane.f32.xlu1 %v3470_v27 }
 0x7e6   :  { %v3469_v28 = vpop.xlane.xlu0 %3468 }
 0x7e7   :  { %v3473_v29 = vmul.f32 0.03125, %v3469_v28 }
 0x7e9   :  { %v3475_v30 = vsub.f32 %v3465_v18, %v3473_v29 }
 0x7ea   :  { %v3472_v31 = vpop.xlane.xlu1 %3471 }
 0x7eb   :  { %v3474_v32 = vmul.f32 0.03125, %v3472_v31  ;;  %v3477_v33 = vmul.f32 %v3475_v30, %v3475_v30 }
 0x7ed   :  { %v3476_v34 = vsub.f32 %v3466_v26, %v3474_v32  ;;  %v3479_v35 = vsel %vm501_vm1, %v3477_v33, 0.0 }
 0x7ee   :  { %3480 = vadd.xlane.f32.xlu0 %v3479_v35 }
 0x7ef   :  { %v3478_v36 = vmul.f32 %v3476_v34, %v3476_v34 }
 0x7f1   :  { %v3482_v37 = vsel %vm501_vm1, %v3478_v36, 0.0 }
 0x7f2   :  { %3483 = vadd.xlane.f32.xlu1 %v3482_v37 }
 0x877   :  { %v3481_v42 = vpop.xlane.xlu0 %3480 }
 0x878   :  { %v3485_v43 = vmul.f32 0.03125, %v3481_v42 }
 0x87a   :  { %v3487_v44 = vadd.f32 1e-05, %v3485_v43  ;;  %v12853_v43 = vld [vmem:[%s15949_s20] ss:$0 sm:$0xff] }
 0x87b   :  { %v3484_v45 = vpop.xlane.xlu1 %3483 }
 0x87c   :  { %15113 = vrsqrt.f32 %v3487_v44  ;;  %v3486_v46 = vmul.f32 0.03125, %v3484_v45 }
 0x87e   :  { %v3488_v47 = vadd.f32 1e-05, %v3486_v46  ;;  %v12833_v46 = vld [vmem:[%s15958_s2] ss:$0 sm:$0xff] }
 0x880   :  { %15115 = vrsqrt.f32 %v3488_v47 }
 0x889   :  { %v15114_v48 = vpop.eup %15113 }
 0x88a   :  { %v3491_v52 = vmul.f32 %v15114_v48, %v3475_v30 }
 0x88c   :  { %v3499_v54 = vmul.f32 %v12829_v51, %v3491_v52 }
 0x88d   :  { %v15116_v49 = vpop.eup %15115 }
 0x88e   :  { %v15774_v55 = vadd.f32 %v12830_v53, %v3499_v54  ;;  %v3492_v50 = vmul.f32 %v15116_v49, %v3476_v34 }
 0x890   :  { %v15779_v57 = vpack.c.bf16 %v15774_v55, %v15774_v55  ;;  %v3500_v59 = vmul.f32 %v12829_v51, %v3492_v50 }
 0x892   :  { %13953 = vmatmul.mubr.msk.bf16.vlgmr.msra.gmra.mxu0 %vm501_vm1, %v15779_v57  ;;  %13969 = vmatmul.mubr.msk.bf16.vlgmr.msra.gmra.mxu1 %vm501_vm1, %v15779_v57  ;;  %v15786_v61 = vadd.f32 %v12830_v53, %v3500_v59 }
 0x893   :  { %13957 = vmatpush3.bf16.msra.mxu0 %v14999_v56  ;;  %13981 = vmatpush3.bf16.msra.mxu1 %v14995_v38 }
 0x894   :  { %13958 = vmatprep.subr.bf16.mxu0 %v15243_v0  ;;  %13982 = vmatprep.subr.bf16.mxu1 %v15243_v0  ;;  %v15797_v58 = vpack.c.bf16 %v15786_v61, %v15786_v61 }
 0x895   :  { %13960 = vmatprep.mubr.msk.bf16.mxu0 %vm15245_vm0, %v15243_v0  ;;  %13984 = vmatprep.mubr.msk.bf16.mxu1 %vm15245_vm0, %v15243_v0 }
 0x897   :  { %13959 = vmatpush3.bf16.msra.mxu0 %v15000_v60  ;;  %13983 = vmatpush3.bf16.msra.mxu1 %v14997_v40 }
 0x898   :  { %13972 = vmatprep.subr.bf16.mxu0 %v15243_v0  ;;  %13996 = vmatprep.subr.bf16.mxu1 %v15243_v0 }
 0x89a   :  { %13961 = vmatmul.mubr.msk.bf16.vlgmr.msra.gmra.mxu0 %vm501_vm1, %v15779_v57  ;;  %13985 = vmatmul.mubr.msk.bf16.vlgmr.msra.gmra.mxu1 %vm501_vm1, %v15797_v58 }
 0x89b   :  { %13973 = vmatpush3.bf16.msra.mxu0 %v15001_v62  ;;  %13997 = vmatpush3.bf16.msra.mxu1 %v14996_v39 }
 0x89c   :  { %13974 = vmatprep.subr.bf16.mxu0 %v15243_v0  ;;  %13998 = vmatprep.subr.bf16.mxu1 %v15243_v0 }
 0x89d   :  { %13976 = vmatprep.mubr.msk.bf16.mxu0 %vm15245_vm0, %v15243_v0  ;;  %14000 = vmatprep.mubr.msk.bf16.mxu1 %vm15245_vm0, %v15243_v0 }
 0x89f   :  { %13975 = vmatpush3.bf16.msra.mxu0 %v15002_v63  ;;  %13999 = vmatpush3.bf16.msra.mxu1 %v14998_v41 }
 0x8a0   :  { %13988 = vmatprep.subr.bf16.mxu0 %v15243_v0  ;;  %14012 = vmatprep.subr.bf16.mxu1 %v15243_v0 }
 0x8a2   :  { %13977 = vmatmul.mubr.msk.bf16.vlgmr.msra.gmra.mxu0 %vm501_vm1, %v15779_v57  ;;  %14001 = vmatmul.mubr.msk.bf16.vlgmr.msra.gmra.mxu1 %vm501_vm1, %v15797_v58 }
 0x8a3   :  { %13989 = vmatpush3.bf16.msra.mxu0 %v14999_v56  ;;  %14013 = vmatpush3.bf16.msra.mxu1 %v15003_v1  ;;  %v12855_v56 = vld [vmem:[%s15949_s20 + $0x2] ss:$0 sm:$0xff] }
 0x8a4   :  { %13990 = vmatprep.subr.bf16.mxu0 %v15243_v0  ;;  %14014 = vmatprep.subr.bf16.mxu1 %v15243_v0 }
 0x8a5   :  { %13992 = vmatprep.mubr.msk.bf16.mxu0 %vm15245_vm0, %v15243_v0  ;;  %14016 = vmatprep.mubr.msk.bf16.mxu1 %vm15245_vm0, %v15243_v0 }
 0x8a7   :  { %13991 = vmatpush3.bf16.msra.mxu0 %v15000_v60  ;;  %14015 = vmatpush3.bf16.msra.mxu1 %v15004_v2  ;;  %v12835_v60 = vld [vmem:[%s15958_s2 + $0x2] ss:$0 sm:$0xff] }
 0x8a8   :  { %14004 = vmatprep.subr.bf16.mxu0 %v15243_v0  ;;  %14028 = vmatprep.subr.bf16.mxu1 %v15243_v0 }
 0x8aa   :  { %13993 = vmatmul.mubr.msk.bf16.vlgmr.msra.gmra.mxu0 %vm501_vm1, %v15797_v58  ;;  %14017 = vmatmul.mubr.msk.bf16.vlgmr.msra.gmra.mxu1 %vm501_vm1, %v15779_v57 }
 0x8ab   :  { %14005 = vmatpush3.bf16.msra.mxu0 %v15001_v62  ;;  %14029 = vmatpush3.bf16.msra.mxu1 %v15005_v3 }
 0x8ac   :  { %14006 = vmatprep.subr.bf16.mxu0 %v15243_v0  ;;  %14030 = vmatprep.subr.bf16.mxu1 %v15243_v0 }
 0x8ad   :  { %14008 = vmatprep.mubr.msk.bf16.mxu0 %vm15245_vm0, %v15243_v0  ;;  %14032 = vmatprep.mubr.msk.bf16.mxu1 %vm15245_vm0, %v15243_v0 }
 0x8af   :  { %14007 = vmatpush3.bf16.msra.mxu0 %v15002_v63  ;;  %14031 = vmatpush3.bf16.msra.mxu1 %v15006_v8 }
 0x8b0   :  { %14020 = vmatprep.subr.bf16.mxu0 %v15243_v0  ;;  %14044 = vmatprep.subr.bf16.mxu1 %v15243_v0 }
 0x8b2   :  { %14009 = vmatmul.mubr.msk.bf16.vlgmr.msra.gmra.mxu0 %vm501_vm1, %v15797_v58  ;;  %14033 = vmatmul.mubr.msk.bf16.vlgmr.msra.gmra.mxu1 %vm501_vm1, %v15779_v57 }
 0x8b3   :  { %14021 = vmatpush3.bf16.msra.mxu0 %v15007_v4  ;;  %14045 = vmatpush3.bf16.msra.mxu1 %v15003_v1 }
 0x8b4   :  { %14022 = vmatprep.subr.bf16.mxu0 %v15243_v0  ;;  %14046 = vmatprep.subr.bf16.mxu1 %v15243_v0 }
 0x8b5   :  { %14024 = vmatprep.mubr.msk.bf16.mxu0 %vm15245_vm0, %v15243_v0  ;;  %14048 = vmatprep.mubr.msk.bf16.mxu1 %vm15245_vm0, %v15243_v0 }
 0x8b7   :  { %14023 = vmatpush3.bf16.msra.mxu0 %v15008_v6  ;;  %14047 = vmatpush3.bf16.msra.mxu1 %v15004_v2 }
 0x8b8   :  { %14036 = vmatprep.subr.bf16.mxu0 %v15243_v0  ;;  %14060 = vmatprep.subr.bf16.mxu1 %v15243_v0 }
 0x8ba   :  { %14025 = vmatmul.mubr.msk.bf16.vlgmr.msra.gmra.mxu0 %vm501_vm1, %v15779_v57  ;;  %14049 = vmatmul.mubr.msk.bf16.vlgmr.msra.gmra.mxu1 %vm501_vm1, %v15797_v58 }
 0x8bb   :  { %14037 = vmatpush3.bf16.msra.mxu0 %v15009_v7  ;;  %14061 = vmatpush3.bf16.msra.mxu1 %v15005_v3 }
 0x8bc   :  { %14038 = vmatprep.subr.bf16.mxu0 %v15243_v0  ;;  %14062 = vmatprep.subr.bf16.mxu1 %v15243_v0 }
 0x8bd   :  { %14040 = vmatprep.mubr.msk.bf16.mxu0 %vm15245_vm0, %v15243_v0  ;;  %14064 = vmatprep.mubr.msk.bf16.mxu1 %vm15245_vm0, %v15243_v0 }
 0x8bf   :  { %14039 = vmatpush3.bf16.msra.mxu0 %v15010_v5  ;;  %14063 = vmatpush3.bf16.msra.mxu1 %v15006_v8 }
 0x8c0   :  { %14052 = vmatprep.subr.bf16.mxu0 %v15243_v0  ;;  %14076 = vmatprep.subr.bf16.mxu1 %v15243_v0 }
 0x8c2   :  { %14041 = vmatmul.mubr.msk.bf16.vlgmr.msra.gmra.mxu0 %vm501_vm1, %v15779_v57  ;;  %14065 = vmatmul.mubr.msk.bf16.vlgmr.msra.gmra.mxu1 %vm501_vm1, %v15797_v58 }
 0x8c3   :  { %14053 = vmatpush3.bf16.msra.mxu0 %v15007_v4  ;;  %14077 = vmatpush3.bf16.msra.mxu1 %v15011_v9 }
 0x8c4   :  { %14054 = vmatprep.subr.bf16.mxu0 %v15243_v0  ;;  %14078 = vmatprep.subr.bf16.mxu1 %v15243_v0 }
 0x8c5   :  { %14056 = vmatprep.mubr.msk.bf16.mxu0 %vm15245_vm0, %v15243_v0  ;;  %14080 = vmatprep.mubr.msk.bf16.mxu1 %vm15245_vm0, %v15243_v0 }
 0x8c7   :  { %14055 = vmatpush3.bf16.msra.mxu0 %v15008_v6  ;;  %14079 = vmatpush3.bf16.msra.mxu1 %v15012_v10  ;;  %v12854_v6 = vld [vmem:[%s15949_s20 + $0x1] ss:$0 sm:$0xff] }
 0x8c8   :  { %14068 = vmatprep.subr.bf16.mxu0 %v15243_v0  ;;  %14092 = vmatprep.subr.bf16.mxu1 %v15243_v0 }
 0x8ca   :  { %14057 = vmatmul.mubr.msk.bf16.vlgmr.msra.gmra.mxu0 %vm501_vm1, %v15797_v58  ;;  %14081 = vmatmul.mubr.msk.bf16.vlgmr.msra.gmra.mxu1 %vm501_vm1, %v15779_v57 }
 0x8cb   :  { %14069 = vmatpush3.bf16.msra.mxu0 %v15009_v7  ;;  %14093 = vmatpush3.bf16.msra.mxu1 %v15013_v13 }
 0x8cc   :  { %14070 = vmatprep.subr.bf16.mxu0 %v15243_v0  ;;  %14094 = vmatprep.subr.bf16.mxu1 %v15243_v0 }
 0x8cd   :  { %14072 = vmatprep.mubr.msk.bf16.mxu0 %vm15245_vm0, %v15243_v0  ;;  %14096 = vmatprep.mubr.msk.bf16.mxu1 %vm15245_vm0, %v15243_v0 }
 0x8cf   :  { %14071 = vmatpush3.bf16.msra.mxu0 %v15010_v5  ;;  %14095 = vmatpush3.bf16.msra.mxu1 %v15014_v19 }
 0x8d0   :  { %14084 = vmatprep.subr.bf16.mxu0 %v15243_v0  ;;  %14108 = vmatprep.subr.bf16.mxu1 %v15243_v0 }
 0x8d2   :  { %14073 = vmatmul.mubr.msk.bf16.vlgmr.msra.gmra.mxu0 %vm501_vm1, %v15797_v58  ;;  %14097 = vmatmul.mubr.msk.bf16.vlgmr.msra.gmra.mxu1 %vm501_vm1, %v15779_v57 }
 0x8d3   :  { %14085 = vmatpush3.bf16.msra.mxu0 %v15015_v25  ;;  %14109 = vmatpush3.bf16.msra.mxu1 %v15011_v9  ;;  %v12834_v9 = vld [vmem:[%s15958_s2 + $0x1] ss:$0 sm:$0xff] }
 0x8d4   :  { %14086 = vmatprep.subr.bf16.mxu0 %v15243_v0  ;;  %14110 = vmatprep.subr.bf16.mxu1 %v15243_v0 }
 0x8d5   :  { %14088 = vmatprep.mubr.msk.bf16.mxu0 %vm15245_vm0, %v15243_v0  ;;  %14112 = vmatprep.mubr.msk.bf16.mxu1 %vm15245_vm0, %v15243_v0 }
 0x8d7   :  { %14087 = vmatpush3.bf16.msra.mxu0 %v15016_v11  ;;  %14111 = vmatpush3.bf16.msra.mxu1 %v15012_v10 }
 0x8d8   :  { %14100 = vmatprep.subr.bf16.mxu0 %v15243_v0  ;;  %14124 = vmatprep.subr.bf16.mxu1 %v15243_v0 }
 0x8da   :  { %14089 = vmatmul.mubr.msk.bf16.vlgmr.msra.gmra.mxu0 %vm501_vm1, %v15779_v57  ;;  %14113 = vmatmul.mubr.msk.bf16.vlgmr.msra.gmra.mxu1 %vm501_vm1, %v15797_v58 }
 0x8db   :  { %14101 = vmatpush3.bf16.msra.mxu0 %v15017_v12  ;;  %14125 = vmatpush3.bf16.msra.mxu1 %v15013_v13 }
 0x8dc   :  { %14102 = vmatprep.subr.bf16.mxu0 %v15243_v0  ;;  %14126 = vmatprep.subr.bf16.mxu1 %v15243_v0 }
 0x8dd   :  { %14104 = vmatprep.mubr.msk.bf16.mxu0 %vm15245_vm0, %v15243_v0  ;;  %14128 = vmatprep.mubr.msk.bf16.mxu1 %vm15245_vm0, %v15243_v0 }
 0x8df   :  { %14103 = vmatpush3.bf16.msra.mxu0 %v15018_v14  ;;  %14127 = vmatpush3.bf16.msra.mxu1 %v15014_v19 }
 0x8e0   :  { %14116 = vmatprep.subr.bf16.mxu0 %v15243_v0  ;;  %14140 = vmatprep.subr.mxu1 %v15243_v0 }
 0x8e2   :  { %14105 = vmatmul.mubr.msk.bf16.vlgmr.msra.gmra.mxu0 %vm501_vm1, %v15779_v57  ;;  %14129 = vmatmul.mubr.msk.bf16.vlgmr.msra.gmra.mxu1 %vm501_vm1, %v15797_v58 }
 0x8e3   :  { %14117 = vmatpush3.bf16.msra.mxu0 %v15015_v25  ;;  %14120 = vmatprep.mubr.msk.bf16.mxu0 %vm15245_vm0, %v15243_v0 }
 0x8e4   :  { %14118 = vmatprep.subr.bf16.mxu0 %v15243_v0  ;;  %14142 = vmatprep.mubr.msk.f32.mxu1 %vm15245_vm0, %v15243_v0 }
 0x8e7   :  { %14119 = vmatpush3.bf16.msra.mxu0 %v15016_v11 }
 0x8e8   :  { %14132 = vmatprep.subr.bf16.mxu0 %v15243_v0 }
 0x8ea   :  { %14121 = vmatmul.mubr.msk.bf16.vlgmr.msra.gmra.mxu0 %vm501_vm1, %v15797_v58 }
 0x8eb   :  { %14133 = vmatpush3.bf16.msra.mxu0 %v15017_v12  ;;  %14136 = vmatprep.mubr.msk.bf16.mxu0 %vm15245_vm0, %v15243_v0 }
 0x8ec   :  { %14134 = vmatprep.subr.bf16.mxu0 %v15243_v0 }
 0x8ef   :  { %14135 = vmatpush3.bf16.msra.mxu0 %v15018_v14 }
 0x8f0   :  { %14150 = vmatprep.subr.mxu0 %v15243_v0 }
 0x8f2   :  { %14137 = vmatmul.mubr.msk.bf16.vlgmr.msra.gmra.mxu0 %vm501_vm1, %v15797_v58 }
 0x8f3   :  { %14152 = vmatprep.mubr.msk.f32.mxu0 %vm15245_vm0, %v15243_v0 }
 0x952   :  { %v3588_v15 = vpop.f32.mrf.mxu0  ;;  %v3692_v17 = vpop.f32.mrf.mxu1 }
 0x953   :  { %v3589_v52 = vadd.f32 %v12833_v46, %v3588_v15  ;;  %v3693_v1 = vadd.f32 %v12835_v60, %v3692_v17 }
 0x954   :  { %v13954_v18 = vpop.f32.mrf.mxu0  ;;  %v13970_v21 = vpop.f32.mrf.mxu1 }
 0x955   :  { %v12856_v21 = vld [vmem:[%s15949_s20 + $0x3] ss:$0 sm:$0xff] }
 0x956   :  { %v3591_v22 = vpop.f32.mrf.mxu0  ;;  %v3695_v23 = vpop.f32.mrf.mxu1 }
 0x958   :  { %v13955_v24 = vpop.f32.mrf.mxu0  ;;  %v13971_v26 = vpop.f32.mrf.mxu1 }
 0x959   :  { %v12836_v24 = vld [vmem:[%s15958_s2 + $0x3] ss:$0 sm:$0xff] }
 0x95a   :  { %v3640_v27 = vpop.f32.mrf.mxu0  ;;  %v3787_v28 = vpop.f32.mrf.mxu1 }
 0x95b   :  { %v3641_v11 = vadd.f32 %v12834_v9, %v3640_v27  ;;  %v3788_v12 = vadd.f32 %v12833_v46, %v3787_v28 }
 0x95c   :  { %v13962_v29 = vpop.f32.mrf.mxu0  ;;  %v13986_v30 = vpop.f32.mrf.mxu1 }
 0x95e   :  { %v3643_v31 = vpop.f32.mrf.mxu0  ;;  %v3790_v32 = vpop.f32.mrf.mxu1 }
 0x960   :  { %v13963_v33 = vpop.f32.mrf.mxu0  ;;  %v13987_v34 = vpop.f32.mrf.mxu1 }
 0x962   :  { %v15951_v35 = vpop.f32.mrf.mxu0  ;;  %v15953_v36 = vpop.f32.mrf.mxu1 }
 0x963   :  { %v3745_v30 = vadd.f32 %v12836_v24, %v15951_v35  ;;  %v3868_v31 = vadd.f32 %v12835_v60, %v15953_v36 }
 0x964   :  { %v13978_v37 = vpop.f32.mrf.mxu0  ;;  %v14002_v38 = vpop.f32.mrf.mxu1 }
 0x965   :  { %v12873_v38 = vld [vmem:[%s15990_s16] ss:$0 sm:$0xff] }
 0x966   :  { %v3747_v39 = vpop.f32.mrf.mxu0  ;;  %v3870_v40 = vpop.f32.mrf.mxu1 }
 0x968   :  { %v13979_v41 = vpop.f32.mrf.mxu0  ;;  %v14003_v42 = vpop.f32.mrf.mxu1 }
 0x96a   :  { %v15961_v44 = vpop.f32.mrf.mxu0  ;;  %v3983_v45 = vpop.f32.mrf.mxu1 }
 0x96b   :  { %v3984_v47 = vadd.f32 %v12853_v43, %v3983_v45 }
 0x96c   :  { %v13994_v48 = vpop.f32.mrf.mxu0  ;;  %v14018_v51 = vpop.f32.mrf.mxu1 }
 0x96d   :  { %14141 = vmatpush3.xpose.msk.msra.mxu1 %vm1619_vm3, %v3984_v47 }
 0x96e   :  { %v3830_v53 = vpop.f32.mrf.mxu0  ;;  %v3986_v54 = vpop.f32.mrf.mxu1  ;;  %14145 = vmatprep.subr.mxu1 %v15243_v0 }
 0x970   :  { %v13995_v49 = vpop.f32.mrf.mxu0  ;;  %v14019_v50 = vpop.f32.mrf.mxu1  ;;  %14143 = vmatmul.mubr.msk.f32.vlgmr.msra.gmra.mxu1 %vm1619_vm3, %v3589_v52 }
 0x971   :  { %14147 = vmatprep.mubr.msk.f32.mxu1 %vm15245_vm0, %v15243_v0 }
 0x972   :  { %v15970_v57 = vpop.f32.mrf.mxu0  ;;  %v4087_v59 = vpop.f32.mrf.mxu1 }
 0x973   :  { %v4088_v62 = vadd.f32 %v12855_v56, %v4087_v59  ;;  %v3908_v49 = vadd.f32 %v12836_v24, %v15970_v57 }
 0x974   :  { %v14010_v58 = vpop.f32.mrf.mxu0  ;;  %v14034_v63 = vpop.f32.mrf.mxu1 }
 0x975   :  { %14151 = vmatpush3.xpose.msk.msra.mxu0 %vm1619_vm3, %v4088_v62  ;;  %v12874_v62 = vld [vmem:[%s15990_s16 + $0x1] ss:$0 sm:$0xff] }
 0x976   :  { %v3910_v2 = vpop.f32.mrf.mxu0  ;;  %v4090_v3 = vpop.f32.mrf.mxu1  ;;  %14160 = vmatprep.subr.mxu0 %v15243_v0 }
 0x978   :  { %v14011_v8 = vpop.f32.mrf.mxu0  ;;  %v14035_v4 = vpop.f32.mrf.mxu1  ;;  %14153 = vmatmul.mubr.msk.f32.vlgmr.msra.gmra.mxu0 %vm1619_vm3, %v3693_v1 }
 0x979   :  { %14162 = vmatprep.mubr.msk.f32.mxu0 %vm15245_vm0, %v15243_v0 }
 0x97a   :  { %v4035_v7 = vpop.f32.mrf.mxu0  ;;  %v4179_v5 = vpop.f32.mrf.mxu1 }
 0x97b   :  { %v4036_v10 = vadd.f32 %v12854_v6, %v4035_v7  ;;  %v4180_v13 = vadd.f32 %v12853_v43, %v4179_v5  ;;  %v3828_v43 = vadd.f32 %v12834_v9, %v15961_v44 }
 0x97c   :  { %v14026_v19 = vpop.f32.mrf.mxu0  ;;  %v14050_v25 = vpop.f32.mrf.mxu1 }
 0x97d   :  { %14146 = vmatpush3.xpose.msk.msra.mxu1 %vm1619_vm3, %v4036_v10  ;;  %14161 = vmatpush3.xpose.msk.msra.mxu0 %vm1619_vm3, %v4180_v13 }
 0x97e   :  { %v4038_v14 = vpop.f32.mrf.mxu0  ;;  %v4182_v15 = vpop.f32.mrf.mxu1  ;;  %14155 = vmatprep.subr.mxu1 %v15243_v0  ;;  %14170 = vmatprep.subr.mxu0 %v15243_v0 }
 0x980   :  { %v14027_v17 = vpop.f32.mrf.mxu0  ;;  %v14051_v18 = vpop.f32.mrf.mxu1  ;;  %14148 = vmatmul.mubr.msk.f32.vlgmr.msra.gmra.mxu1 %vm1619_vm3, %v3641_v11  ;;  %14163 = vmatmul.mubr.msk.f32.vlgmr.msra.gmra.mxu0 %vm1619_vm3, %v3788_v12 }
 0x981   :  { %14157 = vmatprep.mubr.msk.f32.mxu1 %vm15245_vm0, %v15243_v0  ;;  %14172 = vmatprep.mubr.msk.f32.mxu0 %vm15245_vm0, %v15243_v0 }
 0x982   :  { %v4139_v22 = vpop.f32.mrf.mxu0  ;;  %v4259_v23 = vpop.f32.mrf.mxu1 }
 0x983   :  { %v4140_v26 = vadd.f32 %v12856_v21, %v4139_v22  ;;  %v4260_v27 = vadd.f32 %v12855_v56, %v4259_v23 }
 0x984   :  { %v14042_v28 = vpop.f32.mrf.mxu0  ;;  %v14066_v29 = vpop.f32.mrf.mxu1 }
 0x985   :  { %14156 = vmatpush3.xpose.msk.msra.mxu1 %vm1619_vm3, %v4140_v26  ;;  %14171 = vmatpush3.xpose.msk.msra.mxu0 %vm1619_vm3, %v4260_v27 }
 0x986   :  { %v4142_v32 = vpop.f32.mrf.mxu0  ;;  %v4262_v33 = vpop.f32.mrf.mxu1  ;;  %14165 = vmatprep.subr.mxu1 %v15243_v0  ;;  %14180 = vmatprep.subr.mxu0 %v15243_v0 }
 0x988   :  { %v14043_v34 = vpop.f32.mrf.mxu0  ;;  %v14067_v37 = vpop.f32.mrf.mxu1  ;;  %14158 = vmatmul.mubr.msk.f32.vlgmr.msra.gmra.mxu1 %vm1619_vm3, %v3745_v30  ;;  %14173 = vmatmul.mubr.msk.f32.vlgmr.msra.gmra.mxu0 %vm1619_vm3, %v3868_v31 }
 0x989   :  { %14167 = vmatprep.mubr.msk.f32.mxu1 %vm15245_vm0, %v15243_v0  ;;  %14182 = vmatprep.mubr.msk.f32.mxu0 %vm15245_vm0, %v15243_v0 }
 0x98a   :  { %v4219_v35 = vpop.f32.mrf.mxu0  ;;  %v4375_v36 = vpop.f32.mrf.mxu1 }
 0x98b   :  { %v4220_v39 = vadd.f32 %v12854_v6, %v4219_v35  ;;  %v4376_v40 = vadd.f32 %v12873_v38, %v4375_v36 }
 0x98c   :  { %v14058_v41 = vpop.f32.mrf.mxu0  ;;  %v14082_v42 = vpop.f32.mrf.mxu1 }
 0x98d   :  { %14166 = vmatpush3.xpose.msk.msra.mxu1 %vm1619_vm3, %v4220_v39  ;;  %14181 = vmatpush3.msra.mxu0 %v4376_v40 }
 0x98e   :  { %v4222_v45 = vpop.f32.mrf.mxu0  ;;  %v4378_v46 = vpop.f32.mrf.mxu1  ;;  %14175 = vmatprep.subr.mxu1 %v15243_v0  ;;  %14190 = vmatprep.subr.mxu0 %v15243_v0 }
 0x990   :  { %v14059_v47 = vpop.f32.mrf.mxu0  ;;  %v14083_v48 = vpop.f32.mrf.mxu1  ;;  %14168 = vmatmul.mubr.msk.f32.vlgmr.msra.gmra.mxu1 %vm1619_vm3, %v3828_v43 }
 0x991   :  { %14177 = vmatprep.mubr.msk.f32.mxu1 %vm15245_vm0, %v15243_v0 }
 0x992   :  { %v4299_v51 = vpop.f32.mrf.mxu0  ;;  %v16017_v52 = vpop.f32.mrf.mxu1 }
 0x993   :  { %v4300_v53 = vadd.f32 %v12856_v21, %v4299_v51 }
 0x994   :  { %v14074_v54 = vpop.f32.mrf.mxu0  ;;  %v14098_v44 = vpop.f32.mrf.mxu1 }
 0x995   :  { %14176 = vmatpush3.xpose.msk.msra.mxu1 %vm1619_vm3, %v4300_v53 }
 0x996   :  { %v4302_v50 = vpop.f32.mrf.mxu0  ;;  %v4482_v56 = vpop.f32.mrf.mxu1  ;;  %14185 = vmatprep.subr.mxu1 %v15243_v0 }
 0x998   :  { %v14075_v59 = vpop.f32.mrf.mxu0  ;;  %v14099_v60 = vpop.f32.mrf.mxu1  ;;  %14178 = vmatmul.mubr.msk.f32.vlgmr.msra.gmra.mxu1 %vm1619_vm3, %v3908_v49 }
 0x999   :  { %14187 = vmatprep.mubr.msk.f32.mxu1 %vm15245_vm0, %v15243_v0 }
 0x99a   :  { %v4427_v58 = vpop.f32.mrf.mxu0  ;;  %v4571_v63 = vpop.f32.mrf.mxu1 }
 0x99b   :  { %v4428_v1 = vadd.f32 %v12874_v62, %v4427_v58  ;;  %v16026_v2 = vadd.f32 %v12873_v38, %v4571_v63 }
 0x99c   :  { %v14090_v3 = vpop.f32.mrf.mxu0  ;;  %v14114_v8 = vpop.f32.mrf.mxu1 }
 0x99d   :  { %14186 = vmatpush3.msra.mxu1 %v4428_v1 }
 0x99e   :  { %v4430_v57 = vpop.f32.mrf.mxu0  ;;  %v4574_v4 = vpop.f32.mrf.mxu1  ;;  %14195 = vmatprep.subr.mxu1 %v15243_v0 }
 0x9a0   :  { %v14091_v6 = vpop.f32.mrf.mxu0  ;;  %v14115_v7 = vpop.f32.mrf.mxu1 }
 0x9a2   :  { %v16029_v5 = vpop.f32.mrf.mxu0  ;;  %v16031_v9 = vpop.f32.mrf.mxu1 }
 0x9a4   :  { %v14106_v10 = vpop.f32.mrf.mxu0  ;;  %v14130_v13 = vpop.f32.mrf.mxu1 }
 0x9a6   :  { %v4534_v19 = vpop.f32.mrf.mxu0  ;;  %v4654_v25 = vpop.f32.mrf.mxu1 }
 0x9a8   :  { %v14107_v11 = vpop.f32.mrf.mxu0  ;;  %v14131_v12 = vpop.f32.mrf.mxu1 }
 0x9aa   :  { %v4611_v14 = vpop.f32.mrf.mxu0 }
 0x9ab   :  { %v16033_v15 = vadd.f32 %v12874_v62, %v4611_v14 }
 0x9ac   :  { %v14122_v17 = vpop.f32.mrf.mxu0 }
 0x9ae   :  { %v4614_v18 = vpop.f32.mrf.mxu0 }
 0x9b0   :  { %v14123_v21 = vpop.f32.mrf.mxu0 }
 0x9b2   :  { %v16035_v22 = vpop.f32.mrf.mxu0 }
 0x9b4   :  { %v14138_v23 = vpop.f32.mrf.mxu0 }
 0x9b6   :  { %v4694_v24 = vpop.f32.mrf.mxu0 }
 0x9b8   :  { %v14139_v26 = vpop.f32.mrf.mxu0 }
 0xa30   :  { %v4769_v27 = vpop.f32.mrf.mxu1 }
 0xa31   :  { %v5305_v28 = vsel %vm1619_vm3, %v4769_v27, -inf }
 0xa32   :  { %5306 = vmax.xlane.f32.xlu0 %v5305_v28  ;;  %v14144_v29 = vpop.f32.mrf.mxu1 }
 0xa38   :  { %v4921_v30 = vpop.f32.mrf.mxu0 }
 0xa39   :  { %v5311_v31 = vsel %vm1619_vm3, %v4921_v30, -inf }
 0xa3a   :  { %5312 = vmax.xlane.f32.xlu0 %v5311_v31  ;;  %v14154_v32 = vpop.f32.mrf.mxu0 }
 0xa40   :  { %v4845_v33 = vpop.f32.mrf.mxu1  ;;  %v5073_v34 = vpop.f32.mrf.mxu0 }
 0xa41   :  { %v5308_v37 = vsel %vm1619_vm3, %v4845_v33, -inf  ;;  %v5317_v38 = vsel %vm1619_vm3, %v5073_v34, -inf }
 0xa42   :  { %5309 = vmax.xlane.f32.xlu1 %v5308_v37  ;;  %v14149_v35 = vpop.f32.mrf.mxu1  ;;  %5318 = vmax.xlane.f32.xlu0 %v5317_v38  ;;  %v14164_v36 = vpop.f32.mrf.mxu0 }
 0xa48   :  { %v4997_v39 = vpop.f32.mrf.mxu1  ;;  %v5225_v40 = vpop.f32.mrf.mxu0 }
 0xa49   :  { %v5314_v41 = vsel %vm1619_vm3, %v4997_v39, -inf  ;;  %v5323_v42 = vsel %vm1619_vm3, %v5225_v40, -inf }
 0xa4a   :  { %5315 = vmax.xlane.f32.xlu1 %v5314_v41  ;;  %v14159_v43 = vpop.f32.mrf.mxu1  ;;  %5324 = vmax.xlane.f32.xlu0 %v5323_v42  ;;  %v14174_v45 = vpop.f32.mrf.mxu0 }
 0xa50   :  { %v5149_v46 = vpop.f32.mrf.mxu1 }
 0xa51   :  { %v5320_v47 = vsel %vm1619_vm3, %v5149_v46, -inf }
 0xa52   :  { %5321 = vmax.xlane.f32.xlu1 %v5320_v47  ;;  %v14169_v48 = vpop.f32.mrf.mxu1 }
 0xa58   :  { %v5301_v51 = vpop.f32.mrf.mxu1 }
 0xa59   :  { %v5326_v53 = vsel %vm1619_vm3, %v5301_v51, -inf }
 0xa5a   :  { %5327 = vmax.xlane.f32.xlu1 %v5326_v53  ;;  %v14179_v54 = vpop.f32.mrf.mxu1 }
 0xabb   :  { %v5307_v44 = vpop.xlane.xlu0 %5306 }
 0xabc   :  { %v5329_v49 = vsub.f32 %v4769_v27, %v5307_v44 }
 0xabe   :  { %v5337_v50 = vmul.f32 1.442695, %v5329_v49 }
 0xac0   :  { %15117 = vpow2.f32 %v5337_v50 }
 0xac3   :  { %v5313_v56 = vpop.xlane.xlu0 %5312 }
 0xac4   :  { %v5331_v59 = vsub.f32 %v4921_v30, %v5313_v56 }
 0xac6   :  { %v5341_v60 = vmul.f32 1.442695, %v5331_v59 }
 0xac8   :  { %15119 = vpow2.f32 %v5341_v60 }
 0xacb   :  { %v5310_v62 = vpop.xlane.xlu1 %5309  ;;  %v5319_v58 = vpop.xlane.xlu0 %5318 }
 0xacc   :  { %v5330_v63 = vsub.f32 %v4845_v33, %v5310_v62  ;;  %v5333_v1 = vsub.f32 %v5073_v34, %v5319_v58 }
 0xacd   :  { %v15118_v3 = vpop.eup %15117 }
 0xace   :  { %v5339_v8 = vmul.f32 1.442695, %v5330_v63  ;;  %v5345_v57 = vmul.f32 1.442695, %v5333_v1  ;;  %v5353_v4 = vsel %vm1619_vm3, %v15118_v3, 0.0 }
 0xacf   :  { %5354 = vadd.xlane.f32.xlu0 %v5353_v4  ;;  %v376_v4 = vld [vmem:[%s16098_s5 + $0x4] sm:$0xf] }
 0xad0   :  { %15121 = vpow2.f32 %v5339_v8 }
 0xad1   :  { %15123 = vpow2.f32 %v5345_v57 }
 0xad3   :  { %v5316_v6 = vpop.xlane.xlu1 %5315  ;;  %v5325_v7 = vpop.xlane.xlu0 %5324 }
 0xad4   :  { %v5332_v10 = vsub.f32 %v4997_v39, %v5316_v6  ;;  %v5335_v13 = vsub.f32 %v5225_v40, %v5325_v7  ;;  %v12875_v40 = vld [vmem:[%s15990_s16 + $0x2] ss:$0 sm:$0xff]  ;;  %v6035_v6 = vsel %vm2911_vm4, %v376_v4, 0  ;;  %v377_v7 = vld [vmem:[%s16098_s5 + $0x8] sm:$0xf] }
 0xad5   :  { %v15120_v19 = vpop.eup %15119  ;;  %v4480_v43 = vadd.f32 %v12875_v40, %v16017_v52  ;;  %v12876_v52 = vld [vmem:[%s15990_s16 + $0x3] ss:$0 sm:$0xff]  ;;  %v4652_v60 = vadd.f32 %v12875_v40, %v16031_v9  ;;  %s16164_s16 = sld [smem:[%s16965_s0 + %s15272_s9]]   ;;  %s15274_s9 = smov 27  }
 0xad6   :  { %v5343_v25 = vmul.f32 1.442695, %v5332_v10  ;;  %v5349_v11 = vmul.f32 1.442695, %v5335_v13  ;;  %v5359_v12 = vsel %vm1619_vm3, %v15120_v19, 0.0  ;;  %v4532_v50 = vadd.f32 %v12876_v52, %v16029_v5  ;;  %s16176_s2 = sld [smem:[%s16965_s0 + %s15274_s9]]   ;;  %s15276_s9 = smov 25  }
 0xad7   :  { %5360 = vadd.xlane.f32.xlu0 %v5359_v12 }
 0xad8   :  { %15125 = vpow2.f32 %v5343_v25 }
 0xad9   :  { %15127 = vpow2.f32 %v5349_v11 }
 0xadb   :  { %v5322_v14 = vpop.xlane.xlu1 %5321 }
 0xadc   :  { %v5334_v17 = vsub.f32 %v5149_v46, %v5322_v14  ;;  %16988 = sst [smem:[#allocation9_spill]] %s16176_s2 }
 0xadd   :  { %v15122_v18 = vpop.eup %15121 }
 0xade   :  { %v15124_v21 = vpop.eup %15123  ;;  %v5347_v23 = vmul.f32 1.442695, %v5334_v17  ;;  %v5356_v24 = vsel %vm1619_vm3, %v15122_v18, 0.0  ;;  %v378_v17 = vld [vmem:[%s16098_s5 + $0xc] sm:$0xf] }
 0xadf   :  { %5357 = vadd.xlane.f32.xlu1 %v5356_v24  ;;  %v5365_v26 = vsel %vm1619_vm3, %v15124_v21, 0.0  ;;  %v6127_v24 = vsel %vm2911_vm4, %v378_v17, 0 }
 0xae0   :  { %15129 = vpow2.f32 %v5347_v23  ;;  %5366 = vadd.xlane.f32.xlu0 %v5365_v26 }
 0xae3   :  { %v5328_v27 = vpop.xlane.xlu1 %5327 }
 0xae4   :  { %v5336_v28 = vsub.f32 %v5301_v51, %v5328_v27 }
 0xae5   :  { %v15126_v29 = vpop.eup %15125 }
 0xae6   :  { %v15128_v30 = vpop.eup %15127  ;;  %v5351_v31 = vmul.f32 1.442695, %v5336_v28  ;;  %v5362_v32 = vsel %vm1619_vm3, %v15126_v29, 0.0 }
 0xae7   :  { %5363 = vadd.xlane.f32.xlu1 %v5362_v32  ;;  %v5371_v33 = vsel %vm1619_vm3, %v15128_v30, 0.0 }
 0xae8   :  { %15131 = vpow2.f32 %v5351_v31  ;;  %5372 = vadd.xlane.f32.xlu0 %v5371_v33 }
 0xaed   :  { %v15130_v34 = vpop.eup %15129 }
 0xaee   :  { %v5368_v37 = vsel %vm1619_vm3, %v15130_v34, 0.0 }
 0xaef   :  { %5369 = vadd.xlane.f32.xlu1 %v5368_v37 }
 0xaf5   :  { %v16052_v38 = vpop.eup %15131 }
 0xaf6   :  { %v5374_v35 = vsel %vm1619_vm3, %v16052_v38, 0.0 }
 0xaf7   :  { %5375 = vadd.xlane.f32.xlu1 %v5374_v35 }
 0xb58   :  { %v5355_v36 = vpop.xlane.xlu0 %5354 }
 0xb59   :  { %15133 = vrcp.f32 %v5355_v36 }
 0xb60   :  { %v5361_v39 = vpop.xlane.xlu0 %5360 }
 0xb61   :  { %15135 = vrcp.f32 %v5361_v39 }
 0xb66   :  { %v15134_v41 = vpop.eup %15133 }
 0xb67   :  { %v5385_v42 = vmul.f32 %v15134_v41, %v15118_v3  ;;  %v4692_v3 = vadd.f32 %v12876_v52, %v16035_v22  ;;  %v375_v22 = vld [vmem:[%s16098_s5] sm:$0xf]  ;;  %s16171_s5 = sld [smem:[%s16965_s0 + %s15273_s30]]  }
 0xb68   :  { %v5358_v45 = vpop.xlane.xlu1 %5357  ;;  %v5989_v57 = vsel %vm2911_vm4, %v375_v22, 0  ;;  %s16201_s30 = sld [smem:[%s16965_s0 + %s15276_s9]]  }
 0xb69   :  { %15137 = vrcp.f32 %v5358_v45  ;;  %v5367_v46 = vpop.xlane.xlu0 %5366  ;;  %14183 = vmatmul.mubr.msk.f32.vlgmr.msra.gmra.mxu0 %vm1619_vm3, %v5385_v42 }
 0xb6a   :  { %15139 = vrcp.f32 %v5367_v46  ;;  %14191 = vmatpush3.msra.mxu0 %v4480_v43  ;;  %14192 = vmatprep.mubr.msk.f32.mxu0 %vm15245_vm0, %v15243_v0 }
 0xb6b   :  { %14200 = vmatprep.subr.mxu0 %v15243_v0 }
 0xb6d   :  { %16987 = sst [smem:[#allocation8_spill]] %s16171_s5 }
 0xb6e   :  { %v15136_v47 = vpop.eup %15135  ;;  %16990 = sst [smem:[#allocation11_spill]] %s16201_s30 }
 0xb6f   :  { %v5387_v48 = vmul.f32 %v15136_v47, %v15120_v19  ;;  %v6081_v19 = vsel %vm2911_vm4, %v377_v7, 0 }
 0xb70   :  { %v5364_v51 = vpop.xlane.xlu1 %5363 }
 0xb71   :  { %15141 = vrcp.f32 %v5364_v51  ;;  %v5373_v53 = vpop.xlane.xlu0 %5372  ;;  %14193 = vmatmul.mubr.msk.f32.vlgmr.msra.gmra.mxu0 %vm1619_vm3, %v5387_v48 }
 0xb72   :  { %15143 = vrcp.f32 %v5373_v53  ;;  %14201 = vmatpush3.msra.mxu0 %v16026_v2  ;;  %14202 = vmatprep.mubr.msk.f32.mxu0 %vm15245_vm0, %v15243_v0 }
 0xb73   :  { %14210 = vmatprep.subr.mxu0 %v15243_v0 }
 0xb76   :  { %v15138_v54 = vpop.eup %15137 }
 0xb77   :  { %v15140_v44 = vpop.eup %15139  ;;  %v5386_v49 = vmul.f32 %v15138_v54, %v15122_v18 }
 0xb78   :  { %v5389_v56 = vmul.f32 %v15140_v44, %v15124_v21  ;;  %v5370_v59 = vpop.xlane.xlu1 %5369 }
 0xb79   :  { %15145 = vrcp.f32 %v5370_v59  ;;  %14188 = vmatmul.mubr.msk.f32.vlgmr.msra.gmra.mxu1 %vm1619_vm3, %v5386_v49 }
 0xb7a   :  { %14196 = vmatpush3.msra.mxu1 %v4532_v50  ;;  %14203 = vmatmul.mubr.msk.f32.vlgmr.msra.gmra.mxu0 %vm1619_vm3, %v5389_v56 }
 0xb7b   :  { %14211 = vmatpush3.msra.mxu0 %v4652_v60  ;;  %14197 = vmatprep.mubr.msk.f32.mxu1 %vm15245_vm0, %v15243_v0 }
 0xb7c   :  { %14205 = vmatprep.subr.mxu1 %v15243_v0  ;;  %14212 = vmatprep.mubr.msk.f32.mxu0 %vm15245_vm0, %v15243_v0 }
 0xb7d   :  { %14220 = vmatprep.subr.bf16.mxu0 %v15243_v0 }
 0xb7e   :  { %v15142_v2 = vpop.eup %15141 }
 0xb7f   :  { %v15144_v5 = vpop.eup %15143  ;;  %v5388_v9 = vmul.f32 %v15142_v2, %v15126_v29 }
 0xb80   :  { %v5391_v62 = vmul.f32 %v15144_v5, %v15128_v30  ;;  %v5376_v58 = vpop.xlane.xlu1 %5375  ;;  %v12925_v5 = vld [vmem:[%s16143_s26] ss:$0 sm:$0xff] }
 0xb81   :  { %15147 = vrcp.f32 %v5376_v58  ;;  %14198 = vmatmul.mubr.msk.f32.vlgmr.msra.gmra.mxu1 %vm1619_vm3, %v5388_v9 }
 0xb82   :  { %14206 = vmatpush3.msra.mxu1 %v16033_v15  ;;  %14213 = vmatmul.mubr.msk.f32.vlgmr.msra.gmra.mxu0 %vm1619_vm3, %v5391_v62 }
 0xb83   :  { %14207 = vmatprep.mubr.msk.f32.mxu1 %vm15245_vm0, %v15243_v0  ;;  %14215 = vmatprep.subr.mxu1 %v15243_v0 }
 0xb84   :  { %14222 = vmatprep.mubr.msk.bf16.mxu0 %vm15245_vm0, %v15243_v0  ;;  %14221 = vmatpush3.bf16.msra.mxu0 %v5989_v57 }
 0xb85   :  { %14232 = vmatprep.subr.bf16.mxu0 %v15243_v0 }
 0xb86   :  { %v15146_v63 = vpop.eup %15145 }
 0xb87   :  { %v5390_v1 = vmul.f32 %v15146_v63, %v15130_v34 }
 0xb89   :  { %14208 = vmatmul.mubr.msk.f32.vlgmr.msra.gmra.mxu1 %vm1619_vm3, %v5390_v1 }
 0xb8a   :  { %14216 = vmatpush3.msra.mxu1 %v4692_v3  ;;  %14217 = vmatprep.mubr.msk.f32.mxu1 %vm15245_vm0, %v15243_v0 }
 0xb8b   :  { %14226 = vmatprep.subr.bf16.mxu1 %v15243_v0 }
 0xb8e   :  { %v15148_v15 = vpop.eup %15147 }
 0xb8f   :  { %v5392_v8 = vmul.f32 %v15148_v15, %v16052_v38 }
 0xb91   :  { %14218 = vmatmul.mubr.msk.f32.vlgmr.msra.gmra.mxu1 %vm1619_vm3, %v5392_v8 }
 0xb92   :  { %14228 = vmatprep.mubr.msk.bf16.mxu1 %vm15245_vm0, %v15243_v0  ;;  %14227 = vmatpush3.bf16.msra.mxu1 %v6035_v6 }
 0xb93   :  { %14238 = vmatprep.subr.bf16.mxu1 %v15243_v0 }
 0xc29   :  { %v5462_v10 = vpop.f32.mrf.mxu0 }
 0xc2a   :  { %v5977_v13 = vpack.c.bf16 %v5462_v10, %v5462_v10 }
 0xc2b   :  { %v14184_v25 = vpop.f32.mrf.mxu0 }
 0xc2c   :  { %14223 = vmatmul.mubr.msk.bf16.vlgmr.msra.gmra.mxu0 %vm1619_vm3, %v5977_v13 }
 0xc2d   :  { %14233 = vmatpush3.bf16.msra.mxu0 %v6081_v19  ;;  %14234 = vmatprep.mubr.msk.bf16.mxu0 %vm15245_vm0, %v15243_v0 }
 0xc2e   :  { %14244 = vmatprep.subr.bf16.mxu0 %v15243_v0 }
 0xc31   :  { %v5608_v11 = vpop.f32.mrf.mxu0 }
 0xc32   :  { %v5979_v12 = vpack.c.bf16 %v5608_v11, %v5608_v11 }
 0xc33   :  { %v14194_v14 = vpop.f32.mrf.mxu0 }
 0xc34   :  { %14235 = vmatmul.mubr.msk.bf16.vlgmr.msra.gmra.mxu0 %vm1619_vm3, %v5979_v12 }
 0xc35   :  { %14245 = vmatpush3.bf16.msra.mxu0 %v5989_v57  ;;  %14246 = vmatprep.mubr.msk.bf16.mxu0 %vm15245_vm0, %v15243_v0 }
 0xc36   :  { %14256 = vmatprep.subr.bf16.mxu0 %v15243_v0 }
 0xc39   :  { %v5535_v18 = vpop.f32.mrf.mxu1 }
 0xc3a   :  { %v5978_v21 = vpack.c.bf16 %v5535_v18, %v5535_v18  ;;  %v5754_v23 = vpop.f32.mrf.mxu0 }
 0xc3b   :  { %v5981_v26 = vpack.c.bf16 %v5754_v23, %v5754_v23  ;;  %v14189_v27 = vpop.f32.mrf.mxu1 }
 0xc3c   :  { %v14204_v28 = vpop.f32.mrf.mxu0  ;;  %14229 = vmatmul.mubr.msk.bf16.vlgmr.msra.gmra.mxu1 %vm1619_vm3, %v5978_v21 }
 0xc3d   :  { %14247 = vmatmul.mubr.msk.bf16.vlgmr.msra.gmra.mxu0 %vm1619_vm3, %v5981_v26  ;;  %14239 = vmatpush3.bf16.msra.mxu1 %v6127_v24 }
 0xc3e   :  { %14257 = vmatpush3.bf16.msra.mxu0 %v6081_v19  ;;  %14240 = vmatprep.mubr.msk.bf16.mxu1 %vm15245_vm0, %v15243_v0 }
 0xc3f   :  { %14258 = vmatprep.mubr.msk.bf16.mxu0 %vm15245_vm0, %v15243_v0  ;;  %14250 = vmatprep.subr.bf16.mxu1 %v15243_v0 }
 0xc40   :  { %14268 = vmatprep.subr.bf16.mxu0 %v15243_v0 }
 0xc41   :  { %v5681_v29 = vpop.f32.mrf.mxu1 }
 0xc42   :  { %v5980_v30 = vpack.c.bf16 %v5681_v29, %v5681_v29  ;;  %v5900_v31 = vpop.f32.mrf.mxu0 }
 0xc43   :  { %v5983_v32 = vpack.c.bf16 %v5900_v31, %v5900_v31  ;;  %v14199_v33 = vpop.f32.mrf.mxu1 }
 0xc44   :  { %v14214_v34 = vpop.f32.mrf.mxu0  ;;  %14241 = vmatmul.mubr.msk.bf16.vlgmr.msra.gmra.mxu1 %vm1619_vm3, %v5980_v30 }
 0xc45   :  { %14259 = vmatmul.mubr.msk.bf16.vlgmr.msra.gmra.mxu0 %vm1619_vm3, %v5983_v32  ;;  %14251 = vmatpush3.bf16.msra.mxu1 %v6035_v6 }
 0xc46   :  { %14252 = vmatprep.mubr.msk.bf16.mxu1 %vm15245_vm0, %v15243_v0  ;;  %14262 = vmatprep.subr.bf16.mxu1 %v15243_v0 }
 0xc47   :  { %14272 = vmatprep.mubr.msk.bf16.mxu0 %vm15245_vm0, %v15243_v0 }
 0xc49   :  { %v5827_v37 = vpop.f32.mrf.mxu1 }
 0xc4a   :  { %v5982_v38 = vpack.c.bf16 %v5827_v37, %v5827_v37 }
 0xc4b   :  { %v14209_v35 = vpop.f32.mrf.mxu1 }
 0xc4c   :  { %14253 = vmatmul.mubr.msk.bf16.vlgmr.msra.gmra.mxu1 %vm1619_vm3, %v5982_v38  ;;  %v15020_v38 = vld [vmem:[%s16155_s22] sm:$0xff]   ;;  %v15021_v35 = vld [vmem:[%s16164_s16 + $0x18] sm:$0xff]  }
 0xc4d   :  { %14263 = vmatpush3.bf16.msra.mxu1 %v6127_v24  ;;  %14264 = vmatprep.mubr.msk.bf16.mxu1 %vm15245_vm0, %v15243_v0 }
 0xc4e   :  { %14276 = vmatprep.subr.bf16.mxu1 %v15243_v0 }
 0xc51   :  { %v5973_v36 = vpop.f32.mrf.mxu1 }
 0xc52   :  { %v5984_v39 = vpack.c.bf16 %v5973_v36, %v5973_v36 }
 0xc53   :  { %v14219_v40 = vpop.f32.mrf.mxu1 }
 0xc54   :  { %14265 = vmatmul.mubr.msk.bf16.vlgmr.msra.gmra.mxu1 %vm1619_vm3, %v5984_v39 }
 0xc55   :  { %14284 = vmatprep.mubr.msk.bf16.mxu1 %vm15245_vm0, %v15243_v0  ;;  %14277 = vmatpush3.bf16.msra.mxu1 %v15021_v35 }
 0xc56   :  { %14278 = vmatprep.subr.bf16.mxu1 %v15243_v0 }
 0xcec   :  { %v6025_v41 = vpop.f32.mrf.mxu0 }
 0xcee   :  { %v14224_v42 = vpop.f32.mrf.mxu0 }
 0xcf0   :  { %v6028_v43 = vpop.f32.mrf.mxu0 }
 0xcf2   :  { %v14225_v45 = vpop.f32.mrf.mxu0 }
 0xcf4   :  { %v6117_v46 = vpop.f32.mrf.mxu0 }
 0xcf6   :  { %v14236_v47 = vpop.f32.mrf.mxu0 }
 0xcf7   :  { %v12926_v47 = vld [vmem:[%s16171_s5] ss:$0 sm:$0xff] }
 0xcf8   :  { %v6120_v48 = vpop.f32.mrf.mxu0 }
 0xcfa   :  { %v14237_v51 = vpop.f32.mrf.mxu0 }
 0xcfc   :  { %v6071_v53 = vpop.f32.mrf.mxu1 }
 0xcfd   :  { %v6206_v52 = vpop.f32.mrf.mxu0  ;;  %v6341_v44 = vadd.f32 %v6071_v53, %v6025_v41 }
 0xcfe   :  { %v14230_v54 = vpop.f32.mrf.mxu1 }
 0xcff   :  { %v14248_v49 = vpop.f32.mrf.mxu0  ;;  %v6343_v2 = vadd.f32 %v6341_v44, %v6117_v46 }
 0xd00   :  { %v6074_v50 = vpop.f32.mrf.mxu1 }
 0xd01   :  { %v6209_v56 = vpop.f32.mrf.mxu0 }
 0xd02   :  { %v14231_v59 = vpop.f32.mrf.mxu1  ;;  %v15022_v56 = vld [vmem:[%s16164_s16 + $0x10] sm:$0xff]  }
 0xd03   :  { %v14249_v60 = vpop.f32.mrf.mxu0  ;;  %14279 = vmatpush3.bf16.msra.mxu1 %v15022_v56  ;;  %v15023_v59 = vld [vmem:[%s16164_s16 + $0x8] sm:$0xff]   ;;  %v15034_v56 = vld [vmem:[%s15307_s13 + $0x30] sm:$0xff]  }
 0xd04   :  { %v6163_v9 = vpop.f32.mrf.mxu1  ;;  %14280 = vmatprep.subr.bf16.mxu1 %v15243_v0  ;;  %v15024_v60 = vld [vmem:[%s16164_s16] sm:$0xff]  }
 0xd05   :  { %v6345_v62 = vadd.f32 %v6343_v2, %v6163_v9  ;;  %v6292_v58 = vpop.f32.mrf.mxu0 }
 0xd06   :  { %v14242_v63 = vpop.f32.mrf.mxu1 }
 0xd07   :  { %v6353_v1 = vadd.f32 %v12925_v5, %v6345_v62  ;;  %v14260_v3 = vpop.f32.mrf.mxu0  ;;  %14281 = vmatpush3.bf16.msra.mxu1 %v15023_v59  ;;  %v15035_v59 = vld [vmem:[%s15307_s13 + $0x28] sm:$0xff]  }
 0xd08   :  { %v6166_v15 = vpop.f32.mrf.mxu1  ;;  %14282 = vmatprep.subr.bf16.mxu1 %v15243_v0 }
 0xd09   :  { %v6295_v8 = vpop.f32.mrf.mxu0  ;;  %v6355_v22 = vadd.f32 %v6353_v1, %v15774_v55 }
 0xd0a   :  { %v14243_v57 = vpop.f32.mrf.mxu1 }
 0xd0b   :  { %v14261_v4 = vpop.f32.mrf.mxu0  ;;  %v6357_v6 = vsel %vm501_vm1, %v6355_v22, 0.0  ;;  %14283 = vmatpush3.bf16.msra.mxu1 %v15024_v60  ;;  %v15036_v60 = vld [vmem:[%s15307_s13 + $0x38] sm:$0xff]  }
 0xd0c   :  { %v6249_v7 = vpop.f32.mrf.mxu1  ;;  %6358 = vadd.xlane.f32.xlu0 %v6357_v6  ;;  %14304 = vmatprep.subr.bf16.mxu1 %v15243_v0 }
 0xd0d   :  { %v6342_v13 = vadd.f32 %v6249_v7, %v6206_v52  ;;  %v12927_v52 = vld [vmem:[%s16176_s2] ss:$0 sm:$0xff] }
 0xd0e   :  { %v14254_v10 = vpop.f32.mrf.mxu1 }
 0xd0f   :  { %v6344_v11 = vadd.f32 %v6342_v13, %v6292_v58 }
 0xd10   :  { %v6252_v19 = vpop.f32.mrf.mxu1 }
 0xd12   :  { %v14255_v25 = vpop.f32.mrf.mxu1 }
 0xd14   :  { %v6335_v12 = vpop.f32.mrf.mxu1 }
 0xd15   :  { %v6346_v14 = vadd.f32 %v6344_v11, %v6335_v12 }
 0xd16   :  { %v14266_v17 = vpop.f32.mrf.mxu1 }
 0xd17   :  { %v6354_v18 = vadd.f32 %v12925_v5, %v6346_v14 }
 0xd18   :  { %v6338_v21 = vpop.f32.mrf.mxu1 }
 0xd19   :  { %v6356_v23 = vadd.f32 %v6354_v18, %v15786_v61  ;;  %v15019_v61 = vld [vmem:[%s16155_s22 + $0x8] sm:$0xff]   ;;  %s15275_s22 = smov 23  }
 0xd1a   :  { %v14267_v24 = vpop.f32.mrf.mxu1  ;;  %14269 = vmatpush3.bf16.msra.mxu0 %v15019_v61  ;;  %s16192_s15 = sld [smem:[%s16965_s0 + %s15275_s22]]  }
 0xd1b   :  { %v6360_v55 = vsel %vm501_vm1, %v6356_v23, 0.0  ;;  %14270 = vmatprep.subr.bf16.mxu0 %v15243_v0  ;;  %s16219_s22 = sld [smem:[%s16965_s0 + %s15277_s12]]  }
 0xd1c   :  { %6361 = vadd.xlane.f32.xlu1 %v6360_v55 }
 0xd1e   :  { %14271 = vmatpush3.bf16.msra.mxu0 %v15020_v38 }
 0xd1f   :  { %14288 = vmatprep.subr.bf16.mxu0 %v15243_v0 }
 0xd20   :  { %16989 = sst [smem:[#allocation10_spill]] %s16192_s15  ;;  %v12928_v2 = vld [vmem:[%s16192_s15] ss:$0 sm:$0xff] }
 0xd95   :  { %v6359_v26 = vpop.xlane.xlu0 %6358 }
 0xd96   :  { %v6363_v27 = vmul.f32 0.03125, %v6359_v26 }
 0xd98   :  { %v6365_v28 = vsub.f32 %v6355_v22, %v6363_v27  ;;  %v12932_v22 = vld [vmem:[%s16201_s30] ss:$0 sm:$0xff]  ;;  %s15278_s30 = smov 29  }
 0xd99   :  { %s16224_s5 = sld [smem:[%s16965_s0 + %s15278_s30]]  }
 0xd9a   :  { %v6367_v29 = vmul.f32 %v6365_v28, %v6365_v28 }
 0xd9c   :  { %v6369_v30 = vsel %vm501_vm1, %v6367_v29, 0.0  ;;  %v15025_v29 = vld [vmem:[%s15290_s6 + $0x48] sm:$0xff]  }
 0xd9d   :  { %6370 = vadd.xlane.f32.xlu0 %v6369_v30  ;;  %v15026_v30 = vld [vmem:[%s15290_s6 + $0x68] sm:$0xff]  }
 0xda5   :  { %v6362_v31 = vpop.xlane.xlu1 %6361 }
 0xda6   :  { %v6364_v32 = vmul.f32 0.03125, %v6362_v31  ;;  %v15027_v31 = vld [vmem:[%s15290_s6 + $0x40] sm:$0xff]  }
 0xda8   :  { %v6366_v33 = vsub.f32 %v6356_v23, %v6364_v32  ;;  %v15028_v32 = vld [vmem:[%s15290_s6 + $0x60] sm:$0xff]  }
 0xdaa   :  { %v6368_v34 = vmul.f32 %v6366_v33, %v6366_v33 }
 0xdac   :  { %v6372_v37 = vsel %vm501_vm1, %v6368_v34, 0.0 }
 0xdad   :  { %6373 = vadd.xlane.f32.xlu1 %v6372_v37 }
 0xe26   :  { %v6371_v36 = vpop.xlane.xlu0 %6370 }
 0xe27   :  { %v6375_v39 = vmul.f32 0.03125, %v6371_v36 }
 0xe29   :  { %v6377_v40 = vadd.f32 1e-05, %v6375_v39  ;;  %v12938_v39 = vld [vmem:[%s16219_s22] ss:$0 sm:$0xff] }
 0xe2b   :  { %15149 = vrsqrt.f32 %v6377_v40 }
 0xe36   :  { %v6374_v41 = vpop.xlane.xlu1 %6373 }
 0xe37   :  { %v6376_v42 = vmul.f32 0.03125, %v6374_v41  ;;  %v12939_v41 = vld [vmem:[%s16224_s5] ss:$0 sm:$0xff] }
 0xe38   :  { %v15150_v45 = vpop.eup %15149 }
 0xe39   :  { %v6378_v43 = vadd.f32 1e-05, %v6376_v42  ;;  %v6381_v46 = vmul.f32 %v15150_v45, %v6365_v28 }
 0xe3b   :  { %15151 = vrsqrt.f32 %v6378_v43  ;;  %v6389_v51 = vmul.f32 %v12926_v47, %v6381_v46 }
 0xe3d   :  { %v6397_v44 = vadd.f32 %v12927_v52, %v6389_v51 }
 0xe48   :  { %v15152_v48 = vpop.eup %15151 }
 0xe49   :  { %v6382_v53 = vmul.f32 %v15152_v48, %v6366_v33 }
 0xe4b   :  { %v6390_v54 = vmul.f32 %v12926_v47, %v6382_v53  ;;  %v15029_v47 = vld [vmem:[%s15290_s6 + $0x58] sm:$0xff]   ;;  %v15030_v53 = vld [vmem:[%s15290_s6 + $0x50] sm:$0xff]  }
 0xe4d   :  { %v6398_v49 = vadd.f32 %v12927_v52, %v6390_v54  ;;  %v15031_v54 = vld [vmem:[%s15290_s6 + $0x78] sm:$0xff]  }
 0xe4f   :  { %v6399_v50 = vpack.c.bf16 %v6398_v49, %v6397_v44 }
 0xe51   :  { %14273 = vmatmul.mubr.msk.bf16.vlgmr.msra.gmra.mxu0 %vm501_vm1, %v6399_v50  ;;  %v15033_v50 = vld [vmem:[%s15307_s13 + $0x20] sm:$0xff]   ;;  %s16992_s13 = sld [smem:[#allocation4_spill]] }
 0xe52   :  { %14292 = vmatprep.mubr.msk.bf16.mxu0 %vm15245_vm0, %v15243_v0  ;;  %14289 = vmatpush3.bf16.msra.mxu0 %v15025_v29 }
 0xe53   :  { %14290 = vmatprep.subr.bf16.mxu0 %v15243_v0 }
 0xe56   :  { %14291 = vmatpush3.bf16.msra.mxu0 %v15027_v31 }
 0xe57   :  { %14296 = vmatprep.subr.bf16.mxu0 %v15243_v0 }
 0xf11   :  { %v6455_v5 = vpop.f32.mrf.mxu0 }
 0xf12   :  { %v6456_v62 = vadd.f32 %v12928_v2, %v6455_v5  ;;  %v15038_v5 = vld [vmem:[%s15406_s21 + $0x28] sm:$0xff]  }
 0xf13   :  { %v14274_v9 = vpop.f32.mrf.mxu0 }
 0xf14   :  { %v6462_v3 = vmax.f32 %v6456_v62, 0.0  ;;  %v15039_v9 = vld [vmem:[%s15406_s21 + $0x30] sm:$0xff]   ;;  %v15040_v62 = vld [vmem:[%s15406_s21 + $0x38] sm:$0xff]  }
 0xf15   :  { %v6458_v58 = vpop.f32.mrf.mxu0 }
 0xf16   :  { %v6459_v63 = vadd.f32 %v12928_v2, %v6458_v58  ;;  %v15037_v2 = vld [vmem:[%s15406_s21 + $0x20] sm:$0xff]   ;;  %s16993_s21 = sld [smem:[#allocation5_spill]] }
 0xf17   :  { %v14275_v1 = vpop.f32.mrf.mxu0 }
 0xf18   :  { %v6463_v15 = vmax.f32 %v6459_v63, 0.0 }
 0xf1a   :  { %v6464_v8 = vpack.c.bf16 %v6463_v15, %v6462_v3 }
 0xf1c   :  { %14285 = vmatmul.mubr.msk.bf16.vlgmr.msra.gmra.mxu1 %vm3420_vm5, %v6464_v8 }
 0xf1d   :  { %14308 = vmatprep.mubr.msk.bf16.mxu1 %vm15245_vm0, %v15243_v0  ;;  %14305 = vmatpush3.bf16.msra.mxu1 %v15026_v30 }
 0xf1e   :  { %14306 = vmatprep.subr.bf16.mxu1 %v15243_v0 }
 0xf21   :  { %14307 = vmatpush3.bf16.msra.mxu1 %v15028_v32 }
 0xf22   :  { %14320 = vmatprep.subr.bf16.mxu1 %v15243_v0 }
 0xfdc   :  { %v6532_v57 = vpop.f32.mrf.mxu1 }
 0xfdd   :  { %v6533_v4 = vadd.f32 %v12932_v22, %v6532_v57 }
 0xfde   :  { %v14286_v6 = vpop.f32.mrf.mxu1 }
 0xfdf   :  { %v6539_v7 = vadd.f32 %v6533_v4, %v6397_v44 }
 0xfe0   :  { %v6535_v10 = vpop.f32.mrf.mxu1 }
 0xfe1   :  { %v6536_v13 = vadd.f32 %v12932_v22, %v6535_v10  ;;  %v6541_v19 = vsel %vm501_vm1, %v6539_v7, 0.0 }
 0xfe2   :  { %6542 = vadd.xlane.f32.xlu0 %v6541_v19  ;;  %v14287_v25 = vpop.f32.mrf.mxu1 }
 0xfe3   :  { %v6540_v11 = vadd.f32 %v6536_v13, %v6398_v49  ;;  %v15032_v49 = vld [vmem:[%s15290_s6 + $0x70] sm:$0xff]   ;;  %s16991_s6 = sld [smem:[#allocation3_spill]] }
 0xfe5   :  { %v6544_v12 = vsel %vm501_vm1, %v6540_v11, 0.0 }
 0xfe6   :  { %6545 = vadd.xlane.f32.xlu1 %v6544_v12 }
0x106b   :  { %v6543_v14 = vpop.xlane.xlu0 %6542 }
0x106c   :  { %v6547_v17 = vmul.f32 0.03125, %v6543_v14 }
0x106e   :  { %v6549_v18 = vsub.f32 %v6539_v7, %v6547_v17 }
0x106f   :  { %v6546_v21 = vpop.xlane.xlu1 %6545 }
0x1070   :  { %v6548_v23 = vmul.f32 0.03125, %v6546_v21  ;;  %v6551_v24 = vmul.f32 %v6549_v18, %v6549_v18 }
0x1072   :  { %v6550_v55 = vsub.f32 %v6540_v11, %v6548_v23  ;;  %v6553_v26 = vsel %vm501_vm1, %v6551_v24, 0.0  ;;  %v12962_v24 = vld [vmem:[%s15471_s25 + $0x4] ss:$0 sm:$0xff] }
0x1073   :  { %6554 = vadd.xlane.f32.xlu0 %v6553_v26 }
0x1074   :  { %v6552_v27 = vmul.f32 %v6550_v55, %v6550_v55 }
0x1076   :  { %v6556_v28 = vsel %vm501_vm1, %v6552_v27, 0.0  ;;  %v12942_v27 = vld [vmem:[%s15478_s29 + $0x4] ss:$0 sm:$0xff] }
0x1077   :  { %6557 = vadd.xlane.f32.xlu1 %v6556_v28 }
0x10fc   :  { %v6555_v33 = vpop.xlane.xlu0 %6554 }
0x10fd   :  { %v6559_v34 = vmul.f32 0.03125, %v6555_v33 }
0x10ff   :  { %v6561_v37 = vadd.f32 1e-05, %v6559_v34 }
0x1100   :  { %v6558_v61 = vpop.xlane.xlu1 %6557 }
0x1101   :  { %15153 = vrsqrt.f32 %v6561_v37  ;;  %v6560_v38 = vmul.f32 0.03125, %v6558_v61  ;;  %v12964_v61 = vld [vmem:[%s15471_s25 + $0x6] ss:$0 sm:$0xff] }
0x1103   :  { %v6562_v35 = vadd.f32 1e-05, %v6560_v38 }
0x1105   :  { %15155 = vrsqrt.f32 %v6562_v35 }
0x110e   :  { %v15154_v36 = vpop.eup %15153 }
0x110f   :  { %v6565_v40 = vmul.f32 %v15154_v36, %v6549_v18  ;;  %v12944_v36 = vld [vmem:[%s15478_s29 + $0x6] ss:$0 sm:$0xff] }
0x1111   :  { %v6573_v42 = vmul.f32 %v12938_v39, %v6565_v40 }
0x1112   :  { %v15156_v43 = vpop.eup %15155 }
0x1113   :  { %v6566_v45 = vmul.f32 %v15156_v43, %v6550_v55  ;;  %v16228_v46 = vadd.f32 %v12939_v41, %v6573_v42 }
0x1115   :  { %v6574_v48 = vmul.f32 %v12938_v39, %v6566_v45  ;;  %v13156_v51 = vpack.c.bf16 %v16228_v46, %v16228_v46 }
0x1117   :  { %14293 = vmatmul.mubr.msk.bf16.vlgmr.msra.gmra.mxu0 %vm501_vm1, %v13156_v51  ;;  %14309 = vmatmul.mubr.msk.bf16.vlgmr.msra.gmra.mxu1 %vm501_vm1, %v13156_v51  ;;  %v16238_v52 = vadd.f32 %v12939_v41, %v6574_v48 }
0x1118   :  { %14297 = vmatpush3.bf16.msra.mxu0 %v15029_v47  ;;  %14321 = vmatpush3.bf16.msra.mxu1 %v15025_v29 }
0x1119   :  { %14298 = vmatprep.subr.bf16.mxu0 %v15243_v0  ;;  %14322 = vmatprep.subr.bf16.mxu1 %v15243_v0  ;;  %v13157_v44 = vpack.c.bf16 %v16238_v52, %v16238_v52 }
0x111a   :  { %14300 = vmatprep.mubr.msk.bf16.mxu0 %vm15245_vm0, %v15243_v0  ;;  %14324 = vmatprep.mubr.msk.bf16.mxu1 %vm15245_vm0, %v15243_v0 }
0x111c   :  { %14299 = vmatpush3.bf16.msra.mxu0 %v15030_v53  ;;  %14323 = vmatpush3.bf16.msra.mxu1 %v15027_v31 }
0x111d   :  { %14312 = vmatprep.subr.bf16.mxu0 %v15243_v0  ;;  %14336 = vmatprep.subr.bf16.mxu1 %v15243_v0 }
0x111f   :  { %14301 = vmatmul.mubr.msk.bf16.vlgmr.msra.gmra.mxu0 %vm501_vm1, %v13156_v51  ;;  %14325 = vmatmul.mubr.msk.bf16.vlgmr.msra.gmra.mxu1 %vm501_vm1, %v13157_v44 }
0x1120   :  { %14313 = vmatpush3.bf16.msra.mxu0 %v15031_v54  ;;  %14337 = vmatpush3.bf16.msra.mxu1 %v15026_v30 }
0x1121   :  { %14314 = vmatprep.subr.bf16.mxu0 %v15243_v0  ;;  %14338 = vmatprep.subr.bf16.mxu1 %v15243_v0 }
0x1122   :  { %14316 = vmatprep.mubr.msk.bf16.mxu0 %vm15245_vm0, %v15243_v0  ;;  %14340 = vmatprep.mubr.msk.bf16.mxu1 %vm15245_vm0, %v15243_v0 }
0x1124   :  { %14315 = vmatpush3.bf16.msra.mxu0 %v15032_v49  ;;  %14339 = vmatpush3.bf16.msra.mxu1 %v15028_v32 }
0x1125   :  { %14328 = vmatprep.subr.bf16.mxu0 %v15243_v0  ;;  %14352 = vmatprep.subr.bf16.mxu1 %v15243_v0 }
0x1127   :  { %14317 = vmatmul.mubr.msk.bf16.vlgmr.msra.gmra.mxu0 %vm501_vm1, %v13156_v51  ;;  %14341 = vmatmul.mubr.msk.bf16.vlgmr.msra.gmra.mxu1 %vm501_vm1, %v13157_v44  ;;  %v12963_v51 = vld [vmem:[%s15471_s25 + $0x5] ss:$0 sm:$0xff] }
0x1128   :  { %14329 = vmatpush3.bf16.msra.mxu0 %v15029_v47  ;;  %14353 = vmatpush3.bf16.msra.mxu1 %v15033_v50 }
0x1129   :  { %14330 = vmatprep.subr.bf16.mxu0 %v15243_v0  ;;  %14332 = vmatprep.mubr.msk.bf16.mxu0 %vm15245_vm0, %v15243_v0 }
0x112a   :  { %14354 = vmatprep.mubr.msk.bf16.mxu1 %vm15245_vm0, %v15243_v0  ;;  %14364 = vmatprep.subr.bf16.mxu1 %v15243_v0 }
0x112c   :  { %14331 = vmatpush3.bf16.msra.mxu0 %v15030_v53 }
0x112d   :  { %14344 = vmatprep.subr.bf16.mxu0 %v15243_v0 }
0x112f   :  { %14333 = vmatmul.mubr.msk.bf16.vlgmr.msra.gmra.mxu0 %vm501_vm1, %v13157_v44  ;;  %14355 = vmatmul.mubr.msk.bf16.vlgmr.msra.gmra.mxu1 %vm894_vm2, %v15365_v16 }
0x1130   :  { %14345 = vmatpush3.bf16.msra.mxu0 %v15031_v54  ;;  %14365 = vmatpush3.bf16.msra.mxu1 %v15034_v56 }
0x1131   :  { %14346 = vmatprep.subr.bf16.mxu0 %v15243_v0  ;;  %14348 = vmatprep.mubr.msk.bf16.mxu0 %vm15245_vm0, %v15243_v0 }
0x1132   :  { %14366 = vmatprep.mubr.msk.bf16.mxu1 %vm15245_vm0, %v15243_v0  ;;  %14376 = vmatprep.subr.bf16.mxu1 %v15243_v0 }
0x1134   :  { %14347 = vmatpush3.bf16.msra.mxu0 %v15032_v49 }
0x1135   :  { %14358 = vmatprep.subr.bf16.mxu0 %v15243_v0 }
0x1137   :  { %14349 = vmatmul.mubr.msk.bf16.vlgmr.msra.gmra.mxu0 %vm501_vm1, %v13157_v44  ;;  %14367 = vmatmul.mubr.msk.bf16.vlgmr.msra.gmra.mxu1 %vm894_vm2, %v15365_v16  ;;  %v12943_v44 = vld [vmem:[%s15478_s29 + $0x5] ss:$0 sm:$0xff] }
0x1138   :  { %14359 = vmatpush3.bf16.msra.mxu0 %v15035_v59  ;;  %14377 = vmatpush3.bf16.msra.mxu1 %v15033_v50 }
0x1139   :  { %14360 = vmatprep.mubr.msk.bf16.mxu0 %vm15245_vm0, %v15243_v0  ;;  %14378 = vmatprep.mubr.msk.bf16.mxu1 %vm15245_vm0, %v15243_v0 }
0x113a   :  { %14370 = vmatprep.subr.bf16.mxu0 %v15243_v0  ;;  %14388 = vmatprep.subr.bf16.mxu1 %v15243_v0 }
0x113f   :  { %14361 = vmatmul.mubr.msk.bf16.vlgmr.msra.gmra.mxu0 %vm894_vm2, %v15365_v16  ;;  %14379 = vmatmul.mubr.msk.bf16.vlgmr.msra.gmra.mxu1 %vm894_vm2, %v15390_v20 }
0x1140   :  { %14371 = vmatpush3.bf16.msra.mxu0 %v15036_v60  ;;  %14389 = vmatpush3.bf16.msra.mxu1 %v15034_v56 }
0x1141   :  { %14372 = vmatprep.mubr.msk.bf16.mxu0 %vm15245_vm0, %v15243_v0  ;;  %14390 = vmatprep.mubr.msk.bf16.mxu1 %vm15245_vm0, %v15243_v0 }
0x1142   :  { %14382 = vmatprep.subr.bf16.mxu0 %v15243_v0  ;;  %14400 = vmatprep.subr.bf16.mxu1 %v15243_v0 }
0x1147   :  { %14373 = vmatmul.mubr.msk.bf16.vlgmr.msra.gmra.mxu0 %vm894_vm2, %v15365_v16  ;;  %14391 = vmatmul.mubr.msk.bf16.vlgmr.msra.gmra.mxu1 %vm894_vm2, %v15390_v20 }
0x1148   :  { %14383 = vmatpush3.bf16.msra.mxu0 %v15035_v59  ;;  %14384 = vmatprep.mubr.msk.bf16.mxu0 %vm15245_vm0, %v15243_v0 }
0x1149   :  { %14394 = vmatprep.subr.bf16.mxu0 %v15243_v0  ;;  %14401 = vmatpush3.bf16.msra.mxu1 %v15037_v2 }
0x114a   :  { %14402 = vmatprep.mubr.msk.bf16.mxu1 %vm15245_vm0, %v15243_v0  ;;  %14412 = vmatprep.subr.bf16.mxu1 %v15243_v0 }
0x114f   :  { %14385 = vmatmul.mubr.msk.bf16.vlgmr.msra.gmra.mxu0 %vm894_vm2, %v15390_v20  ;;  %14403 = vmatmul.mubr.msk.bf16.vlgmr.msra.gmra.mxu1 %vm894_vm2, %v15365_v16 }
0x1150   :  { %14395 = vmatpush3.bf16.msra.mxu0 %v15036_v60  ;;  %14396 = vmatprep.mubr.msk.bf16.mxu0 %vm15245_vm0, %v15243_v0 }
0x1151   :  { %14406 = vmatprep.subr.bf16.mxu0 %v15243_v0  ;;  %14414 = vmatprep.mubr.msk.bf16.mxu1 %vm15245_vm0, %v15243_v0 }
0x1152   :  { %14413 = vmatpush3.bf16.msra.mxu1 %v15039_v9 }
0x1153   :  { %14424 = vmatprep.subr.bf16.mxu1 %v15243_v0 }
0x1157   :  { %14397 = vmatmul.mubr.msk.bf16.vlgmr.msra.gmra.mxu0 %vm894_vm2, %v15390_v20  ;;  %14415 = vmatmul.mubr.msk.bf16.vlgmr.msra.gmra.mxu1 %vm894_vm2, %v15365_v16 }
0x1158   :  { %14408 = vmatprep.mubr.msk.bf16.mxu0 %vm15245_vm0, %v15243_v0  ;;  %14407 = vmatpush3.bf16.msra.mxu0 %v15038_v5 }
0x1159   :  { %14418 = vmatprep.subr.bf16.mxu0 %v15243_v0  ;;  %14425 = vmatpush3.bf16.msra.mxu1 %v15037_v2 }
0x115a   :  { %14426 = vmatprep.mubr.msk.bf16.mxu1 %vm15245_vm0, %v15243_v0  ;;  %14436 = vmatprep.subr.bf16.mxu1 %v15243_v0 }
0x115f   :  { %14409 = vmatmul.mubr.msk.bf16.vlgmr.msra.gmra.mxu0 %vm894_vm2, %v15365_v16  ;;  %14427 = vmatmul.mubr.msk.bf16.vlgmr.msra.gmra.mxu1 %vm894_vm2, %v15390_v20 }
0x1160   :  { %14420 = vmatprep.mubr.msk.bf16.mxu0 %vm15245_vm0, %v15243_v0  ;;  %14419 = vmatpush3.bf16.msra.mxu0 %v15040_v62 }
0x1161   :  { %14430 = vmatprep.subr.bf16.mxu0 %v15243_v0  ;;  %14437 = vmatpush3.bf16.msra.mxu1 %v15039_v9 }
0x1162   :  { %14438 = vmatprep.mubr.msk.bf16.mxu1 %vm15245_vm0, %v15243_v0  ;;  %14448 = vmatprep.subr.mxu1 %v15243_v0 }
0x1167   :  { %14421 = vmatmul.mubr.msk.bf16.vlgmr.msra.gmra.mxu0 %vm894_vm2, %v15365_v16  ;;  %14439 = vmatmul.mubr.msk.bf16.vlgmr.msra.gmra.mxu1 %vm894_vm2, %v15390_v20 }
0x1168   :  { %14431 = vmatpush3.bf16.msra.mxu0 %v15038_v5  ;;  %14432 = vmatprep.mubr.msk.bf16.mxu0 %vm15245_vm0, %v15243_v0 }
0x1169   :  { %14442 = vmatprep.subr.bf16.mxu0 %v15243_v0  ;;  %14450 = vmatprep.mubr.msk.f32.mxu1 %vm15245_vm0, %v15243_v0 }
0x116f   :  { %14433 = vmatmul.mubr.msk.bf16.vlgmr.msra.gmra.mxu0 %vm894_vm2, %v15390_v20 }
0x1170   :  { %14443 = vmatpush3.bf16.msra.mxu0 %v15040_v62  ;;  %14444 = vmatprep.mubr.msk.bf16.mxu0 %vm15245_vm0, %v15243_v0 }
0x1171   :  { %14458 = vmatprep.subr.mxu0 %v15243_v0 }
0x1177   :  { %14445 = vmatmul.mubr.msk.bf16.vlgmr.msra.gmra.mxu0 %vm894_vm2, %v15390_v20 }
0x1178   :  { %14460 = vmatprep.mubr.msk.f32.mxu0 %vm15245_vm0, %v15243_v0 }
0x11d7   :  { %v6662_v16 = vpop.f32.mrf.mxu0  ;;  %v6766_v58 = vpop.f32.mrf.mxu1 }
0x11d8   :  { %v6663_v31 = vadd.f32 %v12942_v27, %v6662_v16  ;;  %v6767_v42 = vadd.f32 %v12944_v36, %v6766_v58  ;;  %v12965_v58 = vld [vmem:[%s15471_s25 + $0x7] ss:$0 sm:$0xff]  ;;  %s16994_s25 = sld [smem:[#allocation6_spill]] }
0x11d9   :  { %v14294_v63 = vpop.f32.mrf.mxu0  ;;  %v14310_v1 = vpop.f32.mrf.mxu1 }
0x11db   :  { %v6665_v3 = vpop.f32.mrf.mxu0  ;;  %v6769_v15 = vpop.f32.mrf.mxu1 }
0x11dc   :  { %v12945_v3 = vld [vmem:[%s15478_s29 + $0x7] ss:$0 sm:$0xff]  ;;  %s16995_s29 = sld [smem:[#allocation7_spill]] }
0x11dd   :  { %v14295_v8 = vpop.f32.mrf.mxu0  ;;  %v14311_v22 = vpop.f32.mrf.mxu1 }
0x11df   :  { %v6714_v57 = vpop.f32.mrf.mxu0  ;;  %v6861_v4 = vpop.f32.mrf.mxu1 }
0x11e0   :  { %v6715_v60 = vadd.f32 %v12943_v44, %v6714_v57  ;;  %v6862_v2 = vadd.f32 %v12942_v27, %v6861_v4 }
0x11e1   :  { %v14302_v6 = vpop.f32.mrf.mxu0  ;;  %v14326_v7 = vpop.f32.mrf.mxu1 }
0x11e3   :  { %v6717_v10 = vpop.f32.mrf.mxu0  ;;  %v6864_v13 = vpop.f32.mrf.mxu1 }
0x11e5   :  { %v14303_v20 = vpop.f32.mrf.mxu0  ;;  %v14327_v19 = vpop.f32.mrf.mxu1 }
0x11e6   :  { %v12978_v19 = vld [vmem:[%s15525_s3 + $0x4] ss:$0 sm:$0xff] }
0x11e7   :  { %v16364_v25 = vpop.f32.mrf.mxu0  ;;  %v16366_v11 = vpop.f32.mrf.mxu1 }
0x11e8   :  { %v6819_v4 = vadd.f32 %v12945_v3, %v16364_v25  ;;  %v6942_v6 = vadd.f32 %v12944_v36, %v16366_v11 }
0x11e9   :  { %v14318_v12 = vpop.f32.mrf.mxu0  ;;  %v14342_v14 = vpop.f32.mrf.mxu1 }
0x11eb   :  { %v6821_v17 = vpop.f32.mrf.mxu0  ;;  %v6944_v18 = vpop.f32.mrf.mxu1 }
0x11ed   :  { %v14319_v21 = vpop.f32.mrf.mxu0  ;;  %v14343_v23 = vpop.f32.mrf.mxu1 }
0x11ef   :  { %v16369_v55 = vpop.f32.mrf.mxu0  ;;  %v7051_v26 = vpop.f32.mrf.mxu1 }
0x11f0   :  { %v7052_v28 = vadd.f32 %v12962_v24, %v7051_v26  ;;  %v6902_v21 = vadd.f32 %v12943_v44, %v16369_v55 }
0x11f1   :  { %v14334_v29 = vpop.f32.mrf.mxu0  ;;  %v14356_v30 = vpop.f32.mrf.mxu1 }
0x11f2   :  { %14449 = vmatpush3.xpose.msk.msra.mxu1 %vm1619_vm3, %v7052_v28 }
0x11f3   :  { %v6904_v32 = vpop.f32.mrf.mxu0  ;;  %v7054_v33 = vpop.f32.mrf.mxu1  ;;  %14453 = vmatprep.subr.mxu1 %v15243_v0 }
0x11f4   :  { %v12979_v33 = vld [vmem:[%s15525_s3 + $0x5] ss:$0 sm:$0xff] }
0x11f5   :  { %v14335_v34 = vpop.f32.mrf.mxu0  ;;  %v14357_v37 = vpop.f32.mrf.mxu1  ;;  %14451 = vmatmul.mubr.msk.f32.vlgmr.msra.gmra.mxu1 %vm1619_vm3, %v6663_v31 }
0x11f6   :  { %14455 = vmatprep.mubr.msk.f32.mxu1 %vm15245_vm0, %v15243_v0 }
0x11f7   :  { %v16378_v38 = vpop.f32.mrf.mxu0  ;;  %v7143_v35 = vpop.f32.mrf.mxu1 }
0x11f8   :  { %v7144_v39 = vadd.f32 %v12964_v61, %v7143_v35  ;;  %v6982_v55 = vadd.f32 %v12945_v3, %v16378_v38 }
0x11f9   :  { %v14350_v40 = vpop.f32.mrf.mxu0  ;;  %v14368_v41 = vpop.f32.mrf.mxu1 }
0x11fa   :  { %14459 = vmatpush3.xpose.msk.msra.mxu0 %vm1619_vm3, %v7144_v39 }
0x11fb   :  { %v6984_v43 = vpop.f32.mrf.mxu0  ;;  %v7146_v45 = vpop.f32.mrf.mxu1  ;;  %14468 = vmatprep.subr.mxu0 %v15243_v0 }
0x11fd   :  { %v14351_v47 = vpop.f32.mrf.mxu0  ;;  %v14369_v48 = vpop.f32.mrf.mxu1  ;;  %14461 = vmatmul.mubr.msk.f32.vlgmr.msra.gmra.mxu0 %vm1619_vm3, %v6767_v42 }
0x11fe   :  { %14470 = vmatprep.mubr.msk.f32.mxu0 %vm15245_vm0, %v15243_v0 }
0x11ff   :  { %v7097_v53 = vpop.f32.mrf.mxu0  ;;  %v7229_v54 = vpop.f32.mrf.mxu1 }
0x1200   :  { %v7098_v49 = vadd.f32 %v12963_v51, %v7097_v53  ;;  %v7230_v50 = vadd.f32 %v12962_v24, %v7229_v54 }
0x1201   :  { %v14362_v56 = vpop.f32.mrf.mxu0  ;;  %v14380_v59 = vpop.f32.mrf.mxu1 }
0x1202   :  { %14454 = vmatpush3.xpose.msk.msra.mxu1 %vm1619_vm3, %v7098_v49  ;;  %14469 = vmatpush3.xpose.msk.msra.mxu0 %vm1619_vm3, %v7230_v50 }
0x1203   :  { %v7100_v5 = vpop.f32.mrf.mxu0  ;;  %v7232_v9 = vpop.f32.mrf.mxu1  ;;  %14463 = vmatprep.subr.mxu1 %v15243_v0  ;;  %14478 = vmatprep.subr.mxu0 %v15243_v0 }
0x1205   :  { %v14363_v62 = vpop.f32.mrf.mxu0  ;;  %v14381_v16 = vpop.f32.mrf.mxu1  ;;  %14456 = vmatmul.mubr.msk.f32.vlgmr.msra.gmra.mxu1 %vm1619_vm3, %v6715_v60  ;;  %14471 = vmatmul.mubr.msk.f32.vlgmr.msra.gmra.mxu0 %vm1619_vm3, %v6862_v2 }
0x1206   :  { %14465 = vmatprep.mubr.msk.f32.mxu1 %vm15245_vm0, %v15243_v0  ;;  %14480 = vmatprep.mubr.msk.f32.mxu0 %vm15245_vm0, %v15243_v0 }
0x1207   :  { %v7189_v63 = vpop.f32.mrf.mxu0  ;;  %v7309_v1 = vpop.f32.mrf.mxu1 }
0x1208   :  { %v7190_v15 = vadd.f32 %v12965_v58, %v7189_v63  ;;  %v7310_v8 = vadd.f32 %v12964_v61, %v7309_v1 }
0x1209   :  { %v14374_v22 = vpop.f32.mrf.mxu0  ;;  %v14392_v57 = vpop.f32.mrf.mxu1 }
0x120a   :  { %14464 = vmatpush3.xpose.msk.msra.mxu1 %vm1619_vm3, %v7190_v15  ;;  %14479 = vmatpush3.xpose.msk.msra.mxu0 %vm1619_vm3, %v7310_v8  ;;  %v15239_v15 = vld [vmem:[%s15560_s8] ss:$0 sm:$0xff] }
0x120b   :  { %v7192_v7 = vpop.f32.mrf.mxu0  ;;  %14473 = vmatprep.subr.mxu1 %v15243_v0  ;;  %v7312_v10 = vpop.f32.mrf.mxu1  ;;  %14488 = vmatprep.subr.mxu0 %v15243_v0 }
0x120d   :  { %v14375_v13 = vpop.f32.mrf.mxu0  ;;  %14466 = vmatmul.mubr.msk.f32.vlgmr.msra.gmra.mxu1 %vm1619_vm3, %v6819_v4  ;;  %14481 = vmatmul.mubr.msk.f32.vlgmr.msra.gmra.mxu0 %vm1619_vm3, %v6942_v6  ;;  %v14393_v20 = vpop.f32.mrf.mxu1 }
0x120e   :  { %14475 = vmatprep.mubr.msk.f32.mxu1 %vm15245_vm0, %v15243_v0  ;;  %14490 = vmatprep.mubr.msk.f32.mxu0 %vm15245_vm0, %v15243_v0 }
0x120f   :  { %v7269_v25 = vpop.f32.mrf.mxu0  ;;  %v7419_v11 = vpop.f32.mrf.mxu1 }
0x1210   :  { %v7270_v12 = vadd.f32 %v12963_v51, %v7269_v25  ;;  %v7420_v14 = vadd.f32 %v12978_v19, %v7419_v11  ;;  %v15240_v25 = vld [vmem:[%s15560_s8 + $0x1] ss:$0 sm:$0xff]  ;;  %s16997_s8 = sld [smem:[#allocation9_spill]] }
0x1211   :  { %v14386_v17 = vpop.f32.mrf.mxu0  ;;  %v14404_v18 = vpop.f32.mrf.mxu1 }
0x1212   :  { %14474 = vmatpush3.xpose.msk.msra.mxu1 %vm1619_vm3, %v7270_v12  ;;  %14489 = vmatpush3.msra.mxu0 %v7420_v14 }
0x1213   :  { %v7272_v23 = vpop.f32.mrf.mxu0  ;;  %14483 = vmatprep.subr.mxu1 %v15243_v0  ;;  %v7422_v24 = vpop.f32.mrf.mxu1  ;;  %14498 = vmatprep.subr.mxu0 %v15243_v0 }
0x1215   :  { %v14387_v26 = vpop.f32.mrf.mxu0  ;;  %14476 = vmatmul.mubr.msk.f32.vlgmr.msra.gmra.mxu1 %vm1619_vm3, %v6902_v21  ;;  %v14405_v27 = vpop.f32.mrf.mxu1 }
0x1216   :  { %14485 = vmatprep.mubr.msk.f32.mxu1 %vm15245_vm0, %v15243_v0 }
0x1217   :  { %v7349_v28 = vpop.f32.mrf.mxu0  ;;  %v16425_v34 = vpop.f32.mrf.mxu1 }
0x1218   :  { %v7350_v29 = vadd.f32 %v12965_v58, %v7349_v28 }
0x1219   :  { %v14398_v30 = vpop.f32.mrf.mxu0  ;;  %v14416_v35 = vpop.f32.mrf.mxu1 }
0x121a   :  { %14484 = vmatpush3.xpose.msk.msra.mxu1 %vm1619_vm3, %v7350_v29 }
0x121b   :  { %v7352_v31 = vpop.f32.mrf.mxu0  ;;  %14493 = vmatprep.subr.mxu1 %v15243_v0  ;;  %v7514_v39 = vpop.f32.mrf.mxu1 }
0x121d   :  { %v14399_v32 = vpop.f32.mrf.mxu0  ;;  %14486 = vmatmul.mubr.msk.f32.vlgmr.msra.gmra.mxu1 %vm1619_vm3, %v6982_v55  ;;  %v14417_v38 = vpop.f32.mrf.mxu1 }
0x121e   :  { %14495 = vmatprep.mubr.msk.f32.mxu1 %vm15245_vm0, %v15243_v0 }
0x121f   :  { %v7465_v37 = vpop.f32.mrf.mxu0  ;;  %v7597_v42 = vpop.f32.mrf.mxu1 }
0x1220   :  { %v7466_v61 = vadd.f32 %v12979_v33, %v7465_v37  ;;  %v16432_v45 = vadd.f32 %v12978_v19, %v7597_v42 }
0x1221   :  { %v14410_v36 = vpop.f32.mrf.mxu0  ;;  %v14428_v47 = vpop.f32.mrf.mxu1 }
0x1222   :  { %14494 = vmatpush3.msra.mxu1 %v7466_v61 }
0x1223   :  { %v7468_v40 = vpop.f32.mrf.mxu0  ;;  %14503 = vmatprep.subr.mxu1 %v15243_v0  ;;  %v7600_v51 = vpop.f32.mrf.mxu1 }
0x1225   :  { %v14411_v41 = vpop.f32.mrf.mxu0  ;;  %v14429_v54 = vpop.f32.mrf.mxu1 }
0x1227   :  { %v16430_v43 = vpop.f32.mrf.mxu0  ;;  %v16434_v49 = vpop.f32.mrf.mxu1 }
0x1229   :  { %v14422_v48 = vpop.f32.mrf.mxu0  ;;  %v14440_v59 = vpop.f32.mrf.mxu1 }
0x122b   :  { %v7560_v53 = vpop.f32.mrf.mxu0  ;;  %v7680_v2 = vpop.f32.mrf.mxu1 }
0x122d   :  { %v14423_v44 = vpop.f32.mrf.mxu0  ;;  %v14441_v9 = vpop.f32.mrf.mxu1 }
0x122f   :  { %v7637_v50 = vpop.f32.mrf.mxu0 }
0x1230   :  { %v16436_v56 = vadd.f32 %v12979_v33, %v7637_v50 }
0x1231   :  { %v14434_v60 = vpop.f32.mrf.mxu0 }
0x1233   :  { %v7640_v5 = vpop.f32.mrf.mxu0 }
0x1235   :  { %v14435_v62 = vpop.f32.mrf.mxu0 }
0x1237   :  { %v16438_v16 = vpop.f32.mrf.mxu0 }
0x1239   :  { %v14446_v58 = vpop.f32.mrf.mxu0 }
0x123b   :  { %v7720_v63 = vpop.f32.mrf.mxu0 }
0x123d   :  { %v14447_v1 = vpop.f32.mrf.mxu0 }
0x12b5   :  { %v7795_v3 = vpop.f32.mrf.mxu1 }
0x12b6   :  { %v7796_v8 = vadd.f32 %v15239_v15, %v7795_v3 }
0x12b7   :  { %v14452_v22 = vpop.f32.mrf.mxu1 }
0x12b8   :  { %v8331_v57 = vsel %vm1619_vm3, %v7796_v8, -inf }
0x12b9   :  { %8332 = vmax.xlane.f32.xlu0 %v8331_v57 }
0x12bd   :  { %v7947_v4 = vpop.f32.mrf.mxu0 }
0x12be   :  { %v7948_v6 = vadd.f32 %v15239_v15, %v7947_v4 }
0x12bf   :  { %v14462_v7 = vpop.f32.mrf.mxu0 }
0x12c0   :  { %v8337_v10 = vsel %vm1619_vm3, %v7948_v6, -inf }
0x12c1   :  { %8338 = vmax.xlane.f32.xlu0 %v8337_v10 }
0x12c5   :  { %v7871_v13 = vpop.f32.mrf.mxu1  ;;  %v8099_v20 = vpop.f32.mrf.mxu0 }
0x12c6   :  { %v7872_v19 = vadd.f32 %v15239_v15, %v7871_v13  ;;  %v8100_v11 = vadd.f32 %v15240_v25, %v8099_v20 }
0x12c7   :  { %v14457_v12 = vpop.f32.mrf.mxu1  ;;  %v14472_v14 = vpop.f32.mrf.mxu0 }
0x12c8   :  { %v8334_v17 = vsel %vm1619_vm3, %v7872_v19, -inf  ;;  %v8343_v18 = vsel %vm1619_vm3, %v8100_v11, -inf }
0x12c9   :  { %8335 = vmax.xlane.f32.xlu1 %v8334_v17  ;;  %8344 = vmax.xlane.f32.xlu0 %v8343_v18 }
0x12cd   :  { %v8023_v21 = vpop.f32.mrf.mxu1  ;;  %v8251_v23 = vpop.f32.mrf.mxu0 }
0x12ce   :  { %v8024_v24 = vadd.f32 %v15239_v15, %v8023_v21  ;;  %v8252_v26 = vadd.f32 %v15240_v25, %v8251_v23 }
0x12cf   :  { %v14467_v27 = vpop.f32.mrf.mxu1  ;;  %v14482_v28 = vpop.f32.mrf.mxu0 }
0x12d0   :  { %v8340_v29 = vsel %vm1619_vm3, %v8024_v24, -inf  ;;  %v8349_v30 = vsel %vm1619_vm3, %v8252_v26, -inf }
0x12d1   :  { %8341 = vmax.xlane.f32.xlu1 %v8340_v29  ;;  %8350 = vmax.xlane.f32.xlu0 %v8349_v30 }
0x12d5   :  { %v8175_v55 = vpop.f32.mrf.mxu1 }
0x12d6   :  { %v8176_v31 = vadd.f32 %v15240_v25, %v8175_v55 }
0x12d7   :  { %v14477_v32 = vpop.f32.mrf.mxu1 }
0x12d8   :  { %v8346_v33 = vsel %vm1619_vm3, %v8176_v31, -inf }
0x12d9   :  { %8347 = vmax.xlane.f32.xlu1 %v8346_v33 }
0x12dd   :  { %v8327_v37 = vpop.f32.mrf.mxu1 }
0x12de   :  { %v8328_v61 = vadd.f32 %v15240_v25, %v8327_v37 }
0x12df   :  { %v14487_v35 = vpop.f32.mrf.mxu1 }
0x12e0   :  { %v8352_v36 = vsel %vm1619_vm3, %v8328_v61, -inf }
0x12e1   :  { %8353 = vmax.xlane.f32.xlu1 %v8352_v36 }
0x1342   :  { %v8333_v39 = vpop.xlane.xlu0 %8332 }
0x1343   :  { %v8355_v40 = vsub.f32 %v7796_v8, %v8333_v39 }
0x1345   :  { %v8363_v38 = vmul.f32 1.442695, %v8355_v40 }
0x1347   :  { %15157 = vpow2.f32 %v8363_v38 }
0x134a   :  { %v8339_v41 = vpop.xlane.xlu0 %8338 }
0x134b   :  { %v8357_v42 = vsub.f32 %v7948_v6, %v8339_v41 }
0x134d   :  { %v8367_v47 = vmul.f32 1.442695, %v8357_v42 }
0x134f   :  { %15159 = vpow2.f32 %v8367_v47 }
0x1352   :  { %v8336_v48 = vpop.xlane.xlu1 %8335  ;;  %v8345_v51 = vpop.xlane.xlu0 %8344 }
0x1353   :  { %v8356_v53 = vsub.f32 %v7872_v19, %v8336_v48  ;;  %v8359_v54 = vsub.f32 %v8100_v11, %v8345_v51 }
0x1354   :  { %v15158_v44 = vpop.eup %15157 }
0x1355   :  { %v8365_v50 = vmul.f32 1.442695, %v8356_v53  ;;  %v8371_v59 = vmul.f32 1.442695, %v8359_v54  ;;  %v8379_v60 = vsel %vm1619_vm3, %v15158_v44, 0.0 }
0x1356   :  { %8380 = vadd.xlane.f32.xlu0 %v8379_v60  ;;  %v231_v60 = vld [vmem:[%s15629_s14 + $0x18] sm:$0xf] }
0x1357   :  { %15161 = vpow2.f32 %v8365_v50  ;;  %v230_v50 = vld [vmem:[%s15629_s14 + $0x14] sm:$0xf] }
0x1358   :  { %15163 = vpow2.f32 %v8371_v59  ;;  %v9061_v59 = vsel %vm2911_vm4, %v230_v50, 0 }
0x135a   :  { %v8342_v2 = vpop.xlane.xlu1 %8341  ;;  %v8351_v5 = vpop.xlane.xlu0 %8350 }
0x135b   :  { %v8358_v9 = vsub.f32 %v8024_v24, %v8342_v2  ;;  %v8361_v62 = vsub.f32 %v8252_v26, %v8351_v5  ;;  %v12980_v26 = vld [vmem:[%s15525_s3 + $0x6] ss:$0 sm:$0xff] }
0x135c   :  { %v15160_v58 = vpop.eup %15159  ;;  %v7512_v29 = vadd.f32 %v12980_v26, %v16425_v34  ;;  %v12981_v34 = vld [vmem:[%s15525_s3 + $0x7] ss:$0 sm:$0xff]  ;;  %v7678_v41 = vadd.f32 %v12980_v26, %v16434_v49  ;;  %s16996_s3 = sld [smem:[#allocation8_spill]] }
0x135d   :  { %v8369_v63 = vmul.f32 1.442695, %v8358_v9  ;;  %v8375_v1 = vmul.f32 1.442695, %v8361_v62  ;;  %v8385_v3 = vsel %vm1619_vm3, %v15160_v58, 0.0  ;;  %v7558_v39 = vadd.f32 %v12981_v34, %v16430_v43 }
0x135e   :  { %8386 = vadd.xlane.f32.xlu0 %v8385_v3  ;;  %v7718_v53 = vadd.f32 %v12981_v34, %v16438_v16  ;;  %v9107_v9 = vsel %vm2911_vm4, %v231_v60, 0  ;;  %v232_v3 = vld [vmem:[%s15629_s14 + $0x1c] sm:$0xf] }
0x135f   :  { %15165 = vpow2.f32 %v8369_v63 }
0x1360   :  { %15167 = vpow2.f32 %v8375_v1 }
0x1362   :  { %v8348_v15 = vpop.xlane.xlu1 %8347 }
0x1363   :  { %v8360_v8 = vsub.f32 %v8176_v31, %v8348_v15 }
0x1364   :  { %v15162_v22 = vpop.eup %15161 }
0x1365   :  { %v15164_v57 = vpop.eup %15163  ;;  %v8373_v4 = vmul.f32 1.442695, %v8360_v8  ;;  %v8382_v6 = vsel %vm1619_vm3, %v15162_v22, 0.0 }
0x1366   :  { %8383 = vadd.xlane.f32.xlu1 %v8382_v6  ;;  %v8391_v7 = vsel %vm1619_vm3, %v15164_v57, 0.0 }
0x1367   :  { %15169 = vpow2.f32 %v8373_v4  ;;  %8392 = vadd.xlane.f32.xlu0 %v8391_v7 }
0x136a   :  { %v8354_v10 = vpop.xlane.xlu1 %8353 }
0x136b   :  { %v8362_v13 = vsub.f32 %v8328_v61, %v8354_v10 }
0x136c   :  { %v15166_v20 = vpop.eup %15165 }
0x136d   :  { %v15168_v19 = vpop.eup %15167  ;;  %v8377_v25 = vmul.f32 1.442695, %v8362_v13  ;;  %v8388_v11 = vsel %vm1619_vm3, %v15166_v20, 0.0 }
0x136e   :  { %8389 = vadd.xlane.f32.xlu1 %v8388_v11  ;;  %v8397_v12 = vsel %vm1619_vm3, %v15168_v19, 0.0 }
0x136f   :  { %15171 = vpow2.f32 %v8377_v25  ;;  %8398 = vadd.xlane.f32.xlu0 %v8397_v12 }
0x1374   :  { %v15170_v14 = vpop.eup %15169 }
0x1375   :  { %v8394_v17 = vsel %vm1619_vm3, %v15170_v14, 0.0 }
0x1376   :  { %8395 = vadd.xlane.f32.xlu1 %v8394_v17 }
0x137c   :  { %v16457_v18 = vpop.eup %15171 }
0x137d   :  { %v8400_v21 = vsel %vm1619_vm3, %v16457_v18, 0.0 }
0x137e   :  { %8401 = vadd.xlane.f32.xlu1 %v8400_v21 }
0x13df   :  { %v8381_v23 = vpop.xlane.xlu0 %8380 }
0x13e0   :  { %15173 = vrcp.f32 %v8381_v23 }
0x13e7   :  { %v8387_v24 = vpop.xlane.xlu0 %8386 }
0x13e8   :  { %15175 = vrcp.f32 %v8387_v24 }
0x13ed   :  { %v15174_v27 = vpop.eup %15173 }
0x13ee   :  { %v8411_v28 = vmul.f32 %v15174_v27, %v15158_v44  ;;  %v229_v44 = vld [vmem:[%s15629_s14 + $0x10] sm:$0xf]  ;;  %s16998_s14 = sld [smem:[#allocation10_spill]] }
0x13ef   :  { %v8384_v30 = vpop.xlane.xlu1 %8383  ;;  %v9015_v16 = vsel %vm2911_vm4, %v229_v44, 0 }
0x13f0   :  { %15177 = vrcp.f32 %v8384_v30  ;;  %v8393_v55 = vpop.xlane.xlu0 %8392  ;;  %14491 = vmatmul.mubr.msk.f32.vlgmr.msra.gmra.mxu0 %vm1619_vm3, %v8411_v28 }
0x13f1   :  { %15179 = vrcp.f32 %v8393_v55  ;;  %14499 = vmatpush3.msra.mxu0 %v7512_v29  ;;  %14500 = vmatprep.mubr.msk.f32.mxu0 %vm15245_vm0, %v15243_v0 }
0x13f2   :  { %14508 = vmatprep.subr.mxu0 %v15243_v0 }
0x13f5   :  { %v15176_v31 = vpop.eup %15175 }
0x13f6   :  { %v8413_v32 = vmul.f32 %v15176_v31, %v15160_v58 }
0x13f7   :  { %v8390_v33 = vpop.xlane.xlu1 %8389 }
0x13f8   :  { %15181 = vrcp.f32 %v8390_v33  ;;  %v8399_v37 = vpop.xlane.xlu0 %8398  ;;  %14501 = vmatmul.mubr.msk.f32.vlgmr.msra.gmra.mxu0 %vm1619_vm3, %v8413_v32 }
0x13f9   :  { %15183 = vrcp.f32 %v8399_v37  ;;  %14509 = vmatpush3.msra.mxu0 %v16432_v45  ;;  %14510 = vmatprep.mubr.msk.f32.mxu0 %vm15245_vm0, %v15243_v0 }
0x13fa   :  { %14518 = vmatprep.subr.mxu0 %v15243_v0 }
0x13fd   :  { %v15178_v61 = vpop.eup %15177 }
0x13fe   :  { %v15180_v35 = vpop.eup %15179  ;;  %v8412_v36 = vmul.f32 %v15178_v61, %v15162_v22 }
0x13ff   :  { %v8415_v40 = vmul.f32 %v15180_v35, %v15164_v57  ;;  %v8396_v38 = vpop.xlane.xlu1 %8395  ;;  %v9153_v57 = vsel %vm2911_vm4, %v232_v3, 0 }
0x1400   :  { %15185 = vrcp.f32 %v8396_v38  ;;  %14496 = vmatmul.mubr.msk.f32.vlgmr.msra.gmra.mxu1 %vm1619_vm3, %v8412_v36 }
0x1401   :  { %14504 = vmatpush3.msra.mxu1 %v7558_v39  ;;  %14511 = vmatmul.mubr.msk.f32.vlgmr.msra.gmra.mxu0 %vm1619_vm3, %v8415_v40 }
0x1402   :  { %14519 = vmatpush3.msra.mxu0 %v7678_v41  ;;  %14505 = vmatprep.mubr.msk.f32.mxu1 %vm15245_vm0, %v15243_v0  ;;  %v13026_v41 = vld [vmem:[%s15674_s18 + $0x1] ss:$0 sm:$0xff]  ;;  %s16999_s18 = sld [smem:[#allocation11_spill]] }
0x1403   :  { %14513 = vmatprep.subr.mxu1 %v15243_v0  ;;  %14520 = vmatprep.mubr.msk.f32.mxu0 %vm15245_vm0, %v15243_v0 }
0x1404   :  { %14528 = vmatprep.subr.bf16.mxu0 %v15243_v0 }
0x1405   :  { %v15182_v43 = vpop.eup %15181 }
0x1406   :  { %v15184_v45 = vpop.eup %15183  ;;  %v8414_v49 = vmul.f32 %v15182_v43, %v15166_v20 }
0x1407   :  { %v8417_v42 = vmul.f32 %v15184_v45, %v15168_v19  ;;  %v8402_v47 = vpop.xlane.xlu1 %8401 }
0x1408   :  { %15187 = vrcp.f32 %v8402_v47  ;;  %14506 = vmatmul.mubr.msk.f32.vlgmr.msra.gmra.mxu1 %vm1619_vm3, %v8414_v49 }
0x1409   :  { %14514 = vmatpush3.msra.mxu1 %v16436_v56  ;;  %14521 = vmatmul.mubr.msk.f32.vlgmr.msra.gmra.mxu0 %vm1619_vm3, %v8417_v42 }
0x140a   :  { %14515 = vmatprep.mubr.msk.f32.mxu1 %vm15245_vm0, %v15243_v0  ;;  %14523 = vmatprep.subr.mxu1 %v15243_v0 }
0x140b   :  { %14530 = vmatprep.mubr.msk.bf16.mxu0 %vm15245_vm0, %v15243_v0  ;;  %14529 = vmatpush3.bf16.msra.mxu0 %v9015_v16 }
0x140c   :  { %14540 = vmatprep.subr.bf16.mxu0 %v15243_v0 }
0x140d   :  { %v15186_v48 = vpop.eup %15185 }
0x140e   :  { %v8416_v51 = vmul.f32 %v15186_v48, %v15170_v14 }
0x1410   :  { %14516 = vmatmul.mubr.msk.f32.vlgmr.msra.gmra.mxu1 %vm1619_vm3, %v8416_v51 }
0x1411   :  { %14524 = vmatpush3.msra.mxu1 %v7718_v53  ;;  %14525 = vmatprep.mubr.msk.f32.mxu1 %vm15245_vm0, %v15243_v0 }
0x1412   :  { %14534 = vmatprep.subr.bf16.mxu1 %v15243_v0 }
0x1415   :  { %v15188_v56 = vpop.eup %15187 }
0x1416   :  { %v8418_v54 = vmul.f32 %v15188_v56, %v16457_v18 }
0x1418   :  { %14526 = vmatmul.mubr.msk.f32.vlgmr.msra.gmra.mxu1 %vm1619_vm3, %v8418_v54 }
0x1419   :  { %14536 = vmatprep.mubr.msk.bf16.mxu1 %vm15245_vm0, %v15243_v0  ;;  %14535 = vmatpush3.bf16.msra.mxu1 %v9061_v59 }
0x141a   :  { %14546 = vmatprep.subr.bf16.mxu1 %v15243_v0 }
0x14b0   :  { %v8488_v2 = vpop.f32.mrf.mxu0 }
0x14b1   :  { %v9003_v5 = vpack.c.bf16 %v8488_v2, %v8488_v2 }
0x14b2   :  { %v14492_v62 = vpop.f32.mrf.mxu0 }
0x14b3   :  { %14531 = vmatmul.mubr.msk.bf16.vlgmr.msra.gmra.mxu0 %vm1619_vm3, %v9003_v5 }
0x14b4   :  { %14541 = vmatpush3.bf16.msra.mxu0 %v9107_v9  ;;  %14542 = vmatprep.mubr.msk.bf16.mxu0 %vm15245_vm0, %v15243_v0 }
0x14b5   :  { %14552 = vmatprep.subr.bf16.mxu0 %v15243_v0 }
0x14b8   :  { %v8634_v58 = vpop.f32.mrf.mxu0 }
0x14b9   :  { %v9005_v63 = vpack.c.bf16 %v8634_v58, %v8634_v58 }
0x14ba   :  { %v14502_v1 = vpop.f32.mrf.mxu0 }
0x14bb   :  { %14543 = vmatmul.mubr.msk.bf16.vlgmr.msra.gmra.mxu0 %vm1619_vm3, %v9005_v63 }
0x14bc   :  { %14553 = vmatpush3.bf16.msra.mxu0 %v9015_v16  ;;  %14554 = vmatprep.mubr.msk.bf16.mxu0 %vm15245_vm0, %v15243_v0 }
0x14bd   :  { %14564 = vmatprep.subr.bf16.mxu0 %v15243_v0 }
0x14c0   :  { %v8561_v15 = vpop.f32.mrf.mxu1 }
0x14c1   :  { %v9004_v8 = vpack.c.bf16 %v8561_v15, %v8561_v15  ;;  %v8780_v22 = vpop.f32.mrf.mxu0 }
0x14c2   :  { %v9007_v4 = vpack.c.bf16 %v8780_v22, %v8780_v22  ;;  %v14497_v6 = vpop.f32.mrf.mxu1 }
0x14c3   :  { %v14512_v7 = vpop.f32.mrf.mxu0  ;;  %14537 = vmatmul.mubr.msk.bf16.vlgmr.msra.gmra.mxu1 %vm1619_vm3, %v9004_v8 }
0x14c4   :  { %14555 = vmatmul.mubr.msk.bf16.vlgmr.msra.gmra.mxu0 %vm1619_vm3, %v9007_v4  ;;  %14547 = vmatpush3.bf16.msra.mxu1 %v9153_v57 }
0x14c5   :  { %14565 = vmatpush3.bf16.msra.mxu0 %v9107_v9  ;;  %14548 = vmatprep.mubr.msk.bf16.mxu1 %vm15245_vm0, %v15243_v0 }
0x14c6   :  { %14566 = vmatprep.mubr.msk.bf16.mxu0 %vm15245_vm0, %v15243_v0  ;;  %14558 = vmatprep.subr.bf16.mxu1 %v15243_v0 }
0x14c7   :  { %14576 = vmatprep.subr.bf16.mxu0 %v15243_v0 }
0x14c8   :  { %v8707_v10 = vpop.f32.mrf.mxu1 }
0x14c9   :  { %v9006_v13 = vpack.c.bf16 %v8707_v10, %v8707_v10  ;;  %v8926_v20 = vpop.f32.mrf.mxu0 }
0x14ca   :  { %v9009_v19 = vpack.c.bf16 %v8926_v20, %v8926_v20  ;;  %v14507_v25 = vpop.f32.mrf.mxu1 }
0x14cb   :  { %v14522_v11 = vpop.f32.mrf.mxu0  ;;  %14549 = vmatmul.mubr.msk.bf16.vlgmr.msra.gmra.mxu1 %vm1619_vm3, %v9006_v13  ;;  %v15041_v25 = vld [vmem:[%s15686_s23 + $0x18] sm:$0xff]  }
0x14cc   :  { %14567 = vmatmul.mubr.msk.bf16.vlgmr.msra.gmra.mxu0 %vm1619_vm3, %v9009_v19  ;;  %14559 = vmatpush3.bf16.msra.mxu1 %v9061_v59  ;;  %v15042_v11 = vld [vmem:[%s15686_s23 + $0x10] sm:$0xff]   ;;  %s17000_s23 = sld [smem:[#allocation2_spill]] }
0x14cd   :  { %14560 = vmatprep.mubr.msk.bf16.mxu1 %vm15245_vm0, %v15243_v0  ;;  %14570 = vmatprep.subr.bf16.mxu1 %v15243_v0 }
0x14ce   :  { %14580 = vmatprep.mubr.msk.bf16.mxu0 %vm15245_vm0, %v15243_v0  ;;  %14577 = vmatpush3.bf16.msra.mxu0 %v15041_v25 }
0x14cf   :  { %14578 = vmatprep.subr.bf16.mxu0 %v15243_v0 }
0x14d0   :  { %v8853_v12 = vpop.f32.mrf.mxu1 }
0x14d1   :  { %v9008_v14 = vpack.c.bf16 %v8853_v12, %v8853_v12  ;;  %v15043_v12 = vld [vmem:[%s15695_s28 + $0x38] sm:$0xff]  }
0x14d2   :  { %v14517_v17 = vpop.f32.mrf.mxu1  ;;  %14579 = vmatpush3.bf16.msra.mxu0 %v15042_v11 }
0x14d3   :  { %14561 = vmatmul.mubr.msk.bf16.vlgmr.msra.gmra.mxu1 %vm1619_vm3, %v9008_v14  ;;  %14596 = vmatprep.subr.bf16.mxu0 %v15243_v0 }
0x14d4   :  { %14571 = vmatpush3.bf16.msra.mxu1 %v9153_v57  ;;  %14572 = vmatprep.mubr.msk.bf16.mxu1 %vm15245_vm0, %v15243_v0 }
0x14d5   :  { %14584 = vmatprep.subr.bf16.mxu1 %v15243_v0 }
0x14d8   :  { %v8999_v18 = vpop.f32.mrf.mxu1 }
0x14d9   :  { %v9010_v21 = vpack.c.bf16 %v8999_v18, %v8999_v18 }
0x14da   :  { %v14527_v23 = vpop.f32.mrf.mxu1 }
0x14db   :  { %14573 = vmatmul.mubr.msk.bf16.vlgmr.msra.gmra.mxu1 %vm1619_vm3, %v9010_v21 }
0x14dc   :  { %14592 = vmatprep.mubr.msk.bf16.mxu1 %vm15245_vm0, %v15243_v0  ;;  %14585 = vmatpush3.bf16.msra.mxu1 %v15043_v12  ;;  %v13039_v12 = vld [vmem:[%s15765_s27 + $0x1] ss:$0 sm:$0xff] }
0x14dd   :  { %14586 = vmatprep.subr.bf16.mxu1 %v15243_v0 }
0x1573   :  { %v9051_v24 = vpop.f32.mrf.mxu0 }
0x1575   :  { %v14532_v26 = vpop.f32.mrf.mxu0 }
0x1577   :  { %v9054_v27 = vpop.f32.mrf.mxu0 }
0x1579   :  { %v14533_v28 = vpop.f32.mrf.mxu0 }
0x157a   :  { %v13027_v28 = vld [vmem:[%s15702_s4 + $0x1] ss:$0 sm:$0xff] }
0x157b   :  { %v9143_v29 = vpop.f32.mrf.mxu0 }
0x157d   :  { %v14544_v30 = vpop.f32.mrf.mxu0 }
0x157f   :  { %v9146_v55 = vpop.f32.mrf.mxu0 }
0x1581   :  { %v14545_v31 = vpop.f32.mrf.mxu0 }
0x1582   :  { %v13028_v31 = vld [vmem:[%s15707_s11 + $0x1] ss:$0 sm:$0xff] }
0x1583   :  { %v9097_v32 = vpop.f32.mrf.mxu1 }
0x1584   :  { %v9232_v33 = vpop.f32.mrf.mxu0  ;;  %v9367_v34 = vadd.f32 %v9097_v32, %v9051_v24 }
0x1585   :  { %v14538_v37 = vpop.f32.mrf.mxu1 }
0x1586   :  { %v14556_v61 = vpop.f32.mrf.mxu0  ;;  %v9369_v38 = vadd.f32 %v9367_v34, %v9143_v29 }
0x1587   :  { %v9100_v35 = vpop.f32.mrf.mxu1  ;;  %v15044_v61 = vld [vmem:[%s15695_s28 + $0x30] sm:$0xff]  }
0x1588   :  { %v9235_v36 = vpop.f32.mrf.mxu0  ;;  %14587 = vmatpush3.bf16.msra.mxu1 %v15044_v61  ;;  %v15045_v35 = vld [vmem:[%s15695_s28 + $0x28] sm:$0xff]   ;;  %v15058_v61 = vld [vmem:[%s15755_s10 + $0x60] sm:$0xff]  }
0x1589   :  { %v14539_v39 = vpop.f32.mrf.mxu1  ;;  %14588 = vmatprep.subr.bf16.mxu1 %v15243_v0  ;;  %v15046_v36 = vld [vmem:[%s15695_s28 + $0x20] sm:$0xff]   ;;  %s15279_s28 = smov 35  }
0x158a   :  { %v14557_v40 = vpop.f32.mrf.mxu0  ;;  %v13029_v39 = vld [vmem:[%s15723_s17 + $0x1] ss:$0 sm:$0xff]  ;;  %s12725_s17 = sld [smem:[%s16965_s0 + %s15279_s28]]  }
0x158b   :  { %v9189_v43 = vpop.f32.mrf.mxu1 }
0x158c   :  { %v9371_v45 = vadd.f32 %v9369_v38, %v9189_v43  ;;  %v9318_v49 = vpop.f32.mrf.mxu0  ;;  %14589 = vmatpush3.bf16.msra.mxu1 %v15045_v35  ;;  %v15059_v35 = vld [vmem:[%s15755_s10 + $0x58] sm:$0xff]  }
0x158d   :  { %v14550_v42 = vpop.f32.mrf.mxu1  ;;  %14590 = vmatprep.subr.bf16.mxu1 %v15243_v0 }
0x158e   :  { %v9379_v47 = vadd.f32 %v13026_v41, %v9371_v45  ;;  %v14568_v48 = vpop.f32.mrf.mxu0 }
0x158f   :  { %v9192_v51 = vpop.f32.mrf.mxu1 }
0x1590   :  { %v9321_v53 = vpop.f32.mrf.mxu0  ;;  %v9381_v56 = vadd.f32 %v9379_v47, %v16228_v46  ;;  %14591 = vmatpush3.bf16.msra.mxu1 %v15046_v36  ;;  %v13033_v51 = vld [vmem:[%s15732_s24 + $0x1] ss:$0 sm:$0xff]  ;;  %v15060_v36 = vld [vmem:[%s15755_s10 + $0x50] sm:$0xff]  }
0x1591   :  { %v14551_v54 = vpop.f32.mrf.mxu1  ;;  %14612 = vmatprep.subr.bf16.mxu1 %v15243_v0 }
0x1592   :  { %v14569_v44 = vpop.f32.mrf.mxu0  ;;  %v9383_v16 = vsel %vm501_vm1, %v9381_v56, 0.0 }
0x1593   :  { %v9275_v50 = vpop.f32.mrf.mxu1  ;;  %9384 = vadd.xlane.f32.xlu0 %v9383_v16 }
0x1594   :  { %v9368_v60 = vadd.f32 %v9275_v50, %v9232_v33 }
0x1595   :  { %v14562_v59 = vpop.f32.mrf.mxu1 }
0x1596   :  { %v9370_v9 = vadd.f32 %v9368_v60, %v9318_v49 }
0x1597   :  { %v9278_v2 = vpop.f32.mrf.mxu1 }
0x1599   :  { %v14563_v5 = vpop.f32.mrf.mxu1 }
0x159b   :  { %v9361_v62 = vpop.f32.mrf.mxu1 }
0x159c   :  { %v9372_v58 = vadd.f32 %v9370_v9, %v9361_v62 }
0x159d   :  { %v14574_v63 = vpop.f32.mrf.mxu1 }
0x159e   :  { %v9380_v1 = vadd.f32 %v13026_v41, %v9372_v58 }
0x159f   :  { %v9364_v3 = vpop.f32.mrf.mxu1 }
0x15a0   :  { %v9382_v15 = vadd.f32 %v9380_v1, %v16238_v52 }
0x15a1   :  { %v14575_v46 = vpop.f32.mrf.mxu1 }
0x15a2   :  { %v9386_v8 = vsel %vm501_vm1, %v9382_v15, 0.0 }
0x15a3   :  { %9387 = vadd.xlane.f32.xlu1 %v9386_v8 }
0x161c   :  { %v9385_v22 = vpop.xlane.xlu0 %9384 }
0x161d   :  { %v9389_v57 = vmul.f32 0.03125, %v9385_v22 }
0x161f   :  { %v9391_v4 = vsub.f32 %v9381_v56, %v9389_v57  ;;  %v15047_v57 = vld [vmem:[%s15742_s1 + $0x48] sm:$0xff]  }
0x1621   :  { %v9393_v6 = vmul.f32 %v9391_v4, %v9391_v4 }
0x1623   :  { %v9395_v7 = vsel %vm501_vm1, %v9393_v6, 0.0  ;;  %v15049_v6 = vld [vmem:[%s15742_s1 + $0x40] sm:$0xff]  }
0x1624   :  { %9396 = vadd.xlane.f32.xlu0 %v9395_v7  ;;  %v15050_v7 = vld [vmem:[%s15742_s1 + $0x60] sm:$0xff]  }
0x162c   :  { %v9388_v10 = vpop.xlane.xlu1 %9387 }
0x162d   :  { %v9390_v13 = vmul.f32 0.03125, %v9388_v10 }
0x162f   :  { %v9392_v20 = vsub.f32 %v9382_v15, %v9390_v13 }
0x1631   :  { %v9394_v19 = vmul.f32 %v9392_v20, %v9392_v20 }
0x1633   :  { %v9398_v52 = vsel %vm501_vm1, %v9394_v19, 0.0 }
0x1634   :  { %9399 = vadd.xlane.f32.xlu1 %v9398_v52 }
0x16ad   :  { %v9397_v14 = vpop.xlane.xlu0 %9396 }
0x16ae   :  { %v9401_v17 = vmul.f32 0.03125, %v9397_v14 }
0x16b0   :  { %v9403_v18 = vadd.f32 1e-05, %v9401_v17  ;;  %v13040_v17 = vld [vmem:[%s15770_s7 + $0x1] ss:$0 sm:$0xff] }
0x16b2   :  { %15189 = vrsqrt.f32 %v9403_v18 }
0x16bd   :  { %v9400_v21 = vpop.xlane.xlu1 %9399 }
0x16be   :  { %v9402_v23 = vmul.f32 0.03125, %v9400_v21 }
0x16bf   :  { %v15190_v26 = vpop.eup %15189 }
0x16c0   :  { %v9404_v24 = vadd.f32 1e-05, %v9402_v23  ;;  %v9407_v27 = vmul.f32 %v15190_v26, %v9391_v4  ;;  %v15048_v4 = vld [vmem:[%s15742_s1 + $0x68] sm:$0xff]   ;;  %v15051_v26 = vld [vmem:[%s15742_s1 + $0x58] sm:$0xff]  }
0x16c2   :  { %15191 = vrsqrt.f32 %v9404_v24  ;;  %v9415_v30 = vmul.f32 %v13027_v28, %v9407_v27 }
0x16c4   :  { %v9423_v33 = vadd.f32 %v13028_v31, %v9415_v30 }
0x16cf   :  { %v15192_v29 = vpop.eup %15191 }
0x16d0   :  { %v9408_v55 = vmul.f32 %v15192_v29, %v9392_v20  ;;  %v15052_v29 = vld [vmem:[%s15742_s1 + $0x50] sm:$0xff]  }
0x16d2   :  { %v9416_v32 = vmul.f32 %v13027_v28, %v9408_v55  ;;  %v15053_v55 = vld [vmem:[%s15742_s1 + $0x78] sm:$0xff]  }
0x16d4   :  { %v9424_v37 = vadd.f32 %v13028_v31, %v9416_v32  ;;  %v15054_v32 = vld [vmem:[%s15742_s1 + $0x70] sm:$0xff]  }
0x16d6   :  { %v9425_v34 = vpack.c.bf16 %v9424_v37, %v9423_v33 }
0x16d8   :  { %14581 = vmatmul.mubr.msk.bf16.vlgmr.msra.gmra.mxu0 %vm501_vm1, %v9425_v34  ;;  %v15057_v34 = vld [vmem:[%s15755_s10 + $0x68] sm:$0xff]  }
0x16d9   :  { %14600 = vmatprep.mubr.msk.bf16.mxu0 %vm15245_vm0, %v15243_v0  ;;  %14597 = vmatpush3.bf16.msra.mxu0 %v15047_v57 }
0x16da   :  { %14598 = vmatprep.subr.bf16.mxu0 %v15243_v0 }
0x16dd   :  { %14599 = vmatpush3.bf16.msra.mxu0 %v15049_v6 }
0x16de   :  { %14604 = vmatprep.subr.bf16.mxu0 %v15243_v0 }
0x1798   :  { %v9481_v40 = vpop.f32.mrf.mxu0 }
0x1799   :  { %v9482_v41 = vadd.f32 %v13029_v39, %v9481_v40  ;;  %v15062_v40 = vld [vmem:[%s15755_s10 + $0x70] sm:$0xff]  }
0x179a   :  { %v14582_v38 = vpop.f32.mrf.mxu0 }
0x179b   :  { %v9488_v42 = vmax.f32 %v9482_v41, 0.0  ;;  %v15063_v38 = vld [vmem:[%s15760_s19 + $0x48] sm:$0xff]   ;;  %v15064_v41 = vld [vmem:[%s15760_s19 + $0x40] sm:$0xff]  }
0x179c   :  { %v9484_v43 = vpop.f32.mrf.mxu0 }
0x179d   :  { %v9485_v45 = vadd.f32 %v13029_v39, %v9484_v43  ;;  %v15061_v39 = vld [vmem:[%s15755_s10 + $0x78] sm:$0xff]   ;;  %v15065_v43 = vld [vmem:[%s15760_s19 + $0x68] sm:$0xff]  }
0x179e   :  { %v14583_v49 = vpop.f32.mrf.mxu0 }
0x179f   :  { %v9489_v47 = vmax.f32 %v9485_v45, 0.0  ;;  %v15066_v45 = vld [vmem:[%s15760_s19 + $0x60] sm:$0xff]   ;;  %v15067_v49 = vld [vmem:[%s15760_s19 + $0x58] sm:$0xff]  }
0x17a1   :  { %v9490_v48 = vpack.c.bf16 %v9489_v47, %v9488_v42  ;;  %v15068_v42 = vld [vmem:[%s15760_s19 + $0x50] sm:$0xff]   ;;  %v15069_v47 = vld [vmem:[%s15760_s19 + $0x78] sm:$0xff]  }
0x17a3   :  { %14593 = vmatmul.mubr.msk.bf16.vlgmr.msra.gmra.mxu1 %vm3420_vm5, %v9490_v48  ;;  %v15070_v48 = vld [vmem:[%s15760_s19 + $0x70] sm:$0xff]  }
0x17a4   :  { %14616 = vmatprep.mubr.msk.bf16.mxu1 %vm15245_vm0, %v15243_v0  ;;  %14613 = vmatpush3.bf16.msra.mxu1 %v15048_v4 }
0x17a5   :  { %14614 = vmatprep.subr.bf16.mxu1 %v15243_v0 }
0x17a8   :  { %14615 = vmatpush3.bf16.msra.mxu1 %v15050_v7 }
0x17a9   :  { %14628 = vmatprep.subr.bf16.mxu1 %v15243_v0 }
0x1863   :  { %v9558_v53 = vpop.f32.mrf.mxu1 }
0x1864   :  { %v9559_v56 = vadd.f32 %v13033_v51, %v9558_v53 }
0x1865   :  { %v14594_v54 = vpop.f32.mrf.mxu1 }
0x1866   :  { %v9565_v44 = vadd.f32 %v9559_v56, %v9423_v33  ;;  %v15055_v33 = vld [vmem:[%s15755_s10 + $0x48] sm:$0xff]  }
0x1867   :  { %v9561_v16 = vpop.f32.mrf.mxu1 }
0x1868   :  { %v9562_v50 = vadd.f32 %v13033_v51, %v9561_v16  ;;  %v9567_v59 = vsel %vm501_vm1, %v9565_v44, 0.0 }
0x1869   :  { %9568 = vadd.xlane.f32.xlu0 %v9567_v59  ;;  %v14595_v60 = vpop.f32.mrf.mxu1 }
0x186a   :  { %v9566_v2 = vadd.f32 %v9562_v50, %v9424_v37  ;;  %v15056_v37 = vld [vmem:[%s15755_s10 + $0x40] sm:$0xff]  }
0x186c   :  { %v9570_v5 = vsel %vm501_vm1, %v9566_v2, 0.0 }
0x186d   :  { %9571 = vadd.xlane.f32.xlu1 %v9570_v5 }
0x18f2   :  { %v9569_v9 = vpop.xlane.xlu0 %9568 }
0x18f3   :  { %v9573_v62 = vmul.f32 0.03125, %v9569_v9 }
0x18f5   :  { %v9575_v58 = vsub.f32 %v9565_v44, %v9573_v62 }
0x18f6   :  { %v9572_v63 = vpop.xlane.xlu1 %9571 }
0x18f7   :  { %v9574_v1 = vmul.f32 0.03125, %v9572_v63  ;;  %v9577_v3 = vmul.f32 %v9575_v58, %v9575_v58 }
0x18f9   :  { %v9576_v15 = vsub.f32 %v9566_v2, %v9574_v1  ;;  %v9579_v46 = vsel %vm501_vm1, %v9577_v3, 0.0 }
0x18fa   :  { %9580 = vadd.xlane.f32.xlu0 %v9579_v46 }
0x18fb   :  { %v9578_v8 = vmul.f32 %v9576_v15, %v9576_v15 }
0x18fd   :  { %v9582_v22 = vsel %vm501_vm1, %v9578_v8, 0.0 }
0x18fe   :  { %9583 = vadd.xlane.f32.xlu1 %v9582_v22 }
0x1983   :  { %v9581_v10 = vpop.xlane.xlu0 %9580 }
0x1984   :  { %v9585_v13 = vmul.f32 0.03125, %v9581_v10 }
0x1986   :  { %v9587_v20 = vadd.f32 1e-05, %v9585_v13 }
0x1987   :  { %v9584_v19 = vpop.xlane.xlu1 %9583 }
0x1988   :  { %15193 = vrsqrt.f32 %v9587_v20  ;;  %v9586_v52 = vmul.f32 0.03125, %v9584_v19  ;;  %v13043_v20 = vld [vmem:[%s16991_s6 + $0x4] ss:$0 sm:$0xff] }
0x198a   :  { %v9588_v25 = vadd.f32 1e-05, %v9586_v52 }
0x198c   :  { %15195 = vrsqrt.f32 %v9588_v25 }
0x1995   :  { %v15194_v11 = vpop.eup %15193 }
0x1996   :  { %v9591_v14 = vmul.f32 %v15194_v11, %v9575_v58 }
0x1998   :  { %v9599_v18 = vmul.f32 %v13039_v12, %v9591_v14 }
0x1999   :  { %v15196_v21 = vpop.eup %15195 }
0x199a   :  { %v16583_v23 = vadd.f32 %v13040_v17, %v9599_v18  ;;  %v9592_v24 = vmul.f32 %v15196_v21, %v9576_v15  ;;  %v13065_v21 = vld [vmem:[%s15949_s20 + $0x6] ss:$0 sm:$0xff] }
0x199c   :  { %v16588_v27 = vpack.c.bf16 %v16583_v23, %v16583_v23  ;;  %v9600_v28 = vmul.f32 %v13039_v12, %v9592_v24 }
0x199e   :  { %14601 = vmatmul.mubr.msk.bf16.vlgmr.msra.gmra.mxu0 %vm501_vm1, %v16588_v27  ;;  %14617 = vmatmul.mubr.msk.bf16.vlgmr.msra.gmra.mxu1 %vm501_vm1, %v16588_v27  ;;  %v16595_v30 = vadd.f32 %v13040_v17, %v9600_v28 }
0x199f   :  { %14605 = vmatpush3.bf16.msra.mxu0 %v15051_v26  ;;  %14629 = vmatpush3.bf16.msra.mxu1 %v15047_v57 }
0x19a0   :  { %14606 = vmatprep.subr.bf16.mxu0 %v15243_v0  ;;  %14630 = vmatprep.subr.bf16.mxu1 %v15243_v0  ;;  %v16606_v31 = vpack.c.bf16 %v16595_v30, %v16595_v30 }
0x19a1   :  { %14608 = vmatprep.mubr.msk.bf16.mxu0 %vm15245_vm0, %v15243_v0  ;;  %14632 = vmatprep.mubr.msk.bf16.mxu1 %vm15245_vm0, %v15243_v0 }
0x19a3   :  { %14607 = vmatpush3.bf16.msra.mxu0 %v15052_v29  ;;  %14631 = vmatpush3.bf16.msra.mxu1 %v15049_v6 }
0x19a4   :  { %14620 = vmatprep.subr.bf16.mxu0 %v15243_v0  ;;  %14644 = vmatprep.subr.bf16.mxu1 %v15243_v0 }
0x19a6   :  { %14609 = vmatmul.mubr.msk.bf16.vlgmr.msra.gmra.mxu0 %vm501_vm1, %v16588_v27  ;;  %14633 = vmatmul.mubr.msk.bf16.vlgmr.msra.gmra.mxu1 %vm501_vm1, %v16606_v31 }
0x19a7   :  { %14621 = vmatpush3.bf16.msra.mxu0 %v15053_v55  ;;  %14645 = vmatpush3.bf16.msra.mxu1 %v15048_v4 }
0x19a8   :  { %14622 = vmatprep.subr.bf16.mxu0 %v15243_v0  ;;  %14646 = vmatprep.subr.bf16.mxu1 %v15243_v0 }
0x19a9   :  { %14624 = vmatprep.mubr.msk.bf16.mxu0 %vm15245_vm0, %v15243_v0  ;;  %14648 = vmatprep.mubr.msk.bf16.mxu1 %vm15245_vm0, %v15243_v0 }
0x19ab   :  { %14623 = vmatpush3.bf16.msra.mxu0 %v15054_v32  ;;  %14647 = vmatpush3.bf16.msra.mxu1 %v15050_v7  ;;  %v13063_v7 = vld [vmem:[%s15949_s20 + $0x4] ss:$0 sm:$0xff] }
0x19ac   :  { %14636 = vmatprep.subr.bf16.mxu0 %v15243_v0  ;;  %14660 = vmatprep.subr.bf16.mxu1 %v15243_v0 }
0x19ae   :  { %14625 = vmatmul.mubr.msk.bf16.vlgmr.msra.gmra.mxu0 %vm501_vm1, %v16588_v27  ;;  %14649 = vmatmul.mubr.msk.bf16.vlgmr.msra.gmra.mxu1 %vm501_vm1, %v16606_v31 }
0x19af   :  { %14637 = vmatpush3.bf16.msra.mxu0 %v15051_v26  ;;  %14661 = vmatpush3.bf16.msra.mxu1 %v15055_v33 }
0x19b0   :  { %14638 = vmatprep.subr.bf16.mxu0 %v15243_v0  ;;  %14662 = vmatprep.subr.bf16.mxu1 %v15243_v0 }
0x19b1   :  { %14640 = vmatprep.mubr.msk.bf16.mxu0 %vm15245_vm0, %v15243_v0  ;;  %14664 = vmatprep.mubr.msk.bf16.mxu1 %vm15245_vm0, %v15243_v0 }
0x19b3   :  { %14639 = vmatpush3.bf16.msra.mxu0 %v15052_v29  ;;  %14663 = vmatpush3.bf16.msra.mxu1 %v15056_v37 }
0x19b4   :  { %14652 = vmatprep.subr.bf16.mxu0 %v15243_v0  ;;  %14676 = vmatprep.subr.bf16.mxu1 %v15243_v0 }
0x19b6   :  { %14641 = vmatmul.mubr.msk.bf16.vlgmr.msra.gmra.mxu0 %vm501_vm1, %v16606_v31  ;;  %14665 = vmatmul.mubr.msk.bf16.vlgmr.msra.gmra.mxu1 %vm501_vm1, %v16588_v27 }
0x19b7   :  { %14653 = vmatpush3.bf16.msra.mxu0 %v15053_v55  ;;  %14677 = vmatpush3.bf16.msra.mxu1 %v15057_v34 }
0x19b8   :  { %14654 = vmatprep.subr.bf16.mxu0 %v15243_v0  ;;  %14678 = vmatprep.subr.bf16.mxu1 %v15243_v0 }
0x19b9   :  { %14656 = vmatprep.mubr.msk.bf16.mxu0 %vm15245_vm0, %v15243_v0  ;;  %14680 = vmatprep.mubr.msk.bf16.mxu1 %vm15245_vm0, %v15243_v0 }
0x19bb   :  { %14655 = vmatpush3.bf16.msra.mxu0 %v15054_v32  ;;  %14679 = vmatpush3.bf16.msra.mxu1 %v15058_v61 }
0x19bc   :  { %14668 = vmatprep.subr.bf16.mxu0 %v15243_v0  ;;  %14692 = vmatprep.subr.bf16.mxu1 %v15243_v0 }
0x19be   :  { %14657 = vmatmul.mubr.msk.bf16.vlgmr.msra.gmra.mxu0 %vm501_vm1, %v16606_v31  ;;  %14681 = vmatmul.mubr.msk.bf16.vlgmr.msra.gmra.mxu1 %vm501_vm1, %v16588_v27 }
0x19bf   :  { %14669 = vmatpush3.bf16.msra.mxu0 %v15059_v35  ;;  %14693 = vmatpush3.bf16.msra.mxu1 %v15055_v33 }
0x19c0   :  { %14670 = vmatprep.subr.bf16.mxu0 %v15243_v0  ;;  %14694 = vmatprep.subr.bf16.mxu1 %v15243_v0 }
0x19c1   :  { %14672 = vmatprep.mubr.msk.bf16.mxu0 %vm15245_vm0, %v15243_v0  ;;  %14696 = vmatprep.mubr.msk.bf16.mxu1 %vm15245_vm0, %v15243_v0 }
0x19c3   :  { %14671 = vmatpush3.bf16.msra.mxu0 %v15060_v36  ;;  %14695 = vmatpush3.bf16.msra.mxu1 %v15056_v37 }
0x19c4   :  { %14684 = vmatprep.subr.bf16.mxu0 %v15243_v0  ;;  %14708 = vmatprep.subr.bf16.mxu1 %v15243_v0 }
0x19c6   :  { %14673 = vmatmul.mubr.msk.bf16.vlgmr.msra.gmra.mxu0 %vm501_vm1, %v16588_v27  ;;  %14697 = vmatmul.mubr.msk.bf16.vlgmr.msra.gmra.mxu1 %vm501_vm1, %v16606_v31 }
0x19c7   :  { %14685 = vmatpush3.bf16.msra.mxu0 %v15061_v39  ;;  %14709 = vmatpush3.bf16.msra.mxu1 %v15057_v34 }
0x19c8   :  { %14686 = vmatprep.subr.bf16.mxu0 %v15243_v0  ;;  %14710 = vmatprep.subr.bf16.mxu1 %v15243_v0 }
0x19c9   :  { %14688 = vmatprep.mubr.msk.bf16.mxu0 %vm15245_vm0, %v15243_v0  ;;  %14712 = vmatprep.mubr.msk.bf16.mxu1 %vm15245_vm0, %v15243_v0 }
0x19cb   :  { %14687 = vmatpush3.bf16.msra.mxu0 %v15062_v40  ;;  %14711 = vmatpush3.bf16.msra.mxu1 %v15058_v61  ;;  %v13064_v61 = vld [vmem:[%s15949_s20 + $0x5] ss:$0 sm:$0xff] }
0x19cc   :  { %14700 = vmatprep.subr.bf16.mxu0 %v15243_v0  ;;  %14724 = vmatprep.subr.bf16.mxu1 %v15243_v0 }
0x19ce   :  { %14689 = vmatmul.mubr.msk.bf16.vlgmr.msra.gmra.mxu0 %vm501_vm1, %v16588_v27  ;;  %14713 = vmatmul.mubr.msk.bf16.vlgmr.msra.gmra.mxu1 %vm501_vm1, %v16606_v31 }
0x19cf   :  { %14701 = vmatpush3.bf16.msra.mxu0 %v15059_v35  ;;  %14725 = vmatpush3.bf16.msra.mxu1 %v15063_v38 }
0x19d0   :  { %14702 = vmatprep.subr.bf16.mxu0 %v15243_v0  ;;  %14726 = vmatprep.subr.bf16.mxu1 %v15243_v0 }
0x19d1   :  { %14704 = vmatprep.mubr.msk.bf16.mxu0 %vm15245_vm0, %v15243_v0  ;;  %14728 = vmatprep.mubr.msk.bf16.mxu1 %vm15245_vm0, %v15243_v0 }
0x19d3   :  { %14703 = vmatpush3.bf16.msra.mxu0 %v15060_v36  ;;  %14727 = vmatpush3.bf16.msra.mxu1 %v15064_v41 }
0x19d4   :  { %14716 = vmatprep.subr.bf16.mxu0 %v15243_v0  ;;  %14740 = vmatprep.subr.bf16.mxu1 %v15243_v0 }
0x19d6   :  { %14705 = vmatmul.mubr.msk.bf16.vlgmr.msra.gmra.mxu0 %vm501_vm1, %v16606_v31  ;;  %14729 = vmatmul.mubr.msk.bf16.vlgmr.msra.gmra.mxu1 %vm501_vm1, %v16588_v27 }
0x19d7   :  { %14717 = vmatpush3.bf16.msra.mxu0 %v15061_v39  ;;  %14741 = vmatpush3.bf16.msra.mxu1 %v15065_v43  ;;  %v13044_v39 = vld [vmem:[%s16991_s6 + $0x5] ss:$0 sm:$0xff] }
0x19d8   :  { %14718 = vmatprep.subr.bf16.mxu0 %v15243_v0  ;;  %14742 = vmatprep.subr.bf16.mxu1 %v15243_v0 }
0x19d9   :  { %14720 = vmatprep.mubr.msk.bf16.mxu0 %vm15245_vm0, %v15243_v0  ;;  %14744 = vmatprep.mubr.msk.bf16.mxu1 %vm15245_vm0, %v15243_v0 }
0x19db   :  { %14719 = vmatpush3.bf16.msra.mxu0 %v15062_v40  ;;  %14743 = vmatpush3.bf16.msra.mxu1 %v15066_v45 }
0x19dc   :  { %14732 = vmatprep.subr.bf16.mxu0 %v15243_v0  ;;  %14756 = vmatprep.subr.bf16.mxu1 %v15243_v0 }
0x19de   :  { %14721 = vmatmul.mubr.msk.bf16.vlgmr.msra.gmra.mxu0 %vm501_vm1, %v16606_v31  ;;  %14745 = vmatmul.mubr.msk.bf16.vlgmr.msra.gmra.mxu1 %vm501_vm1, %v16588_v27 }
0x19df   :  { %14733 = vmatpush3.bf16.msra.mxu0 %v15067_v49  ;;  %14757 = vmatpush3.bf16.msra.mxu1 %v15063_v38 }
0x19e0   :  { %14734 = vmatprep.subr.bf16.mxu0 %v15243_v0  ;;  %14758 = vmatprep.subr.bf16.mxu1 %v15243_v0 }
0x19e1   :  { %14736 = vmatprep.mubr.msk.bf16.mxu0 %vm15245_vm0, %v15243_v0  ;;  %14760 = vmatprep.mubr.msk.bf16.mxu1 %vm15245_vm0, %v15243_v0 }
0x19e3   :  { %14735 = vmatpush3.bf16.msra.mxu0 %v15068_v42  ;;  %14759 = vmatpush3.bf16.msra.mxu1 %v15064_v41 }
0x19e4   :  { %14748 = vmatprep.subr.bf16.mxu0 %v15243_v0  ;;  %14772 = vmatprep.subr.bf16.mxu1 %v15243_v0 }
0x19e6   :  { %14737 = vmatmul.mubr.msk.bf16.vlgmr.msra.gmra.mxu0 %vm501_vm1, %v16588_v27  ;;  %14761 = vmatmul.mubr.msk.bf16.vlgmr.msra.gmra.mxu1 %vm501_vm1, %v16606_v31 }
0x19e7   :  { %14749 = vmatpush3.bf16.msra.mxu0 %v15069_v47  ;;  %14773 = vmatpush3.bf16.msra.mxu1 %v15065_v43 }
0x19e8   :  { %14750 = vmatprep.subr.bf16.mxu0 %v15243_v0  ;;  %14774 = vmatprep.subr.bf16.mxu1 %v15243_v0 }
0x19e9   :  { %14752 = vmatprep.mubr.msk.bf16.mxu0 %vm15245_vm0, %v15243_v0  ;;  %14776 = vmatprep.mubr.msk.bf16.mxu1 %vm15245_vm0, %v15243_v0 }
0x19eb   :  { %14751 = vmatpush3.bf16.msra.mxu0 %v15070_v48  ;;  %14775 = vmatpush3.bf16.msra.mxu1 %v15066_v45 }
0x19ec   :  { %14764 = vmatprep.subr.bf16.mxu0 %v15243_v0  ;;  %14788 = vmatprep.subr.mxu1 %v15243_v0 }
0x19ee   :  { %14753 = vmatmul.mubr.msk.bf16.vlgmr.msra.gmra.mxu0 %vm501_vm1, %v16588_v27  ;;  %14777 = vmatmul.mubr.msk.bf16.vlgmr.msra.gmra.mxu1 %vm501_vm1, %v16606_v31  ;;  %v13045_v27 = vld [vmem:[%s16991_s6 + $0x6] ss:$0 sm:$0xff] }
0x19ef   :  { %14765 = vmatpush3.bf16.msra.mxu0 %v15067_v49  ;;  %14768 = vmatprep.mubr.msk.bf16.mxu0 %vm15245_vm0, %v15243_v0 }
0x19f0   :  { %14766 = vmatprep.subr.bf16.mxu0 %v15243_v0  ;;  %14790 = vmatprep.mubr.msk.f32.mxu1 %vm15245_vm0, %v15243_v0 }
0x19f3   :  { %14767 = vmatpush3.bf16.msra.mxu0 %v15068_v42 }
0x19f4   :  { %14780 = vmatprep.subr.bf16.mxu0 %v15243_v0 }
0x19f6   :  { %14769 = vmatmul.mubr.msk.bf16.vlgmr.msra.gmra.mxu0 %vm501_vm1, %v16606_v31 }
0x19f7   :  { %14781 = vmatpush3.bf16.msra.mxu0 %v15069_v47  ;;  %14784 = vmatprep.mubr.msk.bf16.mxu0 %vm15245_vm0, %v15243_v0 }
0x19f8   :  { %14782 = vmatprep.subr.bf16.mxu0 %v15243_v0 }
0x19fb   :  { %14783 = vmatpush3.bf16.msra.mxu0 %v15070_v48 }
0x19fc   :  { %14798 = vmatprep.subr.mxu0 %v15243_v0 }
0x19fe   :  { %14785 = vmatmul.mubr.msk.bf16.vlgmr.msra.gmra.mxu0 %vm501_vm1, %v16606_v31 }
0x19ff   :  { %14800 = vmatprep.mubr.msk.f32.mxu0 %vm15245_vm0, %v15243_v0 }
0x1a5e   :  { %v9688_v51 = vpop.f32.mrf.mxu0  ;;  %v9792_v53 = vpop.f32.mrf.mxu1 }
0x1a5f   :  { %v9689_v11 = vadd.f32 %v13043_v20, %v9688_v51  ;;  %v9793_v31 = vadd.f32 %v13045_v27, %v9792_v53  ;;  %v13066_v53 = vld [vmem:[%s15949_s20 + $0x7] ss:$0 sm:$0xff] }
0x1a60   :  { %v14602_v56 = vpop.f32.mrf.mxu0  ;;  %v14618_v54 = vpop.f32.mrf.mxu1 }
0x1a62   :  { %v9691_v44 = vpop.f32.mrf.mxu0  ;;  %v9795_v16 = vpop.f32.mrf.mxu1 }
0x1a63   :  { %v13046_v44 = vld [vmem:[%s16991_s6 + $0x7] ss:$0 sm:$0xff] }
0x1a64   :  { %v14603_v50 = vpop.f32.mrf.mxu0  ;;  %v14619_v59 = vpop.f32.mrf.mxu1 }
0x1a66   :  { %v9740_v60 = vpop.f32.mrf.mxu0  ;;  %v9887_v2 = vpop.f32.mrf.mxu1 }
0x1a67   :  { %v9741_v45 = vadd.f32 %v13044_v39, %v9740_v60  ;;  %v9888_v49 = vadd.f32 %v13043_v20, %v9887_v2 }
0x1a68   :  { %v14610_v5 = vpop.f32.mrf.mxu0  ;;  %v14634_v9 = vpop.f32.mrf.mxu1 }
0x1a6a   :  { %v9743_v62 = vpop.f32.mrf.mxu0  ;;  %v9890_v58 = vpop.f32.mrf.mxu1 }
0x1a6c   :  { %v14611_v63 = vpop.f32.mrf.mxu0  ;;  %v14635_v1 = vpop.f32.mrf.mxu1 }
0x1a6d   :  { %v13083_v1 = vld [vmem:[%s16992_s13 + $0x4] ss:$0 sm:$0xff] }
0x1a6e   :  { %v16755_v3 = vpop.f32.mrf.mxu0  ;;  %v16757_v15 = vpop.f32.mrf.mxu1 }
0x1a6f   :  { %v9845_v2 = vadd.f32 %v13046_v44, %v16755_v3  ;;  %v9968_v5 = vadd.f32 %v13045_v27, %v16757_v15 }
0x1a70   :  { %v14626_v46 = vpop.f32.mrf.mxu0  ;;  %v14650_v8 = vpop.f32.mrf.mxu1 }
0x1a72   :  { %v9847_v22 = vpop.f32.mrf.mxu0  ;;  %v9970_v57 = vpop.f32.mrf.mxu1 }
0x1a74   :  { %v14627_v4 = vpop.f32.mrf.mxu0  ;;  %v14651_v6 = vpop.f32.mrf.mxu1 }
0x1a76   :  { %v16760_v10 = vpop.f32.mrf.mxu0  ;;  %v10083_v13 = vpop.f32.mrf.mxu1 }
0x1a77   :  { %v10084_v19 = vadd.f32 %v13063_v7, %v10083_v13  ;;  %v9928_v4 = vadd.f32 %v13044_v39, %v16760_v10 }
0x1a78   :  { %v14642_v52 = vpop.f32.mrf.mxu0  ;;  %v14666_v25 = vpop.f32.mrf.mxu1 }
0x1a79   :  { %14789 = vmatpush3.xpose.msk.msra.mxu1 %vm1619_vm3, %v10084_v19 }
0x1a7a   :  { %v9930_v12 = vpop.f32.mrf.mxu0  ;;  %v10086_v14 = vpop.f32.mrf.mxu1  ;;  %14793 = vmatprep.subr.mxu1 %v15243_v0 }
0x1a7c   :  { %v14643_v17 = vpop.f32.mrf.mxu0  ;;  %v14667_v18 = vpop.f32.mrf.mxu1  ;;  %14791 = vmatmul.mubr.msk.f32.vlgmr.msra.gmra.mxu1 %vm1619_vm3, %v9689_v11 }
0x1a7d   :  { %14795 = vmatprep.mubr.msk.f32.mxu1 %vm15245_vm0, %v15243_v0 }
0x1a7e   :  { %v16769_v24 = vpop.f32.mrf.mxu0  ;;  %v10187_v26 = vpop.f32.mrf.mxu1 }
0x1a7f   :  { %v10188_v28 = vadd.f32 %v13065_v21, %v10187_v26  ;;  %v10008_v12 = vadd.f32 %v13046_v44, %v16769_v24  ;;  %v13084_v26 = vld [vmem:[%s16992_s13 + $0x5] ss:$0 sm:$0xff] }
0x1a80   :  { %v14658_v29 = vpop.f32.mrf.mxu0  ;;  %v14682_v55 = vpop.f32.mrf.mxu1 }
0x1a81   :  { %14799 = vmatpush3.xpose.msk.msra.mxu0 %vm1619_vm3, %v10188_v28 }
0x1a82   :  { %v10010_v32 = vpop.f32.mrf.mxu0  ;;  %v10190_v33 = vpop.f32.mrf.mxu1  ;;  %14808 = vmatprep.subr.mxu0 %v15243_v0 }
0x1a84   :  { %v14659_v37 = vpop.f32.mrf.mxu0  ;;  %v14683_v34 = vpop.f32.mrf.mxu1  ;;  %14801 = vmatmul.mubr.msk.f32.vlgmr.msra.gmra.mxu0 %vm1619_vm3, %v9793_v31 }
0x1a85   :  { %14810 = vmatprep.mubr.msk.f32.mxu0 %vm15245_vm0, %v15243_v0 }
0x1a86   :  { %v10135_v35 = vpop.f32.mrf.mxu0  ;;  %v10279_v36 = vpop.f32.mrf.mxu1 }
0x1a87   :  { %v10136_v40 = vadd.f32 %v13064_v61, %v10135_v35  ;;  %v10280_v38 = vadd.f32 %v13063_v7, %v10279_v36 }
0x1a88   :  { %v14674_v41 = vpop.f32.mrf.mxu0  ;;  %v14698_v43 = vpop.f32.mrf.mxu1 }
0x1a89   :  { %14794 = vmatpush3.xpose.msk.msra.mxu1 %vm1619_vm3, %v10136_v40  ;;  %14809 = vmatpush3.xpose.msk.msra.mxu0 %vm1619_vm3, %v10280_v38 }
0x1a8a   :  { %v10138_v42 = vpop.f32.mrf.mxu0  ;;  %v10282_v47 = vpop.f32.mrf.mxu1  ;;  %14803 = vmatprep.subr.mxu1 %v15243_v0  ;;  %14818 = vmatprep.subr.mxu0 %v15243_v0 }
0x1a8c   :  { %v14675_v48 = vpop.f32.mrf.mxu0  ;;  %v14699_v51 = vpop.f32.mrf.mxu1  ;;  %14796 = vmatmul.mubr.msk.f32.vlgmr.msra.gmra.mxu1 %vm1619_vm3, %v9741_v45  ;;  %14811 = vmatmul.mubr.msk.f32.vlgmr.msra.gmra.mxu0 %vm1619_vm3, %v9888_v49 }
0x1a8d   :  { %14805 = vmatprep.mubr.msk.f32.mxu1 %vm15245_vm0, %v15243_v0  ;;  %14820 = vmatprep.mubr.msk.f32.mxu0 %vm15245_vm0, %v15243_v0 }
0x1a8e   :  { %v10239_v56 = vpop.f32.mrf.mxu0  ;;  %v10359_v54 = vpop.f32.mrf.mxu1 }
0x1a8f   :  { %v10240_v16 = vadd.f32 %v13066_v53, %v10239_v56  ;;  %v10360_v50 = vadd.f32 %v13065_v21, %v10359_v54 }
0x1a90   :  { %v14690_v59 = vpop.f32.mrf.mxu0  ;;  %v14714_v60 = vpop.f32.mrf.mxu1 }
0x1a91   :  { %14804 = vmatpush3.xpose.msk.msra.mxu1 %vm1619_vm3, %v10240_v16  ;;  %14819 = vmatpush3.xpose.msk.msra.mxu0 %vm1619_vm3, %v10360_v50 }
0x1a92   :  { %v10242_v9 = vpop.f32.mrf.mxu0  ;;  %v10362_v62 = vpop.f32.mrf.mxu1  ;;  %14813 = vmatprep.subr.mxu1 %v15243_v0  ;;  %14828 = vmatprep.subr.mxu0 %v15243_v0 }
0x1a94   :  { %v14691_v58 = vpop.f32.mrf.mxu0  ;;  %v14715_v63 = vpop.f32.mrf.mxu1  ;;  %14806 = vmatmul.mubr.msk.f32.vlgmr.msra.gmra.mxu1 %vm1619_vm3, %v9845_v2  ;;  %14821 = vmatmul.mubr.msk.f32.vlgmr.msra.gmra.mxu0 %vm1619_vm3, %v9968_v5 }
0x1a95   :  { %14815 = vmatprep.mubr.msk.f32.mxu1 %vm15245_vm0, %v15243_v0  ;;  %14830 = vmatprep.mubr.msk.f32.mxu0 %vm15245_vm0, %v15243_v0 }
0x1a96   :  { %v10319_v3 = vpop.f32.mrf.mxu0  ;;  %v10475_v15 = vpop.f32.mrf.mxu1 }
0x1a97   :  { %v10320_v46 = vadd.f32 %v13064_v61, %v10319_v3  ;;  %v10476_v8 = vadd.f32 %v13083_v1, %v10475_v15 }
0x1a98   :  { %v14706_v22 = vpop.f32.mrf.mxu0  ;;  %v14730_v57 = vpop.f32.mrf.mxu1 }
0x1a99   :  { %14814 = vmatpush3.xpose.msk.msra.mxu1 %vm1619_vm3, %v10320_v46  ;;  %14829 = vmatpush3.msra.mxu0 %v10476_v8 }
0x1a9a   :  { %v10322_v6 = vpop.f32.mrf.mxu0  ;;  %v10478_v7 = vpop.f32.mrf.mxu1  ;;  %14823 = vmatprep.subr.mxu1 %v15243_v0  ;;  %14838 = vmatprep.subr.mxu0 %v15243_v0 }
0x1a9c   :  { %v14707_v13 = vpop.f32.mrf.mxu0  ;;  %v14731_v20 = vpop.f32.mrf.mxu1  ;;  %14816 = vmatmul.mubr.msk.f32.vlgmr.msra.gmra.mxu1 %vm1619_vm3, %v9928_v4 }
0x1a9d   :  { %14825 = vmatprep.mubr.msk.f32.mxu1 %vm15245_vm0, %v15243_v0 }
0x1a9e   :  { %v10399_v19 = vpop.f32.mrf.mxu0  ;;  %v16811_v52 = vpop.f32.mrf.mxu1 }
0x1a9f   :  { %v10400_v25 = vadd.f32 %v13066_v53, %v10399_v19 }
0x1aa0   :  { %v14722_v11 = vpop.f32.mrf.mxu0  ;;  %v14746_v10 = vpop.f32.mrf.mxu1 }
0x1aa1   :  { %14824 = vmatpush3.xpose.msk.msra.mxu1 %vm1619_vm3, %v10400_v25 }
0x1aa2   :  { %v10402_v14 = vpop.f32.mrf.mxu0  ;;  %v10582_v17 = vpop.f32.mrf.mxu1  ;;  %14833 = vmatprep.subr.mxu1 %v15243_v0 }
0x1aa4   :  { %v14723_v18 = vpop.f32.mrf.mxu0  ;;  %v14747_v21 = vpop.f32.mrf.mxu1  ;;  %14826 = vmatmul.mubr.msk.f32.vlgmr.msra.gmra.mxu1 %vm1619_vm3, %v10008_v12 }
0x1aa5   :  { %14835 = vmatprep.mubr.msk.f32.mxu1 %vm15245_vm0, %v15243_v0 }
0x1aa6   :  { %v10527_v27 = vpop.f32.mrf.mxu0  ;;  %v10671_v28 = vpop.f32.mrf.mxu1 }
0x1aa7   :  { %v10528_v29 = vadd.f32 %v13084_v26, %v10527_v27  ;;  %v16820_v55 = vadd.f32 %v13083_v1, %v10671_v28 }
0x1aa8   :  { %v14738_v31 = vpop.f32.mrf.mxu0  ;;  %v14762_v32 = vpop.f32.mrf.mxu1 }
0x1aa9   :  { %14834 = vmatpush3.msra.mxu1 %v10528_v29 }
0x1aaa   :  { %v10530_v24 = vpop.f32.mrf.mxu0  ;;  %v10674_v33 = vpop.f32.mrf.mxu1  ;;  %14843 = vmatprep.subr.mxu1 %v15243_v0 }
0x1aac   :  { %v14739_v37 = vpop.f32.mrf.mxu0  ;;  %v14763_v34 = vpop.f32.mrf.mxu1 }
0x1aae   :  { %v16823_v61 = vpop.f32.mrf.mxu0  ;;  %v16825_v35 = vpop.f32.mrf.mxu1 }
0x1ab0   :  { %v14754_v36 = vpop.f32.mrf.mxu0  ;;  %v14778_v39 = vpop.f32.mrf.mxu1 }
0x1ab2   :  { %v10634_v40 = vpop.f32.mrf.mxu0  ;;  %v10754_v38 = vpop.f32.mrf.mxu1 }
0x1ab4   :  { %v14755_v41 = vpop.f32.mrf.mxu0  ;;  %v14779_v43 = vpop.f32.mrf.mxu1 }
0x1ab6   :  { %v10711_v45 = vpop.f32.mrf.mxu0 }
0x1ab7   :  { %v16827_v49 = vadd.f32 %v13084_v26, %v10711_v45 }
0x1ab8   :  { %v14770_v42 = vpop.f32.mrf.mxu0 }
0x1aba   :  { %v10714_v47 = vpop.f32.mrf.mxu0 }
0x1abc   :  { %v14771_v48 = vpop.f32.mrf.mxu0 }
0x1abe   :  { %v16829_v51 = vpop.f32.mrf.mxu0 }
0x1ac0   :  { %v14786_v53 = vpop.f32.mrf.mxu0 }
0x1ac2   :  { %v10794_v56 = vpop.f32.mrf.mxu0 }
0x1ac4   :  { %v14787_v54 = vpop.f32.mrf.mxu0 }
0x1b3c   :  { %v10869_v44 = vpop.f32.mrf.mxu1 }
0x1b3d   :  { %v11405_v16 = vsel %vm1619_vm3, %v10869_v44, -inf }
0x1b3e   :  { %11406 = vmax.xlane.f32.xlu0 %v11405_v16  ;;  %v14792_v50 = vpop.f32.mrf.mxu1 }
0x1b44   :  { %v11021_v59 = vpop.f32.mrf.mxu0 }
0x1b45   :  { %v11411_v60 = vsel %vm1619_vm3, %v11021_v59, -inf }
0x1b46   :  { %11412 = vmax.xlane.f32.xlu0 %v11411_v60  ;;  %v14802_v2 = vpop.f32.mrf.mxu0 }
0x1b4c   :  { %v10945_v5 = vpop.f32.mrf.mxu1  ;;  %v11173_v9 = vpop.f32.mrf.mxu0 }
0x1b4d   :  { %v11408_v62 = vsel %vm1619_vm3, %v10945_v5, -inf  ;;  %v11417_v58 = vsel %vm1619_vm3, %v11173_v9, -inf }
0x1b4e   :  { %11409 = vmax.xlane.f32.xlu1 %v11408_v62  ;;  %v14797_v63 = vpop.f32.mrf.mxu1  ;;  %11418 = vmax.xlane.f32.xlu0 %v11417_v58  ;;  %v14812_v1 = vpop.f32.mrf.mxu0 }
0x1b4f   :  { %v13085_v1 = vld [vmem:[%s16992_s13 + $0x6] ss:$0 sm:$0xff] }
0x1b54   :  { %v11097_v3 = vpop.f32.mrf.mxu1  ;;  %v11325_v15 = vpop.f32.mrf.mxu0 }
0x1b55   :  { %v11414_v46 = vsel %vm1619_vm3, %v11097_v3, -inf  ;;  %v11423_v8 = vsel %vm1619_vm3, %v11325_v15, -inf }
0x1b56   :  { %11415 = vmax.xlane.f32.xlu1 %v11414_v46  ;;  %v14807_v22 = vpop.f32.mrf.mxu1  ;;  %11424 = vmax.xlane.f32.xlu0 %v11423_v8  ;;  %v14822_v57 = vpop.f32.mrf.mxu0  ;;  %v10580_v46 = vadd.f32 %v13085_v1, %v16811_v52  ;;  %v13086_v52 = vld [vmem:[%s16992_s13 + $0x7] ss:$0 sm:$0xff] }
0x1b5c   :  { %v11249_v4 = vpop.f32.mrf.mxu1 }
0x1b5d   :  { %v11420_v6 = vsel %vm1619_vm3, %v11249_v4, -inf }
0x1b5e   :  { %11421 = vmax.xlane.f32.xlu1 %v11420_v6  ;;  %v14817_v7 = vpop.f32.mrf.mxu1 }
0x1b64   :  { %v11401_v13 = vpop.f32.mrf.mxu1 }
0x1b65   :  { %v11426_v20 = vsel %vm1619_vm3, %v11401_v13, -inf }
0x1b66   :  { %11427 = vmax.xlane.f32.xlu1 %v11426_v20  ;;  %v14827_v19 = vpop.f32.mrf.mxu1 }
0x1bc7   :  { %v11407_v25 = vpop.xlane.xlu0 %11406 }
0x1bc8   :  { %v11429_v11 = vsub.f32 %v10869_v44, %v11407_v25  ;;  %v10632_v25 = vadd.f32 %v13086_v52, %v16823_v61 }
0x1bca   :  { %v11437_v10 = vmul.f32 1.442695, %v11429_v11 }
0x1bcc   :  { %15197 = vpow2.f32 %v11437_v10 }
0x1bcf   :  { %v11413_v12 = vpop.xlane.xlu0 %11412 }
0x1bd0   :  { %v11431_v14 = vsub.f32 %v11021_v59, %v11413_v12  ;;  %v10752_v12 = vadd.f32 %v13085_v1, %v16825_v35 }
0x1bd2   :  { %v11441_v17 = vmul.f32 1.442695, %v11431_v14 }
0x1bd4   :  { %15199 = vpow2.f32 %v11441_v17 }
0x1bd7   :  { %v11410_v18 = vpop.xlane.xlu1 %11409  ;;  %v11419_v21 = vpop.xlane.xlu0 %11418 }
0x1bd8   :  { %v11430_v26 = vsub.f32 %v10945_v5, %v11410_v18  ;;  %v11433_v27 = vsub.f32 %v11173_v9, %v11419_v21 }
0x1bd9   :  { %v15198_v28 = vpop.eup %15197 }
0x1bda   :  { %v11439_v29 = vmul.f32 1.442695, %v11430_v26  ;;  %v11445_v31 = vmul.f32 1.442695, %v11433_v27  ;;  %v11453_v32 = vsel %vm1619_vm3, %v15198_v28, 0.0  ;;  %v10792_v26 = vadd.f32 %v13086_v52, %v16829_v51 }
0x1bdb   :  { %11454 = vadd.xlane.f32.xlu0 %v11453_v32  ;;  %v381_v32 = vld [vmem:[%s16993_s21 + $0x18] sm:$0xf] }
0x1bdc   :  { %15201 = vpow2.f32 %v11439_v29  ;;  %v380_v29 = vld [vmem:[%s16993_s21 + $0x14] sm:$0xf] }
0x1bdd   :  { %15203 = vpow2.f32 %v11445_v31  ;;  %v12135_v31 = vsel %vm2911_vm4, %v380_v29, 0 }
0x1bdf   :  { %v11416_v24 = vpop.xlane.xlu1 %11415  ;;  %v11425_v33 = vpop.xlane.xlu0 %11424 }
0x1be0   :  { %v11432_v37 = vsub.f32 %v11097_v3, %v11416_v24  ;;  %v11435_v34 = vsub.f32 %v11325_v15, %v11425_v33 }
0x1be1   :  { %v15200_v36 = vpop.eup %15199 }
0x1be2   :  { %v11443_v39 = vmul.f32 1.442695, %v11432_v37  ;;  %v11449_v40 = vmul.f32 1.442695, %v11435_v34  ;;  %v11459_v38 = vsel %vm1619_vm3, %v15200_v36, 0.0  ;;  %v12181_v37 = vsel %vm2911_vm4, %v381_v32, 0 }
0x1be3   :  { %11460 = vadd.xlane.f32.xlu0 %v11459_v38  ;;  %v382_v38 = vld [vmem:[%s16993_s21 + $0x1c] sm:$0xf] }
0x1be4   :  { %15205 = vpow2.f32 %v11443_v39 }
0x1be5   :  { %15207 = vpow2.f32 %v11449_v40 }
0x1be7   :  { %v11422_v41 = vpop.xlane.xlu1 %11421 }
0x1be8   :  { %v11434_v43 = vsub.f32 %v11249_v4, %v11422_v41 }
0x1be9   :  { %v15202_v45 = vpop.eup %15201 }
0x1bea   :  { %v15204_v42 = vpop.eup %15203  ;;  %v11447_v47 = vmul.f32 1.442695, %v11434_v43  ;;  %v11456_v48 = vsel %vm1619_vm3, %v15202_v45, 0.0 }
0x1beb   :  { %11457 = vadd.xlane.f32.xlu1 %v11456_v48  ;;  %v11465_v53 = vsel %vm1619_vm3, %v15204_v42, 0.0 }
0x1bec   :  { %15209 = vpow2.f32 %v11447_v47  ;;  %11466 = vadd.xlane.f32.xlu0 %v11465_v53 }
0x1bef   :  { %v11428_v56 = vpop.xlane.xlu1 %11427 }
0x1bf0   :  { %v11436_v54 = vsub.f32 %v11401_v13, %v11428_v56 }
0x1bf1   :  { %v15206_v44 = vpop.eup %15205 }
0x1bf2   :  { %v15208_v16 = vpop.eup %15207  ;;  %v11451_v50 = vmul.f32 1.442695, %v11436_v54  ;;  %v11462_v59 = vsel %vm1619_vm3, %v15206_v44, 0.0 }
0x1bf3   :  { %11463 = vadd.xlane.f32.xlu1 %v11462_v59  ;;  %v11471_v60 = vsel %vm1619_vm3, %v15208_v16, 0.0 }
0x1bf4   :  { %15211 = vpow2.f32 %v11451_v50  ;;  %11472 = vadd.xlane.f32.xlu0 %v11471_v60 }
0x1bf9   :  { %v15210_v2 = vpop.eup %15209 }
0x1bfa   :  { %v11468_v5 = vsel %vm1619_vm3, %v15210_v2, 0.0 }
0x1bfb   :  { %11469 = vadd.xlane.f32.xlu1 %v11468_v5 }
0x1c01   :  { %v16846_v9 = vpop.eup %15211 }
0x1c02   :  { %v11474_v62 = vsel %vm1619_vm3, %v16846_v9, 0.0 }
0x1c03   :  { %11475 = vadd.xlane.f32.xlu1 %v11474_v62 }
0x1c64   :  { %v11455_v58 = vpop.xlane.xlu0 %11454 }
0x1c65   :  { %15213 = vrcp.f32 %v11455_v58 }
0x1c6c   :  { %v11461_v63 = vpop.xlane.xlu0 %11460 }
0x1c6d   :  { %15215 = vrcp.f32 %v11461_v63 }
0x1c72   :  { %v15214_v3 = vpop.eup %15213 }
0x1c73   :  { %v11485_v15 = vmul.f32 %v15214_v3, %v15198_v28  ;;  %v379_v28 = vld [vmem:[%s16993_s21 + $0x10] sm:$0xf] }
0x1c74   :  { %v11458_v8 = vpop.xlane.xlu1 %11457  ;;  %v12089_v51 = vsel %vm2911_vm4, %v379_v28, 0 }
0x1c75   :  { %15217 = vrcp.f32 %v11458_v8  ;;  %v11467_v22 = vpop.xlane.xlu0 %11466  ;;  %14831 = vmatmul.mubr.msk.f32.vlgmr.msra.gmra.mxu0 %vm1619_vm3, %v11485_v15 }
0x1c76   :  { %15219 = vrcp.f32 %v11467_v22  ;;  %14839 = vmatpush3.msra.mxu0 %v10580_v46  ;;  %14840 = vmatprep.mubr.msk.f32.mxu0 %vm15245_vm0, %v15243_v0 }
0x1c77   :  { %14848 = vmatprep.subr.mxu0 %v15243_v0 }
0x1c7a   :  { %v15216_v57 = vpop.eup %15215 }
0x1c7b   :  { %v11487_v4 = vmul.f32 %v15216_v57, %v15200_v36 }
0x1c7c   :  { %v11464_v6 = vpop.xlane.xlu1 %11463 }
0x1c7d   :  { %15221 = vrcp.f32 %v11464_v6  ;;  %v11473_v7 = vpop.xlane.xlu0 %11472  ;;  %14841 = vmatmul.mubr.msk.f32.vlgmr.msra.gmra.mxu0 %vm1619_vm3, %v11487_v4 }
0x1c7e   :  { %15223 = vrcp.f32 %v11473_v7  ;;  %14849 = vmatpush3.msra.mxu0 %v16820_v55  ;;  %14850 = vmatprep.mubr.msk.f32.mxu0 %vm15245_vm0, %v15243_v0 }
0x1c7f   :  { %14858 = vmatprep.subr.mxu0 %v15243_v0 }
0x1c82   :  { %v15218_v13 = vpop.eup %15217 }
0x1c83   :  { %v15220_v20 = vpop.eup %15219  ;;  %v11486_v19 = vmul.f32 %v15218_v13, %v15202_v45 }
0x1c84   :  { %v11489_v11 = vmul.f32 %v15220_v20, %v15204_v42  ;;  %v11470_v10 = vpop.xlane.xlu1 %11469  ;;  %v12227_v42 = vsel %vm2911_vm4, %v382_v38, 0 }
0x1c85   :  { %15225 = vrcp.f32 %v11470_v10  ;;  %14836 = vmatmul.mubr.msk.f32.vlgmr.msra.gmra.mxu1 %vm1619_vm3, %v11486_v19 }
0x1c86   :  { %14844 = vmatpush3.msra.mxu1 %v10632_v25  ;;  %14851 = vmatmul.mubr.msk.f32.vlgmr.msra.gmra.mxu0 %vm1619_vm3, %v11489_v11 }
0x1c87   :  { %14859 = vmatpush3.msra.mxu0 %v10752_v12  ;;  %14845 = vmatprep.mubr.msk.f32.mxu1 %vm15245_vm0, %v15243_v0  ;;  %v13135_v12 = vld [vmem:[%s16994_s25 + $0x1] ss:$0 sm:$0xff] }
0x1c88   :  { %14853 = vmatprep.subr.mxu1 %v15243_v0  ;;  %14860 = vmatprep.mubr.msk.f32.mxu0 %vm15245_vm0, %v15243_v0 }
0x1c89   :  { %14868 = vmatprep.subr.bf16.mxu0 %v15243_v0 }
0x1c8a   :  { %v15222_v55 = vpop.eup %15221 }
0x1c8b   :  { %v15224_v61 = vpop.eup %15223  ;;  %v11488_v35 = vmul.f32 %v15222_v55, %v15206_v44 }
0x1c8c   :  { %v11491_v14 = vmul.f32 %v15224_v61, %v15208_v16  ;;  %v11476_v17 = vpop.xlane.xlu1 %11475 }
0x1c8d   :  { %15227 = vrcp.f32 %v11476_v17  ;;  %14846 = vmatmul.mubr.msk.f32.vlgmr.msra.gmra.mxu1 %vm1619_vm3, %v11488_v35 }
0x1c8e   :  { %14854 = vmatpush3.msra.mxu1 %v16827_v49  ;;  %14861 = vmatmul.mubr.msk.f32.vlgmr.msra.gmra.mxu0 %vm1619_vm3, %v11491_v14 }
0x1c8f   :  { %14855 = vmatprep.mubr.msk.f32.mxu1 %vm15245_vm0, %v15243_v0  ;;  %14863 = vmatprep.subr.mxu1 %v15243_v0 }
0x1c90   :  { %14870 = vmatprep.mubr.msk.bf16.mxu0 %vm15245_vm0, %v15243_v0  ;;  %14869 = vmatpush3.bf16.msra.mxu0 %v12089_v51 }
0x1c91   :  { %14880 = vmatprep.subr.bf16.mxu0 %v15243_v0 }
0x1c92   :  { %v15226_v18 = vpop.eup %15225 }
0x1c93   :  { %v11490_v21 = vmul.f32 %v15226_v18, %v15210_v2 }
0x1c95   :  { %14856 = vmatmul.mubr.msk.f32.vlgmr.msra.gmra.mxu1 %vm1619_vm3, %v11490_v21 }
0x1c96   :  { %14864 = vmatpush3.msra.mxu1 %v10792_v26  ;;  %14865 = vmatprep.mubr.msk.f32.mxu1 %vm15245_vm0, %v15243_v0 }
0x1c97   :  { %14874 = vmatprep.subr.bf16.mxu1 %v15243_v0 }
0x1c9a   :  { %v15228_v49 = vpop.eup %15227 }
0x1c9b   :  { %v11492_v27 = vmul.f32 %v15228_v49, %v16846_v9 }
0x1c9d   :  { %14866 = vmatmul.mubr.msk.f32.vlgmr.msra.gmra.mxu1 %vm1619_vm3, %v11492_v27 }
0x1c9e   :  { %14876 = vmatprep.mubr.msk.bf16.mxu1 %vm15245_vm0, %v15243_v0  ;;  %14875 = vmatpush3.bf16.msra.mxu1 %v12135_v31 }
0x1c9f   :  { %14886 = vmatprep.subr.bf16.mxu1 %v15243_v0 }
0x1d35   :  { %v11562_v24 = vpop.f32.mrf.mxu0 }
0x1d36   :  { %v12077_v33 = vpack.c.bf16 %v11562_v24, %v11562_v24 }
0x1d37   :  { %v14832_v34 = vpop.f32.mrf.mxu0 }
0x1d38   :  { %14871 = vmatmul.mubr.msk.bf16.vlgmr.msra.gmra.mxu0 %vm1619_vm3, %v12077_v33 }
0x1d39   :  { %14881 = vmatpush3.bf16.msra.mxu0 %v12181_v37  ;;  %14882 = vmatprep.mubr.msk.bf16.mxu0 %vm15245_vm0, %v15243_v0 }
0x1d3a   :  { %14892 = vmatprep.subr.bf16.mxu0 %v15243_v0 }
0x1d3d   :  { %v11708_v36 = vpop.f32.mrf.mxu0 }
0x1d3e   :  { %v12079_v39 = vpack.c.bf16 %v11708_v36, %v11708_v36 }
0x1d3f   :  { %v14842_v40 = vpop.f32.mrf.mxu0 }
0x1d40   :  { %14883 = vmatmul.mubr.msk.bf16.vlgmr.msra.gmra.mxu0 %vm1619_vm3, %v12079_v39 }
0x1d41   :  { %14893 = vmatpush3.bf16.msra.mxu0 %v12089_v51  ;;  %14894 = vmatprep.mubr.msk.bf16.mxu0 %vm15245_vm0, %v15243_v0 }
0x1d42   :  { %14904 = vmatprep.subr.bf16.mxu0 %v15243_v0 }
0x1d45   :  { %v11635_v41 = vpop.f32.mrf.mxu1 }
0x1d46   :  { %v12078_v43 = vpack.c.bf16 %v11635_v41, %v11635_v41  ;;  %v11854_v45 = vpop.f32.mrf.mxu0 }
0x1d47   :  { %v12081_v47 = vpack.c.bf16 %v11854_v45, %v11854_v45  ;;  %v14837_v48 = vpop.f32.mrf.mxu1 }
0x1d48   :  { %v14852_v53 = vpop.f32.mrf.mxu0  ;;  %14877 = vmatmul.mubr.msk.bf16.vlgmr.msra.gmra.mxu1 %vm1619_vm3, %v12078_v43 }
0x1d49   :  { %14895 = vmatmul.mubr.msk.bf16.vlgmr.msra.gmra.mxu0 %vm1619_vm3, %v12081_v47  ;;  %14887 = vmatpush3.bf16.msra.mxu1 %v12227_v42 }
0x1d4a   :  { %14905 = vmatpush3.bf16.msra.mxu0 %v12181_v37  ;;  %14888 = vmatprep.mubr.msk.bf16.mxu1 %vm15245_vm0, %v15243_v0 }
0x1d4b   :  { %14906 = vmatprep.mubr.msk.bf16.mxu0 %vm15245_vm0, %v15243_v0  ;;  %14898 = vmatprep.subr.bf16.mxu1 %v15243_v0 }
0x1d4c   :  { %14916 = vmatprep.subr.bf16.mxu0 %v15243_v0 }
0x1d4d   :  { %v11781_v56 = vpop.f32.mrf.mxu1 }
0x1d4e   :  { %v12080_v54 = vpack.c.bf16 %v11781_v56, %v11781_v56  ;;  %v12000_v44 = vpop.f32.mrf.mxu0 }
0x1d4f   :  { %v12083_v16 = vpack.c.bf16 %v12000_v44, %v12000_v44  ;;  %v14847_v50 = vpop.f32.mrf.mxu1 }
0x1d50   :  { %v14862_v59 = vpop.f32.mrf.mxu0  ;;  %14889 = vmatmul.mubr.msk.bf16.vlgmr.msra.gmra.mxu1 %vm1619_vm3, %v12080_v54  ;;  %v15071_v50 = vld [vmem:[%s16995_s29 + $0x18] sm:$0xff]  }
0x1d51   :  { %14907 = vmatmul.mubr.msk.bf16.vlgmr.msra.gmra.mxu0 %vm1619_vm3, %v12083_v16  ;;  %14899 = vmatpush3.bf16.msra.mxu1 %v12135_v31  ;;  %v15072_v59 = vld [vmem:[%s16995_s29 + $0x10] sm:$0xff]  }
0x1d52   :  { %14900 = vmatprep.mubr.msk.bf16.mxu1 %vm15245_vm0, %v15243_v0  ;;  %14910 = vmatprep.subr.bf16.mxu1 %v15243_v0 }
0x1d53   :  { %14920 = vmatprep.mubr.msk.bf16.mxu0 %vm15245_vm0, %v15243_v0  ;;  %14917 = vmatpush3.bf16.msra.mxu0 %v15071_v50 }
0x1d54   :  { %14918 = vmatprep.subr.bf16.mxu0 %v15243_v0 }
0x1d55   :  { %v11927_v60 = vpop.f32.mrf.mxu1 }
0x1d56   :  { %v12082_v2 = vpack.c.bf16 %v11927_v60, %v11927_v60  ;;  %v15073_v60 = vld [vmem:[%s16164_s16 + $0x38] sm:$0xff]  }
0x1d57   :  { %v14857_v5 = vpop.f32.mrf.mxu1  ;;  %14919 = vmatpush3.bf16.msra.mxu0 %v15072_v59 }
0x1d58   :  { %14901 = vmatmul.mubr.msk.bf16.vlgmr.msra.gmra.mxu1 %vm1619_vm3, %v12082_v2 }
0x1d59   :  { %14911 = vmatpush3.bf16.msra.mxu1 %v12227_v42  ;;  %14912 = vmatprep.mubr.msk.bf16.mxu1 %vm15245_vm0, %v15243_v0 }
0x1d5a   :  { %14924 = vmatprep.subr.bf16.mxu1 %v15243_v0 }
0x1d5d   :  { %v12073_v9 = vpop.f32.mrf.mxu1 }
0x1d5e   :  { %v12084_v62 = vpack.c.bf16 %v12073_v9, %v12073_v9 }
0x1d5f   :  { %v14867_v58 = vpop.f32.mrf.mxu1 }
0x1d60   :  { %14913 = vmatmul.mubr.msk.bf16.vlgmr.msra.gmra.mxu1 %vm1619_vm3, %v12084_v62 }
0x1d61   :  { %14932 = vmatprep.mubr.msk.bf16.mxu1 %vm15245_vm0, %v15243_v0  ;;  %14925 = vmatpush3.bf16.msra.mxu1 %v15073_v60 }
0x1d62   :  { %14926 = vmatprep.subr.bf16.mxu1 %v15243_v0 }
0x1df8   :  { %v12125_v63 = vpop.f32.mrf.mxu0 }
0x1dfa   :  { %v14872_v1 = vpop.f32.mrf.mxu0 }
0x1dfc   :  { %v12128_v3 = vpop.f32.mrf.mxu0 }
0x1dfe   :  { %v14873_v15 = vpop.f32.mrf.mxu0 }
0x1dff   :  { %v13136_v15 = vld [vmem:[%s16996_s3 + $0x1] ss:$0 sm:$0xff] }
0x1e00   :  { %v12217_v46 = vpop.f32.mrf.mxu0 }
0x1e02   :  { %v14884_v8 = vpop.f32.mrf.mxu0 }
0x1e04   :  { %v12220_v22 = vpop.f32.mrf.mxu0 }
0x1e06   :  { %v14885_v57 = vpop.f32.mrf.mxu0 }
0x1e07   :  { %v13137_v57 = vld [vmem:[%s16997_s8 + $0x1] ss:$0 sm:$0xff] }
0x1e08   :  { %v12171_v4 = vpop.f32.mrf.mxu1 }
0x1e09   :  { %v12306_v6 = vpop.f32.mrf.mxu0  ;;  %v12441_v52 = vadd.f32 %v12171_v4, %v12125_v63 }
0x1e0a   :  { %v14878_v7 = vpop.f32.mrf.mxu1 }
0x1e0b   :  { %v14896_v13 = vpop.f32.mrf.mxu0  ;;  %v12443_v10 = vadd.f32 %v12441_v52, %v12217_v46 }
0x1e0c   :  { %v12174_v20 = vpop.f32.mrf.mxu1  ;;  %v15074_v13 = vld [vmem:[%s16164_s16 + $0x30] sm:$0xff]  }
0x1e0d   :  { %v12309_v19 = vpop.f32.mrf.mxu0  ;;  %14927 = vmatpush3.bf16.msra.mxu1 %v15074_v13  ;;  %v15075_v20 = vld [vmem:[%s16164_s16 + $0x28] sm:$0xff]  }
0x1e0e   :  { %v14879_v25 = vpop.f32.mrf.mxu1  ;;  %14928 = vmatprep.subr.bf16.mxu1 %v15243_v0  ;;  %v15076_v19 = vld [vmem:[%s16164_s16 + $0x20] sm:$0xff]  }
0x1e0f   :  { %v14897_v11 = vpop.f32.mrf.mxu0  ;;  %v13138_v25 = vld [vmem:[%s16998_s14 + $0x1] ss:$0 sm:$0xff] }
0x1e10   :  { %v12263_v55 = vpop.f32.mrf.mxu1 }
0x1e11   :  { %v12445_v61 = vadd.f32 %v12443_v10, %v12263_v55  ;;  %v12392_v35 = vpop.f32.mrf.mxu0  ;;  %14929 = vmatpush3.bf16.msra.mxu1 %v15075_v20 }
0x1e12   :  { %v14890_v14 = vpop.f32.mrf.mxu1  ;;  %14930 = vmatprep.subr.bf16.mxu1 %v15243_v0 }
0x1e13   :  { %v12453_v17 = vadd.f32 %v13135_v12, %v12445_v61  ;;  %v14908_v18 = vpop.f32.mrf.mxu0 }
0x1e14   :  { %v12266_v21 = vpop.f32.mrf.mxu1 }
0x1e15   :  { %v12395_v26 = vpop.f32.mrf.mxu0  ;;  %v12455_v49 = vadd.f32 %v12453_v17, %v16583_v23  ;;  %14931 = vmatpush3.bf16.msra.mxu1 %v15076_v19  ;;  %v13142_v21 = vld [vmem:[%s16999_s18 + $0x1] ss:$0 sm:$0xff] }
0x1e16   :  { %v14891_v27 = vpop.f32.mrf.mxu1 }
0x1e17   :  { %v14909_v28 = vpop.f32.mrf.mxu0  ;;  %v12457_v51 = vsel %vm501_vm1, %v12455_v49, 0.0 }
0x1e18   :  { %v12349_v29 = vpop.f32.mrf.mxu1  ;;  %12458 = vadd.xlane.f32.xlu0 %v12457_v51 }
0x1e19   :  { %v12442_v32 = vadd.f32 %v12349_v29, %v12306_v6 }
0x1e1a   :  { %v14902_v31 = vpop.f32.mrf.mxu1 }
0x1e1b   :  { %v12444_v37 = vadd.f32 %v12442_v32, %v12392_v35 }
0x1e1c   :  { %v12352_v24 = vpop.f32.mrf.mxu1 }
0x1e1e   :  { %v14903_v33 = vpop.f32.mrf.mxu1 }
0x1e20   :  { %v12435_v34 = vpop.f32.mrf.mxu1 }
0x1e21   :  { %v12446_v36 = vadd.f32 %v12444_v37, %v12435_v34 }
0x1e22   :  { %v14914_v39 = vpop.f32.mrf.mxu1 }
0x1e23   :  { %v12454_v40 = vadd.f32 %v13135_v12, %v12446_v36 }
0x1e24   :  { %v12438_v38 = vpop.f32.mrf.mxu1 }
0x1e25   :  { %v12456_v41 = vadd.f32 %v12454_v40, %v16595_v30 }
0x1e26   :  { %v14915_v23 = vpop.f32.mrf.mxu1 }
0x1e27   :  { %v12460_v43 = vsel %vm501_vm1, %v12456_v41, 0.0 }
0x1e28   :  { %12461 = vadd.xlane.f32.xlu1 %v12460_v43 }
0x1ea1   :  { %v12459_v45 = vpop.xlane.xlu0 %12458 }
0x1ea2   :  { %v12463_v42 = vmul.f32 0.03125, %v12459_v45 }
0x1ea4   :  { %v12465_v47 = vsub.f32 %v12455_v49, %v12463_v42 }
0x1ea6   :  { %v12467_v48 = vmul.f32 %v12465_v47, %v12465_v47 }
0x1ea8   :  { %v12469_v53 = vsel %vm501_vm1, %v12467_v48, 0.0 }
0x1ea9   :  { %12470 = vadd.xlane.f32.xlu0 %v12469_v53 }
0x1eb1   :  { %v12462_v56 = vpop.xlane.xlu1 %12461 }
0x1eb2   :  { %v12464_v54 = vmul.f32 0.03125, %v12462_v56 }
0x1eb4   :  { %v12466_v44 = vsub.f32 %v12456_v41, %v12464_v54 }
0x1eb6   :  { %v12468_v16 = vmul.f32 %v12466_v44, %v12466_v44 }
0x1eb8   :  { %v12472_v30 = vsel %vm501_vm1, %v12468_v16, 0.0 }
0x1eb9   :  { %12473 = vadd.xlane.f32.xlu1 %v12472_v30  ;;  %v13149_v30 = vld [vmem:[%s16224_s5 + $0x1] ss:$0 sm:$0xff] }
0x1f32   :  { %v12471_v2 = vpop.xlane.xlu0 %12470 }
0x1f33   :  { %v12475_v5 = vmul.f32 0.03125, %v12471_v2 }
0x1f35   :  { %v12477_v9 = vadd.f32 1e-05, %v12475_v5  ;;  %v15241_v5 = vld [vmem:[%s17000_s23] sm:$0xff] }
0x1f37   :  { %15229 = vrsqrt.f32 %v12477_v9 }
0x1f42   :  { %v12474_v62 = vpop.xlane.xlu1 %12473 }
0x1f43   :  { %v12476_v58 = vmul.f32 0.03125, %v12474_v62 }
0x1f44   :  { %v15230_v1 = vpop.eup %15229 }
0x1f45   :  { %v12478_v63 = vadd.f32 1e-05, %v12476_v58  ;;  %v12481_v3 = vmul.f32 %v15230_v1, %v12465_v47 }
0x1f47   :  { %15231 = vrsqrt.f32 %v12478_v63  ;;  %v12489_v8 = vmul.f32 %v13136_v15, %v12481_v3  ;;  %v15242_v63 = vld [vmem:[%s17000_s23 + $0x8] sm:$0xff] }
0x1f49   :  { %v12497_v6 = vadd.f32 %v13137_v57, %v12489_v8 }
0x1f54   :  { %v15232_v46 = vpop.eup %15231 }
0x1f55   :  { %v12482_v22 = vmul.f32 %v15232_v46, %v12466_v44  ;;  %v13148_v44 = vld [vmem:[%s16219_s22 + $0x1] ss:$0 sm:$0xff] }
0x1f57   :  { %v12490_v4 = vmul.f32 %v13136_v15, %v12482_v22 }
0x1f59   :  { %v12498_v7 = vadd.f32 %v13137_v57, %v12490_v4 }
0x1f5b   :  { %v12499_v52 = vpack.c.bf16 %v12498_v7, %v12497_v6 }
0x1f5d   :  { %14921 = vmatmul.mubr.msk.bf16.vlgmr.msra.gmra.mxu0 %vm501_vm1, %v12499_v52 }
0x201d   :  { %v12555_v11 = vpop.f32.mrf.mxu0 }
0x201e   :  { %v12556_v12 = vadd.f32 %v13138_v25, %v12555_v11 }
0x201f   :  { %v14922_v10 = vpop.f32.mrf.mxu0 }
0x2020   :  { %v12562_v14 = vmax.f32 %v12556_v12, 0.0 }
0x2021   :  { %v12558_v55 = vpop.f32.mrf.mxu0 }
0x2022   :  { %v12559_v61 = vadd.f32 %v13138_v25, %v12558_v55 }
0x2023   :  { %v14923_v35 = vpop.f32.mrf.mxu0 }
0x2024   :  { %v12563_v17 = vmax.f32 %v12559_v61, 0.0 }
0x2026   :  { %v12564_v18 = vpack.c.bf16 %v12563_v17, %v12562_v14 }
0x2028   :  { %14933 = vmatmul.mubr.msk.bf16.vlgmr.msra.gmra.mxu1 %vm3420_vm5, %v12564_v18 }
0x20e8   :  { %v12632_v26 = vpop.f32.mrf.mxu1 }
0x20e9   :  { %v12633_v49 = vadd.f32 %v13142_v21, %v12632_v26 }
0x20ea   :  { %v14934_v27 = vpop.f32.mrf.mxu1 }
0x20eb   :  { %v12639_v28 = vadd.f32 %v12633_v49, %v12497_v6 }
0x20ec   :  { %v12635_v0 = vpop.f32.mrf.mxu1 }
0x20ed   :  { %v12636_v51 = vadd.f32 %v13142_v21, %v12635_v0  ;;  %v12641_v29 = vsel %vm501_vm1, %v12639_v28, 0.0 }
0x20ee   :  { %12642 = vadd.xlane.f32.xlu0 %v12641_v29  ;;  %v14935_v31 = vpop.f32.mrf.mxu1 }
0x20ef   :  { %v12640_v32 = vadd.f32 %v12636_v51, %v12498_v7 }
0x20f1   :  { %v12644_v24 = vsel %vm501_vm1, %v12640_v32, 0.0 }
0x20f2   :  { %12645 = vadd.xlane.f32.xlu1 %v12644_v24 }
0x2177   :  { %v12643_v33 = vpop.xlane.xlu0 %12642 }
0x2178   :  { %v12647_v37 = vmul.f32 0.03125, %v12643_v33 }
0x217a   :  { %v12649_v34 = vsub.f32 %v12639_v28, %v12647_v37 }
0x217b   :  { %v12646_v36 = vpop.xlane.xlu1 %12645 }
0x217c   :  { %v12648_v39 = vmul.f32 0.03125, %v12646_v36  ;;  %v12651_v40 = vmul.f32 %v12649_v34, %v12649_v34 }
0x217e   :  { %v12650_v38 = vsub.f32 %v12640_v32, %v12648_v39  ;;  %v12653_v41 = vsel %vm501_vm1, %v12651_v40, 0.0 }
0x217f   :  { %12654 = vadd.xlane.f32.xlu0 %v12653_v41 }
0x2180   :  { %v12652_v23 = vmul.f32 %v12650_v38, %v12650_v38 }
0x2182   :  { %v12656_v43 = vsel %vm501_vm1, %v12652_v23, 0.0 }
0x2183   :  { %12657 = vadd.xlane.f32.xlu1 %v12656_v43 }
0x2208   :  { %v12655_v45 = vpop.xlane.xlu0 %12654 }
0x2209   :  { %v12659_v42 = vmul.f32 0.03125, %v12655_v45 }
0x220b   :  { %v12661_v47 = vadd.f32 1e-05, %v12659_v42 }
0x220c   :  { %v12658_v48 = vpop.xlane.xlu1 %12657 }
0x220d   :  { %15233 = vrsqrt.f32 %v12661_v47  ;;  %v12660_v53 = vmul.f32 0.03125, %v12658_v48 }
0x220f   :  { %v12662_v56 = vadd.f32 1e-05, %v12660_v53 }
0x2211   :  { %15235 = vrsqrt.f32 %v12662_v56 }
0x221a   :  { %v15234_v54 = vpop.eup %15233 }
0x221b   :  { %v12665_v16 = vmul.f32 %v15234_v54, %v12649_v34 }
0x221d   :  { %v12673_v50 = vmul.f32 %v13148_v44, %v12665_v16 }
0x221e   :  { %v15236_v59 = vpop.eup %15235 }
0x221f   :  { %v12681_v60 = vadd.f32 %v13149_v30, %v12673_v50  ;;  %v12666_v2 = vmul.f32 %v15236_v59, %v12650_v38 }
0x2221   :  { %v12683_v9 = vadd.f32 %v15241_v5, %v12681_v60  ;;  %v12674_v62 = vmul.f32 %v13148_v44, %v12666_v2 }
0x2223   :  { %12685 = vst.msk [vmem:[%s12725_s17] sm:$0xff] %vm501_vm1, %v12683_v9  ;;  %v12682_v58 = vadd.f32 %v13149_v30, %v12674_v62 }
0x2225   :  { %v12684_v1 = vadd.f32 %v15242_v63, %v12682_v58 }
0x2227   :  { %12686 = vst.msk [vmem:[%s12725_s17 + $0x8] sm:$0xff] %vm501_vm1, %v12684_v1 }

</bundles_post_ra>
